<compile_context>
chip_gen: v7x
topology: tpu7x:2x2x1
jax: 0.10.0
libtpu: 0.0.40
codegen_flags: <defaults>
</compile_context>

<pallas_src>
import functools
import math

import jax
import jax.numpy as jnp
from jax.experimental import pallas as pl
from jax.experimental.pallas import tpu as pltpu

KERNEL_SIZE = 5
BN_EPS = 1e-5


def _vmem_spec():
    # whole array resident in VMEM (shapes here are tiny; total < 2 MiB)
    return pl.BlockSpec(memory_space=pltpu.MemorySpace.VMEM)


# ------------------------------------------------------------------ kernel ---

def _refiner_kernel(xg_ref, y_ref, s_ref, disp_ref, rowm_ref, colm_ref,
                    emb_w_ref, emb_b_ref,
                    w5_ref, gamma_ref, beta_ref, w2_ref, b2_ref,
                    ow_ref, ob_ref,
                    out_ref,
                    stack_scr,
                    *, img_w):
    n = out_ref.shape[-1]                   # B * H * W (lane axis, 512 here)
    n_blocks, ch, _ = gamma_ref.shape       # (4, hidden_dim, 1)
    c_feat = xg_ref.shape[0]
    emb_dim = emb_w_ref.shape[0]
    k = KERNEL_SIZE
    r = k // 2

    # x_hat = grid_sample(y, flow) as a dense bilinear bf16 matmul on the MXU.
    x_hat = jnp.dot(y_ref[...], s_ref[...], preferred_element_type=jnp.float32)

    # displacement embedding (1x1 conv, K=2 -> keep f32): (emb_dim,2)@(2,N)+b
    emb = (jnp.dot(emb_w_ref[...], disp_ref[...],
                   preferred_element_type=jnp.float32) + emb_b_ref[...])

    # block-1 input [grid_feature ; x_hat ; disp_emb ; zero pad] built in vregs
    pad = ch - 2 * c_feat - emb_dim
    pieces = [xg_ref[...], x_hat, emb]
    if pad > 0:
        pieces.append(jnp.zeros((pad, n), jnp.float32))
    d = jnp.concatenate(pieces, axis=0)                       # (ch, N) f32

    # hoist the (1, N) row / column validity masks once (reused by all blocks)
    row_m = [rowm_ref[pl.ds(ky, 1), :] for ky in range(k)]
    col_m = [colm_ref[pl.ds(kx, 1), :] for kx in range(k)]

    for blk in range(n_blocks):
        # --- separable im2col, dy pass ------------------------------------
        # 5 lane-rolls of d (by dy*W), row-masked in f32, stored bf16 into the
        # (5*ch, N) stack scratch. (Conv bias omitted: a per-channel constant
        # is exactly cancelled by the train-mode BatchNorm mean subtraction.)
        for ky in range(k):
            off = (ky - r) * img_w
            shifted = d if off == 0 else pltpu.roll(d, (-off) % n, axis=1)
            stack_scr[pl.ds(ky * ch, ch), :] = (
                shifted * row_m[ky]).astype(jnp.bfloat16)

        # --- separable im2col, dx pass ------------------------------------
        # 5 MXU matmuls (ch, 5*ch) @ (5*ch, N); each partial is lane-rolled by
        # -dx and masked by the dx column mask before accumulation.
        acc = jnp.zeros((ch, n), jnp.float32)
        for kx in range(k):
            dx = kx - r
            part = jnp.dot(w5_ref[blk, kx], stack_scr[...],
                           preferred_element_type=jnp.float32)     # (ch, N)
            if dx != 0:
                part = pltpu.roll(part, (-dx) % n, axis=1)
            acc = acc + part * col_m[kx]

        # train-mode BatchNorm2d: stats over (B, H, W) == lane axis, biased var
        mean = jnp.mean(acc, axis=1, keepdims=True)
        var = jnp.mean(jnp.square(acc - mean), axis=1, keepdims=True)
        h = (acc - mean) * jax.lax.rsqrt(var + BN_EPS)
        h = h * gamma_ref[blk] + beta_ref[blk]
        h = jnp.maximum(h, 0.0)                                    # ReLU

        # 1x1 conv (+ bias), bf16 operands, f32 accumulate
        d = (jnp.dot(w2_ref[blk], h.astype(jnp.bfloat16),
                     preferred_element_type=jnp.float32) + b2_ref[blk])

    # out_conv (1x1): (out_dim, ch) @ (ch, N) + bias
    out_ref[...] = (jnp.dot(ow_ref[...], d.astype(jnp.bfloat16),
                            preferred_element_type=jnp.float32)
                    + ob_ref[...]).astype(out_ref.dtype)


# --------------------------------------------------------------- XLA glue ----

def _bilinear_matrix(grid_xy, h_src, w_src):
    """Dense bilinear-sampling matrix S of shape (B*Hs*Ws, B*Hg*Wg) such that
    sampled_cn = img_cn @ S reproduces F.grid_sample(img, grid, bilinear,
    align_corners=False, padding_mode='zeros'). Built from iota/one-hot ops
    only (no gather); block-diagonal across the batch."""
    # TODO(synk): at production ng>=64 replace by a scalar-prefetched 4-corner
    # gather (indices + weights in SMEM) -- the dense matrix is O(N^2).
    B, Hg, Wg, _ = grid_xy.shape
    nd, ns = Hg * Wg, h_src * w_src
    gx = grid_xy[..., 0].reshape(B * nd)
    gy = grid_xy[..., 1].reshape(B * nd)
    bidx = jnp.repeat(jnp.arange(B, dtype=jnp.int32), nd)
    ix = ((gx + 1.0) * w_src - 1.0) * 0.5
    iy = ((gy + 1.0) * h_src - 1.0) * 0.5
    x0 = jnp.floor(ix)
    y0 = jnp.floor(iy)
    x1 = x0 + 1.0
    y1 = y0 + 1.0
    wx1 = ix - x0
    wx0 = 1.0 - wx1
    wy1 = iy - y0
    wy0 = 1.0 - wy1

    def corner(xc, yc, w):
        valid = (xc >= 0) & (xc <= w_src - 1) & (yc >= 0) & (yc <= h_src - 1)
        xi = jnp.clip(xc, 0, w_src - 1).astype(jnp.int32)
        yi = jnp.clip(yc, 0, h_src - 1).astype(jnp.int32)
        src = bidx * ns + yi * w_src + xi
        wgt = jnp.where(valid, w, 0.0)
        return wgt[:, None] * jax.nn.one_hot(src, B * ns, dtype=jnp.float32)

    s_ds = (corner(x0, y0, wx0 * wy0) + corner(x1, y0, wx1 * wy0)
            + corner(x0, y1, wx0 * wy1) + corner(x1, y1, wx1 * wy1))
    return s_ds.T                                    # (B*Hs*Ws, B*Hg*Wg)


def _sep_masks(B, H, W, k=KERNEL_SIZE):
    """Separable validity masks for the roll-based im2col (zero padding):
    row_masks[ky] (5, B*H*W) and col_masks[kx] (5, B*H*W)."""
    n = B * H * W
    p = jnp.arange(n, dtype=jnp.int32)
    yy = (p // W) % H
    xx = p % W
    r = k // 2
    row = jnp.stack([(yy + (ky - r) >= 0) & (yy + (ky - r) < H) for ky in range(k)])
    col = jnp.stack([(xx + (kx - r) >= 0) & (xx + (kx - r) < W) for kx in range(k)])
    return row.astype(jnp.float32), col.astype(jnp.float32)


def _pack_params(params, hidden_dim):
    """PyTorch-layout params -> lane-dense, separable, bf16 kernel layout.
    Conv 5x5 weight (Cout, Cin, kH, kW) -> (kW, Cout, kH*hidden_dim) with
    column index ky*hidden_dim + c (Cin zero-padded to hidden_dim), so each
    [kx] slice contracts against the dy-rolled stack."""
    def pack_conv5(w):
        cout, cin = w.shape[0], w.shape[1]
        assert cin <= hidden_dim
        w = jnp.transpose(w, (3, 0, 2, 1))                      # (kx, co, ky, ci)
        w = jnp.pad(w, ((0, 0), (0, 0), (0, 0), (0, hidden_dim - cin)))
        return w.reshape(KERNEL_SIZE, cout, KERNEL_SIZE * hidden_dim)

    blocks = [params["block1"]] + list(params["hidden_blocks"])
    return dict(
        w5=jnp.stack([pack_conv5(b["conv1_w"]) for b in blocks]).astype(jnp.bfloat16),
        gamma=jnp.stack([b["bn_gamma"].reshape(-1, 1) for b in blocks]),
        beta=jnp.stack([b["bn_beta"].reshape(-1, 1) for b in blocks]),
        w2=jnp.stack([b["conv2_w"][:, :, 0, 0] for b in blocks]).astype(jnp.bfloat16),
        b2=jnp.stack([b["conv2_b"].reshape(-1, 1) for b in blocks]),
        emb_w=params["disp_emb_w"][:, :, 0, 0],
        emb_b=params["disp_emb_b"].reshape(-1, 1),
        out_w=params["out_w"][:, :, 0, 0].astype(jnp.bfloat16),
        out_b=params["out_b"].reshape(-1, 1),
    )
    # note: conv1 biases are NOT packed — train-mode BN cancels them exactly.


# ----------------------------------------------------------------- forward ---

def conv_refiner_forward(params, num_grid, x, y, flow, scale_factor=1.0):
    """ConvRefiner.forward (has_displacement_emb=True, corr_in_other=None).
    x, y: (B, C, H, W) NCHW feature maps; flow: (B, 2, num_grid, num_grid).
    Returns (displacement (B,2,ng,ng), certainty (B,1,ng,ng), local_corr=None)."""
    B, C, Hs, Ws = x.shape
    ng = num_grid
    N = B * ng * ng
    hidden_dim = params["block1"]["conv2_w"].shape[0]
    out_dim = params["out_w"].shape[0]
    emb_dim = params["disp_emb_w"].shape[0]
    packed = _pack_params(params, hidden_dim)
    n_blocks = packed["w5"].shape[0]

    def to_cn(a):   # (B, C, H, W) -> (C, B*H*W)  lane-dense
        return jnp.transpose(a, (1, 0, 2, 3)).reshape(a.shape[1], -1)

    # regular pixel-center grid of image-A coordinates (ch0 = x, ch1 = y)
    lin = jnp.linspace(-1.0 + 1.0 / ng, 1.0 - 1.0 / ng, ng, dtype=jnp.float32)
    gy_c, gx_c = jnp.meshgrid(lin, lin, indexing="ij")
    im_A_coords = jnp.broadcast_to(jnp.stack((gx_c, gy_c))[None], (B, 2, ng, ng))

    # grid_feature: with align_corners=False the pixel-center grid samples x
    # exactly -> identity (no gather).  Fall back to a bilinear-resize matrix
    # if x is not at num_grid resolution.
    if (Hs, Ws) == (ng, ng):
        xg_cn = to_cn(x)
    else:
        grid_xy = jnp.broadcast_to(jnp.stack((gx_c, gy_c), axis=-1)[None], (B, ng, ng, 2))
        xg_cn = jnp.dot(to_cn(x), _bilinear_matrix(grid_xy, Hs, Ws))

    y_cn = to_cn(y).astype(jnp.bfloat16)
    S = _bilinear_matrix(jnp.transpose(flow, (0, 2, 3, 1)), Hs, Ws
                         ).astype(jnp.bfloat16)                  # (B*Hs*Ws, N)
    disp_cn = to_cn((40.0 / 32.0) * scale_factor * (flow - im_A_coords))
    row_masks, col_masks = _sep_masks(B, ng, ng)

    kernel_inputs = (xg_cn, y_cn, S, disp_cn, row_masks, col_masks,
                     packed["emb_w"], packed["emb_b"],
                     packed["w5"], packed["gamma"], packed["beta"],
                     packed["w2"], packed["b2"],
                     packed["out_w"], packed["out_b"])

    k2 = KERNEL_SIZE * KERNEL_SIZE
    flops = (2 * C * y_cn.shape[1] * N                       # bilinear sampling matmul
             + 2 * emb_dim * 2 * N                           # disp embedding
             + n_blocks * (2 * hidden_dim * k2 * hidden_dim * N
                           + 2 * hidden_dim * hidden_dim * N)
             + 2 * out_dim * hidden_dim * N)
    bytes_accessed = (sum(int(a.size) * a.dtype.itemsize for a in kernel_inputs)
                      + out_dim * N * 4)

    out = pl.pallas_call(
        functools.partial(_refiner_kernel, img_w=ng),
        out_shape=jax.ShapeDtypeStruct((out_dim, N), jnp.float32),
        in_specs=[_vmem_spec()] * len(kernel_inputs),
        out_specs=_vmem_spec(),
        scratch_shapes=[
            pltpu.VMEM((KERNEL_SIZE * hidden_dim, N), jnp.bfloat16),  # dy-stack
        ],
        cost_estimate=pl.CostEstimate(
            flops=int(flops),
            transcendentals=int(n_blocks * hidden_dim),
            bytes_accessed=int(bytes_accessed)),
    )(*kernel_inputs)

    d = jnp.transpose(out.reshape(out_dim, B, ng, ng), (1, 0, 2, 3))   # NCHW
    displacement, certainty = d[:, :2], d[:, 2:3]
    return displacement, certainty, None        # corr_in_other is None


# ---------------------------------------------------- pure-JAX reference -----

def _grid_sample_ref(img, grid):
    B, C, H, W = img.shape
    Hg, Wg = grid.shape[1], grid.shape[2]
    gx, gy = grid[..., 0], grid[..., 1]
    ix = ((gx + 1.0) * W - 1.0) * 0.5
    iy = ((gy + 1.0) * H - 1.0) * 0.5
    x0 = jnp.floor(ix); y0 = jnp.floor(iy)
    x1 = x0 + 1.0; y1 = y0 + 1.0
    wx1 = ix - x0; wx0 = 1.0 - wx1
    wy1 = iy - y0; wy0 = 1.0 - wy1
    img_flat = img.reshape(B, C, H * W)

    def corner(xc, yc):
        valid = ((xc >= 0) & (xc <= W - 1) & (yc >= 0) & (yc <= H - 1)).astype(img.dtype)
        xi = jnp.clip(xc, 0, W - 1).astype(jnp.int32)
        yi = jnp.clip(yc, 0, H - 1).astype(jnp.int32)
        idx = (yi * W + xi).reshape(B, -1)
        vals = jax.vmap(lambda im, ind: jnp.take(im, ind, axis=1))(img_flat, idx)
        return vals.reshape(B, C, Hg, Wg) * valid[:, None]

    return (corner(x0, y0) * (wx0 * wy0)[:, None] + corner(x1, y0) * (wx1 * wy0)[:, None]
            + corner(x0, y1) * (wx0 * wy1)[:, None] + corner(x1, y1) * (wx1 * wy1)[:, None])


def _block_ref(d, blk):
    acc = jax.lax.conv_general_dilated(
        d, blk["conv1_w"], (1, 1), "SAME",
        dimension_numbers=("NCHW", "OIHW", "NCHW"),
        precision=jax.lax.Precision.HIGHEST) + blk["conv1_b"][None, :, None, None]
    mean = jnp.mean(acc, axis=(0, 2, 3), keepdims=True)
    var = jnp.mean(jnp.square(acc - mean), axis=(0, 2, 3), keepdims=True)
    h = (acc - mean) * jax.lax.rsqrt(var + BN_EPS)
    h = h * blk["bn_gamma"][None, :, None, None] + blk["bn_beta"][None, :, None, None]
    h = jnp.maximum(h, 0.0)
    return (jnp.einsum("oi,bihw->bohw", blk["conv2_w"][:, :, 0, 0], h,
                       precision=jax.lax.Precision.HIGHEST)
            + blk["conv2_b"][None, :, None, None])


def conv_refiner_reference(params, num_grid, x, y, flow, scale_factor=1.0):
    b = x.shape[0]
    x_hat = _grid_sample_ref(y, jnp.transpose(flow, (0, 2, 3, 1)))
    lin = jnp.linspace(-1.0 + 1.0 / num_grid, 1.0 - 1.0 / num_grid, num_grid,
                       dtype=jnp.float32)
    gy_c, gx_c = jnp.meshgrid(lin, lin, indexing="ij")
    im_A_coords = jnp.broadcast_to(jnp.stack((gx_c, gy_c))[None], (b, 2, num_grid, num_grid))
    grid_feature = _grid_sample_ref(x, jnp.transpose(im_A_coords, (0, 2, 3, 1)))
    in_disp = (40.0 / 32.0) * scale_factor * (flow - im_A_coords)
    emb = (jnp.einsum("oi,bihw->bohw", params["disp_emb_w"][:, :, 0, 0], in_disp,
                      precision=jax.lax.Precision.HIGHEST)
           + params["disp_emb_b"][None, :, None, None])
    d = jnp.concatenate((grid_feature, x_hat, emb), axis=1)
    for blk in [params["block1"]] + list(params["hidden_blocks"]):
        d = _block_ref(d, blk)
    d = (jnp.einsum("oi,bihw->bohw", params["out_w"][:, :, 0, 0], d,
                    precision=jax.lax.Precision.HIGHEST)
         + params["out_b"][None, :, None, None])
    return d[:, :2], d[:, 2:3], None


# ------------------------------------------------------------------ params ---

def _conv_init(key, cout, cin, k):
    kw, kb = jax.random.split(key)
    bound = 1.0 / math.sqrt(cin * k * k)
    w = jax.random.uniform(kw, (cout, cin, k, k), jnp.float32, -bound, bound)
    b = jax.random.uniform(kb, (cout,), jnp.float32, -bound, bound)
    return w, b


def init_block_params(key, cin, cout):
    k1, k2 = jax.random.split(key)
    w1, b1 = _conv_init(k1, cout, cin, KERNEL_SIZE)
    w2, b2 = _conv_init(k2, cout, cout, 1)
    return {"conv1_w": w1, "conv1_b": b1,
            "bn_gamma": jnp.ones((cout,), jnp.float32),
            "bn_beta": jnp.zeros((cout,), jnp.float32),
            "conv2_w": w2, "conv2_b": b2}


def init_params(key, c_feat=4, disp_emb_dim=4, hidden_dim=16, out_dim=3, hidden_blocks=3):
    in_dim = 2 * c_feat + disp_emb_dim
    keys = jax.random.split(key, 3 + hidden_blocks)
    emb_w, emb_b = _conv_init(keys[0], disp_emb_dim, 2, 1)
    out_w, out_b = _conv_init(keys[2 + hidden_blocks], out_dim, hidden_dim, 1)
    return {
        "disp_emb_w": emb_w, "disp_emb_b": emb_b,
        "block1": init_block_params(keys[1], in_dim, hidden_dim),
        "hidden_blocks": [init_block_params(keys[2 + i], hidden_dim, hidden_dim)
                          for i in range(hidden_blocks)],
        "out_w": out_w, "out_b": out_b,
    }


# -------------------------------------------------------------------- main ---

if __name__ == "__main__":
    B, C, NG = 2, 4, 16

    key = jax.random.PRNGKey(0)
    kp, kx, ky_, kf = jax.random.split(key, 4)

    params = init_params(kp, c_feat=C)
    x = jax.random.normal(kx, (B, C, NG, NG), jnp.float32)
    y = jax.random.normal(ky_, (B, C, NG, NG), jnp.float32)

    # flow = regular grid + small perturbation (stays mostly in-bounds)
    lin = jnp.linspace(-1.0 + 1.0 / NG, 1.0 - 1.0 / NG, NG, dtype=jnp.float32)
    gy_c, gx_c = jnp.meshgrid(lin, lin, indexing="ij")
    base = jnp.broadcast_to(jnp.stack((gx_c, gy_c))[None], (B, 2, NG, NG))
    flow = base + 0.05 * jax.random.normal(kf, (B, 2, NG, NG), jnp.float32)

    fwd = jax.jit(conv_refiner_forward, static_argnums=(1,))
    displacement, certainty, local_corr = fwd(params, NG, x, y, flow)
    jax.block_until_ready((displacement, certainty))

    assert displacement.shape == (B, 2, NG, NG), displacement.shape
    assert certainty.shape == (B, 1, NG, NG), certainty.shape
    assert local_corr is None
    assert bool(jnp.all(jnp.isfinite(displacement)))
    assert bool(jnp.all(jnp.isfinite(certainty)))

    # correctness vs. pure-JAX reference (gather grid_sample + lax.conv + train BN)
    # bf16 matmul operands in the kernel -> tolerance ~1e-1 max / 3e-2 mean.
    ref_d, ref_c, _ = jax.jit(conv_refiner_reference, static_argnums=(1,))(
        params, NG, x, y, flow)
    diff = jnp.concatenate([(displacement - ref_d).ravel(),
                            (certainty - ref_c).ravel()])
    err_max = float(jnp.max(jnp.abs(diff)))
    err_mean = float(jnp.mean(jnp.abs(diff)))
    assert err_max < 0.10, f"max abs err vs reference = {err_max}"
    assert err_mean < 0.03, f"mean abs err vs reference = {err_mean}"

    print("KERNEL_OK")
</pallas_src>

<mosaic_0001>
module attributes {stable_mosaic.version = 11 : i64} {
  func.func @_refiner_kernel(%arg0: memref<4x512xf32, #tpu.memory_space<vmem>>, %arg1: memref<4x512xbf16, #tpu.memory_space<vmem>>, %arg2: memref<512x512xbf16, #tpu.memory_space<vmem>>, %arg3: memref<2x512xf32, #tpu.memory_space<vmem>>, %arg4: memref<5x512xf32, #tpu.memory_space<vmem>>, %arg5: memref<5x512xf32, #tpu.memory_space<vmem>>, %arg6: memref<4x2xf32, #tpu.memory_space<vmem>>, %arg7: memref<4x1xf32, #tpu.memory_space<vmem>>, %arg8: memref<4x5x16x80xbf16, #tpu.memory_space<vmem>>, %arg9: memref<4x16x1xf32, #tpu.memory_space<vmem>>, %arg10: memref<4x16x1xf32, #tpu.memory_space<vmem>>, %arg11: memref<4x16x16xbf16, #tpu.memory_space<vmem>>, %arg12: memref<4x16x1xf32, #tpu.memory_space<vmem>>, %arg13: memref<3x16xbf16, #tpu.memory_space<vmem>>, %arg14: memref<3x1xf32, #tpu.memory_space<vmem>>, %arg15: memref<3x512xf32, #tpu.memory_space<vmem>>, %arg16: memref<80x512xbf16, #tpu.memory_space<vmem>>) attributes {dimension_semantics = [], scalar_prefetch = 0 : i64, scratch_operands = 1 : i64, tpu.core_type = #tpu.core_type<tc>} {
    %c0 = arith.constant 0 : index
    %c0_0 = arith.constant 0 : index
    %0 = vector.load %arg1[%c0, %c0_0] : memref<4x512xbf16, #tpu.memory_space<vmem>>, vector<4x512xbf16>
    %c0_1 = arith.constant 0 : index
    %c0_2 = arith.constant 0 : index
    %1 = vector.load %arg2[%c0_1, %c0_2] : memref<512x512xbf16, #tpu.memory_space<vmem>>, vector<512x512xbf16>
    %cst = arith.constant dense<0.000000e+00> : vector<4x512xf32>
    %2 = tpu.matmul %0, %1, %cst {dimension_numbers = #tpu.dot_dimension_numbers<[1], [0], [0], [1], [0, 0, 1, 1], [], []>} : vector<4x512xbf16>, vector<512x512xbf16>, vector<4x512xf32> -> vector<4x512xf32>
    %c0_3 = arith.constant 0 : index
    %c0_4 = arith.constant 0 : index
    %3 = vector.load %arg6[%c0_3, %c0_4] : memref<4x2xf32, #tpu.memory_space<vmem>>, vector<4x2xf32>
    %c0_5 = arith.constant 0 : index
    %c0_6 = arith.constant 0 : index
    %4 = vector.load %arg3[%c0_5, %c0_6] : memref<2x512xf32, #tpu.memory_space<vmem>>, vector<2x512xf32>
    %cst_7 = arith.constant dense<0.000000e+00> : vector<4x512xf32>
    %5 = tpu.matmul %3, %4, %cst_7 {dimension_numbers = #tpu.dot_dimension_numbers<[1], [0], [0], [1], [0, 0, 1, 1], [], []>} : vector<4x2xf32>, vector<2x512xf32>, vector<4x512xf32> -> vector<4x512xf32>
    %c0_8 = arith.constant 0 : index
    %c0_9 = arith.constant 0 : index
    %6 = vector.load %arg7[%c0_8, %c0_9] : memref<4x1xf32, #tpu.memory_space<vmem>>, vector<4x1xf32>
    %7 = vector.broadcast %6 : vector<4x1xf32> to vector<4x512xf32>
    %8 = arith.addf %5, %7 : vector<4x512xf32>
    %c0_10 = arith.constant 0 : index
    %c0_11 = arith.constant 0 : index
    %9 = vector.load %arg0[%c0_10, %c0_11] : memref<4x512xf32, #tpu.memory_space<vmem>>, vector<4x512xf32>
    %cst_12 = arith.constant 0.000000e+00 : f32
    %10 = vector.broadcast %cst_12 : f32 to vector<4x512xf32>
    %11 = tpu.concatenate %9, %2, %8, %10 in 0 : vector<4x512xf32>, vector<4x512xf32>, vector<4x512xf32>, vector<4x512xf32> -> vector<16x512xf32>
    %c0_13 = arith.constant 0 : index
    %c0_14 = arith.constant 0 : index
    %12 = vector.load %arg4[%c0_13, %c0_14] : memref<5x512xf32, #tpu.memory_space<vmem>>, vector<1x512xf32>
    %c1 = arith.constant 1 : index
    %c0_15 = arith.constant 0 : index
    %13 = vector.load %arg4[%c1, %c0_15] : memref<5x512xf32, #tpu.memory_space<vmem>>, vector<1x512xf32>
    %c2 = arith.constant 2 : index
    %c0_16 = arith.constant 0 : index
    %14 = vector.load %arg4[%c2, %c0_16] : memref<5x512xf32, #tpu.memory_space<vmem>>, vector<1x512xf32>
    %c3 = arith.constant 3 : index
    %c0_17 = arith.constant 0 : index
    %15 = vector.load %arg4[%c3, %c0_17] : memref<5x512xf32, #tpu.memory_space<vmem>>, vector<1x512xf32>
    %c4 = arith.constant 4 : index
    %c0_18 = arith.constant 0 : index
    %16 = vector.load %arg4[%c4, %c0_18] : memref<5x512xf32, #tpu.memory_space<vmem>>, vector<1x512xf32>
    %c0_19 = arith.constant 0 : index
    %c0_20 = arith.constant 0 : index
    %17 = vector.load %arg5[%c0_19, %c0_20] : memref<5x512xf32, #tpu.memory_space<vmem>>, vector<1x512xf32>
    %c1_21 = arith.constant 1 : index
    %c0_22 = arith.constant 0 : index
    %18 = vector.load %arg5[%c1_21, %c0_22] : memref<5x512xf32, #tpu.memory_space<vmem>>, vector<1x512xf32>
    %c2_23 = arith.constant 2 : index
    %c0_24 = arith.constant 0 : index
    %19 = vector.load %arg5[%c2_23, %c0_24] : memref<5x512xf32, #tpu.memory_space<vmem>>, vector<1x512xf32>
    %c3_25 = arith.constant 3 : index
    %c0_26 = arith.constant 0 : index
    %20 = vector.load %arg5[%c3_25, %c0_26] : memref<5x512xf32, #tpu.memory_space<vmem>>, vector<1x512xf32>
    %c4_27 = arith.constant 4 : index
    %c0_28 = arith.constant 0 : index
    %21 = vector.load %arg5[%c4_27, %c0_28] : memref<5x512xf32, #tpu.memory_space<vmem>>, vector<1x512xf32>
    %c32_i32 = arith.constant 32 : i32
    %22 = tpu.dynamic_rotate %11 by %c32_i32 dim 1 : vector<16x512xf32>, i32 -> vector<16x512xf32>
    %23 = vector.broadcast %12 : vector<1x512xf32> to vector<16x512xf32>
    %24 = arith.mulf %22, %23 : vector<16x512xf32>
    %25 = arith.truncf %24 : vector<16x512xf32> to vector<16x512xbf16>
    %c0_29 = arith.constant 0 : index
    %c0_30 = arith.constant 0 : index
    %26 = vector.load %arg16[%c0_29, %c0_30] : memref<80x512xbf16, #tpu.memory_space<vmem>>, vector<16x512xbf16>
    tpu.vector_store %arg16[%c0_29, %c0_30], %25 {strides = array<i32>} : memref<80x512xbf16, #tpu.memory_space<vmem>>, vector<16x512xbf16>,
    %c16_i32 = arith.constant 16 : i32
    %27 = tpu.dynamic_rotate %11 by %c16_i32 dim 1 : vector<16x512xf32>, i32 -> vector<16x512xf32>
    %28 = vector.broadcast %13 : vector<1x512xf32> to vector<16x512xf32>
    %29 = arith.mulf %27, %28 : vector<16x512xf32>
    %30 = arith.truncf %29 : vector<16x512xf32> to vector<16x512xbf16>
    %c16 = arith.constant 16 : index
    %c0_31 = arith.constant 0 : index
    %31 = vector.load %arg16[%c16, %c0_31] : memref<80x512xbf16, #tpu.memory_space<vmem>>, vector<16x512xbf16>
    tpu.vector_store %arg16[%c16, %c0_31], %30 {strides = array<i32>} : memref<80x512xbf16, #tpu.memory_space<vmem>>, vector<16x512xbf16>,
    %32 = vector.broadcast %14 : vector<1x512xf32> to vector<16x512xf32>
    %33 = arith.mulf %11, %32 : vector<16x512xf32>
    %34 = arith.truncf %33 : vector<16x512xf32> to vector<16x512xbf16>
    %c32 = arith.constant 32 : index
    %c0_32 = arith.constant 0 : index
    %35 = vector.load %arg16[%c32, %c0_32] : memref<80x512xbf16, #tpu.memory_space<vmem>>, vector<16x512xbf16>
    tpu.vector_store %arg16[%c32, %c0_32], %34 {strides = array<i32>} : memref<80x512xbf16, #tpu.memory_space<vmem>>, vector<16x512xbf16>,
    %c496_i32 = arith.constant 496 : i32
    %36 = tpu.dynamic_rotate %11 by %c496_i32 dim 1 : vector<16x512xf32>, i32 -> vector<16x512xf32>
    %37 = vector.broadcast %15 : vector<1x512xf32> to vector<16x512xf32>
    %38 = arith.mulf %36, %37 : vector<16x512xf32>
    %39 = arith.truncf %38 : vector<16x512xf32> to vector<16x512xbf16>
    %c48 = arith.constant 48 : index
    %c0_33 = arith.constant 0 : index
    %40 = vector.load %arg16[%c48, %c0_33] : memref<80x512xbf16, #tpu.memory_space<vmem>>, vector<16x512xbf16>
    tpu.vector_store %arg16[%c48, %c0_33], %39 {strides = array<i32>} : memref<80x512xbf16, #tpu.memory_space<vmem>>, vector<16x512xbf16>,
    %c480_i32 = arith.constant 480 : i32
    %41 = tpu.dynamic_rotate %11 by %c480_i32 dim 1 : vector<16x512xf32>, i32 -> vector<16x512xf32>
    %42 = vector.broadcast %16 : vector<1x512xf32> to vector<16x512xf32>
    %43 = arith.mulf %41, %42 : vector<16x512xf32>
    %44 = arith.truncf %43 : vector<16x512xf32> to vector<16x512xbf16>
    %c64 = arith.constant 64 : index
    %c0_34 = arith.constant 0 : index
    %45 = vector.load %arg16[%c64, %c0_34] : memref<80x512xbf16, #tpu.memory_space<vmem>>, vector<16x512xbf16>
    tpu.vector_store %arg16[%c64, %c0_34], %44 {strides = array<i32>} : memref<80x512xbf16, #tpu.memory_space<vmem>>, vector<16x512xbf16>,
    %cst_35 = arith.constant 0.000000e+00 : f32
    %46 = vector.broadcast %cst_35 : f32 to vector<16x512xf32>
    %c0_36 = arith.constant 0 : index
    %c0_37 = arith.constant 0 : index
    %c0_38 = arith.constant 0 : index
    %c0_39 = arith.constant 0 : index
    %47 = vector.load %arg8[%c0_36, %c0_37, %c0_38, %c0_39] : memref<4x5x16x80xbf16, #tpu.memory_space<vmem>>, vector<1x1x16x80xbf16>
    %48 = vector.shape_cast %47 : vector<1x1x16x80xbf16> to vector<16x80xbf16>
    %c0_40 = arith.constant 0 : index
    %c0_41 = arith.constant 0 : index
    %49 = vector.load %arg16[%c0_40, %c0_41] : memref<80x512xbf16, #tpu.memory_space<vmem>>, vector<80x512xbf16>
    %cst_42 = arith.constant dense<0.000000e+00> : vector<16x512xf32>
    %50 = tpu.matmul %48, %49, %cst_42 {dimension_numbers = #tpu.dot_dimension_numbers<[1], [0], [0], [1], [0, 0, 1, 1], [], []>} : vector<16x80xbf16>, vector<80x512xbf16>, vector<16x512xf32> -> vector<16x512xf32>
    %c2_i32 = arith.constant 2 : i32
    %51 = tpu.dynamic_rotate %50 by %c2_i32 dim 1 : vector<16x512xf32>, i32 -> vector<16x512xf32>
    %52 = vector.broadcast %17 : vector<1x512xf32> to vector<16x512xf32>
    %53 = arith.mulf %51, %52 : vector<16x512xf32>
    %54 = arith.addf %46, %53 : vector<16x512xf32>
    %c0_43 = arith.constant 0 : index
    %c1_44 = arith.constant 1 : index
    %c0_45 = arith.constant 0 : index
    %c0_46 = arith.constant 0 : index
    %55 = vector.load %arg8[%c0_43, %c1_44, %c0_45, %c0_46] : memref<4x5x16x80xbf16, #tpu.memory_space<vmem>>, vector<1x1x16x80xbf16>
    %56 = vector.shape_cast %55 : vector<1x1x16x80xbf16> to vector<16x80xbf16>
    %c0_47 = arith.constant 0 : index
    %c0_48 = arith.constant 0 : index
    %57 = vector.load %arg16[%c0_47, %c0_48] : memref<80x512xbf16, #tpu.memory_space<vmem>>, vector<80x512xbf16>
    %cst_49 = arith.constant dense<0.000000e+00> : vector<16x512xf32>
    %58 = tpu.matmul %56, %57, %cst_49 {dimension_numbers = #tpu.dot_dimension_numbers<[1], [0], [0], [1], [0, 0, 1, 1], [], []>} : vector<16x80xbf16>, vector<80x512xbf16>, vector<16x512xf32> -> vector<16x512xf32>
    %c1_i32 = arith.constant 1 : i32
    %59 = tpu.dynamic_rotate %58 by %c1_i32 dim 1 : vector<16x512xf32>, i32 -> vector<16x512xf32>
    %60 = vector.broadcast %18 : vector<1x512xf32> to vector<16x512xf32>
    %61 = arith.mulf %59, %60 : vector<16x512xf32>
    %62 = arith.addf %54, %61 : vector<16x512xf32>
    %c0_50 = arith.constant 0 : index
    %c2_51 = arith.constant 2 : index
    %c0_52 = arith.constant 0 : index
    %c0_53 = arith.constant 0 : index
    %63 = vector.load %arg8[%c0_50, %c2_51, %c0_52, %c0_53] : memref<4x5x16x80xbf16, #tpu.memory_space<vmem>>, vector<1x1x16x80xbf16>
    %64 = vector.shape_cast %63 : vector<1x1x16x80xbf16> to vector<16x80xbf16>
    %c0_54 = arith.constant 0 : index
    %c0_55 = arith.constant 0 : index
    %65 = vector.load %arg16[%c0_54, %c0_55] : memref<80x512xbf16, #tpu.memory_space<vmem>>, vector<80x512xbf16>
    %cst_56 = arith.constant dense<0.000000e+00> : vector<16x512xf32>
    %66 = tpu.matmul %64, %65, %cst_56 {dimension_numbers = #tpu.dot_dimension_numbers<[1], [0], [0], [1], [0, 0, 1, 1], [], []>} : vector<16x80xbf16>, vector<80x512xbf16>, vector<16x512xf32> -> vector<16x512xf32>
    %67 = vector.broadcast %19 : vector<1x512xf32> to vector<16x512xf32>
    %68 = arith.mulf %66, %67 : vector<16x512xf32>
    %69 = arith.addf %62, %68 : vector<16x512xf32>
    %c0_57 = arith.constant 0 : index
    %c3_58 = arith.constant 3 : index
    %c0_59 = arith.constant 0 : index
    %c0_60 = arith.constant 0 : index
    %70 = vector.load %arg8[%c0_57, %c3_58, %c0_59, %c0_60] : memref<4x5x16x80xbf16, #tpu.memory_space<vmem>>, vector<1x1x16x80xbf16>
    %71 = vector.shape_cast %70 : vector<1x1x16x80xbf16> to vector<16x80xbf16>
    %c0_61 = arith.constant 0 : index
    %c0_62 = arith.constant 0 : index
    %72 = vector.load %arg16[%c0_61, %c0_62] : memref<80x512xbf16, #tpu.memory_space<vmem>>, vector<80x512xbf16>
    %cst_63 = arith.constant dense<0.000000e+00> : vector<16x512xf32>
    %73 = tpu.matmul %71, %72, %cst_63 {dimension_numbers = #tpu.dot_dimension_numbers<[1], [0], [0], [1], [0, 0, 1, 1], [], []>} : vector<16x80xbf16>, vector<80x512xbf16>, vector<16x512xf32> -> vector<16x512xf32>
    %c511_i32 = arith.constant 511 : i32
    %74 = tpu.dynamic_rotate %73 by %c511_i32 dim 1 : vector<16x512xf32>, i32 -> vector<16x512xf32>
    %75 = vector.broadcast %20 : vector<1x512xf32> to vector<16x512xf32>
    %76 = arith.mulf %74, %75 : vector<16x512xf32>
    %77 = arith.addf %69, %76 : vector<16x512xf32>
    %c0_64 = arith.constant 0 : index
    %c4_65 = arith.constant 4 : index
    %c0_66 = arith.constant 0 : index
    %c0_67 = arith.constant 0 : index
    %78 = vector.load %arg8[%c0_64, %c4_65, %c0_66, %c0_67] : memref<4x5x16x80xbf16, #tpu.memory_space<vmem>>, vector<1x1x16x80xbf16>
    %79 = vector.shape_cast %78 : vector<1x1x16x80xbf16> to vector<16x80xbf16>
    %c0_68 = arith.constant 0 : index
    %c0_69 = arith.constant 0 : index
    %80 = vector.load %arg16[%c0_68, %c0_69] : memref<80x512xbf16, #tpu.memory_space<vmem>>, vector<80x512xbf16>
    %cst_70 = arith.constant dense<0.000000e+00> : vector<16x512xf32>
    %81 = tpu.matmul %79, %80, %cst_70 {dimension_numbers = #tpu.dot_dimension_numbers<[1], [0], [0], [1], [0, 0, 1, 1], [], []>} : vector<16x80xbf16>, vector<80x512xbf16>, vector<16x512xf32> -> vector<16x512xf32>
    %c510_i32 = arith.constant 510 : i32
    %82 = tpu.dynamic_rotate %81 by %c510_i32 dim 1 : vector<16x512xf32>, i32 -> vector<16x512xf32>
    %83 = vector.broadcast %21 : vector<1x512xf32> to vector<16x512xf32>
    %84 = arith.mulf %82, %83 : vector<16x512xf32>
    %85 = arith.addf %77, %84 : vector<16x512xf32>
    %cst_71 = arith.constant dense<0.000000e+00> : vector<16xf32>
    %86 = vector.multi_reduction <add>, %85, %cst_71 [1] : vector<16x512xf32> to vector<16xf32>
    %87 = vector.shape_cast %86 : vector<16xf32> to vector<16x1xf32>
    %cst_72 = arith.constant 5.120000e+02 : f32
    %88 = vector.broadcast %cst_72 : f32 to vector<16x1xf32>
    %89 = arith.divf %87, %88 : vector<16x1xf32>
    %90 = vector.broadcast %89 : vector<16x1xf32> to vector<16x512xf32>
    %91 = arith.subf %85, %90 : vector<16x512xf32>
    %92 = arith.mulf %91, %91 : vector<16x512xf32>
    %cst_73 = arith.constant dense<0.000000e+00> : vector<16xf32>
    %93 = vector.multi_reduction <add>, %92, %cst_73 [1] : vector<16x512xf32> to vector<16xf32>
    %94 = vector.shape_cast %93 : vector<16xf32> to vector<16x1xf32>
    %cst_74 = arith.constant 5.120000e+02 : f32
    %95 = vector.broadcast %cst_74 : f32 to vector<16x1xf32>
    %96 = arith.divf %94, %95 : vector<16x1xf32>
    %97 = vector.broadcast %89 : vector<16x1xf32> to vector<16x512xf32>
    %98 = arith.subf %85, %97 : vector<16x512xf32>
    %cst_75 = arith.constant 9.99999974E-6 : f32
    %99 = vector.broadcast %cst_75 : f32 to vector<16x1xf32>
    %100 = arith.addf %96, %99 : vector<16x1xf32>
    %101 = math.rsqrt %100 : vector<16x1xf32>
    %102 = vector.broadcast %101 : vector<16x1xf32> to vector<16x512xf32>
    %103 = arith.mulf %98, %102 : vector<16x512xf32>
    %c0_76 = arith.constant 0 : index
    %c0_77 = arith.constant 0 : index
    %c0_78 = arith.constant 0 : index
    %104 = vector.load %arg9[%c0_76, %c0_77, %c0_78] : memref<4x16x1xf32, #tpu.memory_space<vmem>>, vector<1x16x1xf32>
    %105 = vector.shape_cast %104 : vector<1x16x1xf32> to vector<16x1xf32>
    %106 = vector.broadcast %105 : vector<16x1xf32> to vector<16x512xf32>
    %107 = arith.mulf %103, %106 : vector<16x512xf32>
    %c0_79 = arith.constant 0 : index
    %c0_80 = arith.constant 0 : index
    %c0_81 = arith.constant 0 : index
    %108 = vector.load %arg10[%c0_79, %c0_80, %c0_81] : memref<4x16x1xf32, #tpu.memory_space<vmem>>, vector<1x16x1xf32>
    %109 = vector.shape_cast %108 : vector<1x16x1xf32> to vector<16x1xf32>
    %110 = vector.broadcast %109 : vector<16x1xf32> to vector<16x512xf32>
    %111 = arith.addf %107, %110 : vector<16x512xf32>
    %cst_82 = arith.constant 0.000000e+00 : f32
    %112 = vector.broadcast %cst_82 : f32 to vector<16x512xf32>
    %113 = arith.maximumf %111, %112 : vector<16x512xf32>
    %c0_83 = arith.constant 0 : index
    %c0_84 = arith.constant 0 : index
    %c0_85 = arith.constant 0 : index
    %114 = vector.load %arg11[%c0_83, %c0_84, %c0_85] : memref<4x16x16xbf16, #tpu.memory_space<vmem>>, vector<1x16x16xbf16>
    %115 = vector.shape_cast %114 : vector<1x16x16xbf16> to vector<16x16xbf16>
    %116 = arith.truncf %113 : vector<16x512xf32> to vector<16x512xbf16>
    %cst_86 = arith.constant dense<0.000000e+00> : vector<16x512xf32>
    %117 = tpu.matmul %115, %116, %cst_86 {dimension_numbers = #tpu.dot_dimension_numbers<[1], [0], [0], [1], [0, 0, 1, 1], [], []>} : vector<16x16xbf16>, vector<16x512xbf16>, vector<16x512xf32> -> vector<16x512xf32>
    %c0_87 = arith.constant 0 : index
    %c0_88 = arith.constant 0 : index
    %c0_89 = arith.constant 0 : index
    %118 = vector.load %arg12[%c0_87, %c0_88, %c0_89] : memref<4x16x1xf32, #tpu.memory_space<vmem>>, vector<1x16x1xf32>
    %119 = vector.shape_cast %118 : vector<1x16x1xf32> to vector<16x1xf32>
    %120 = vector.broadcast %119 : vector<16x1xf32> to vector<16x512xf32>
    %121 = arith.addf %117, %120 : vector<16x512xf32>
    %c32_i32_90 = arith.constant 32 : i32
    %122 = tpu.dynamic_rotate %121 by %c32_i32_90 dim 1 : vector<16x512xf32>, i32 -> vector<16x512xf32>
    %123 = vector.broadcast %12 : vector<1x512xf32> to vector<16x512xf32>
    %124 = arith.mulf %122, %123 : vector<16x512xf32>
    %125 = arith.truncf %124 : vector<16x512xf32> to vector<16x512xbf16>
    %c0_91 = arith.constant 0 : index
    %c0_92 = arith.constant 0 : index
    %126 = vector.load %arg16[%c0_91, %c0_92] : memref<80x512xbf16, #tpu.memory_space<vmem>>, vector<16x512xbf16>
    tpu.vector_store %arg16[%c0_91, %c0_92], %125 {strides = array<i32>} : memref<80x512xbf16, #tpu.memory_space<vmem>>, vector<16x512xbf16>,
    %c16_i32_93 = arith.constant 16 : i32
    %127 = tpu.dynamic_rotate %121 by %c16_i32_93 dim 1 : vector<16x512xf32>, i32 -> vector<16x512xf32>
    %128 = vector.broadcast %13 : vector<1x512xf32> to vector<16x512xf32>
    %129 = arith.mulf %127, %128 : vector<16x512xf32>
    %130 = arith.truncf %129 : vector<16x512xf32> to vector<16x512xbf16>
    %c16_94 = arith.constant 16 : index
    %c0_95 = arith.constant 0 : index
    %131 = vector.load %arg16[%c16_94, %c0_95] : memref<80x512xbf16, #tpu.memory_space<vmem>>, vector<16x512xbf16>
    tpu.vector_store %arg16[%c16_94, %c0_95], %130 {strides = array<i32>} : memref<80x512xbf16, #tpu.memory_space<vmem>>, vector<16x512xbf16>,
    %132 = vector.broadcast %14 : vector<1x512xf32> to vector<16x512xf32>
    %133 = arith.mulf %121, %132 : vector<16x512xf32>
    %134 = arith.truncf %133 : vector<16x512xf32> to vector<16x512xbf16>
    %c32_96 = arith.constant 32 : index
    %c0_97 = arith.constant 0 : index
    %135 = vector.load %arg16[%c32_96, %c0_97] : memref<80x512xbf16, #tpu.memory_space<vmem>>, vector<16x512xbf16>
    tpu.vector_store %arg16[%c32_96, %c0_97], %134 {strides = array<i32>} : memref<80x512xbf16, #tpu.memory_space<vmem>>, vector<16x512xbf16>,
    %c496_i32_98 = arith.constant 496 : i32
    %136 = tpu.dynamic_rotate %121 by %c496_i32_98 dim 1 : vector<16x512xf32>, i32 -> vector<16x512xf32>
    %137 = vector.broadcast %15 : vector<1x512xf32> to vector<16x512xf32>
    %138 = arith.mulf %136, %137 : vector<16x512xf32>
    %139 = arith.truncf %138 : vector<16x512xf32> to vector<16x512xbf16>
    %c48_99 = arith.constant 48 : index
    %c0_100 = arith.constant 0 : index
    %140 = vector.load %arg16[%c48_99, %c0_100] : memref<80x512xbf16, #tpu.memory_space<vmem>>, vector<16x512xbf16>
    tpu.vector_store %arg16[%c48_99, %c0_100], %139 {strides = array<i32>} : memref<80x512xbf16, #tpu.memory_space<vmem>>, vector<16x512xbf16>,
    %c480_i32_101 = arith.constant 480 : i32
    %141 = tpu.dynamic_rotate %121 by %c480_i32_101 dim 1 : vector<16x512xf32>, i32 -> vector<16x512xf32>
    %142 = vector.broadcast %16 : vector<1x512xf32> to vector<16x512xf32>
    %143 = arith.mulf %141, %142 : vector<16x512xf32>
    %144 = arith.truncf %143 : vector<16x512xf32> to vector<16x512xbf16>
    %c64_102 = arith.constant 64 : index
    %c0_103 = arith.constant 0 : index
    %145 = vector.load %arg16[%c64_102, %c0_103] : memref<80x512xbf16, #tpu.memory_space<vmem>>, vector<16x512xbf16>
    tpu.vector_store %arg16[%c64_102, %c0_103], %144 {strides = array<i32>} : memref<80x512xbf16, #tpu.memory_space<vmem>>, vector<16x512xbf16>,
    %cst_104 = arith.constant 0.000000e+00 : f32
    %146 = vector.broadcast %cst_104 : f32 to vector<16x512xf32>
    %c1_105 = arith.constant 1 : index
    %c0_106 = arith.constant 0 : index
    %c0_107 = arith.constant 0 : index
    %c0_108 = arith.constant 0 : index
    %147 = vector.load %arg8[%c1_105, %c0_106, %c0_107, %c0_108] : memref<4x5x16x80xbf16, #tpu.memory_space<vmem>>, vector<1x1x16x80xbf16>
    %148 = vector.shape_cast %147 : vector<1x1x16x80xbf16> to vector<16x80xbf16>
    %c0_109 = arith.constant 0 : index
    %c0_110 = arith.constant 0 : index
    %149 = vector.load %arg16[%c0_109, %c0_110] : memref<80x512xbf16, #tpu.memory_space<vmem>>, vector<80x512xbf16>
    %cst_111 = arith.constant dense<0.000000e+00> : vector<16x512xf32>
    %150 = tpu.matmul %148, %149, %cst_111 {dimension_numbers = #tpu.dot_dimension_numbers<[1], [0], [0], [1], [0, 0, 1, 1], [], []>} : vector<16x80xbf16>, vector<80x512xbf16>, vector<16x512xf32> -> vector<16x512xf32>
    %c2_i32_112 = arith.constant 2 : i32
    %151 = tpu.dynamic_rotate %150 by %c2_i32_112 dim 1 : vector<16x512xf32>, i32 -> vector<16x512xf32>
    %152 = vector.broadcast %17 : vector<1x512xf32> to vector<16x512xf32>
    %153 = arith.mulf %151, %152 : vector<16x512xf32>
    %154 = arith.addf %146, %153 : vector<16x512xf32>
    %c1_113 = arith.constant 1 : index
    %c1_114 = arith.constant 1 : index
    %c0_115 = arith.constant 0 : index
    %c0_116 = arith.constant 0 : index
    %155 = vector.load %arg8[%c1_113, %c1_114, %c0_115, %c0_116] : memref<4x5x16x80xbf16, #tpu.memory_space<vmem>>, vector<1x1x16x80xbf16>
    %156 = vector.shape_cast %155 : vector<1x1x16x80xbf16> to vector<16x80xbf16>
    %c0_117 = arith.constant 0 : index
    %c0_118 = arith.constant 0 : index
    %157 = vector.load %arg16[%c0_117, %c0_118] : memref<80x512xbf16, #tpu.memory_space<vmem>>, vector<80x512xbf16>
    %cst_119 = arith.constant dense<0.000000e+00> : vector<16x512xf32>
    %158 = tpu.matmul %156, %157, %cst_119 {dimension_numbers = #tpu.dot_dimension_numbers<[1], [0], [0], [1], [0, 0, 1, 1], [], []>} : vector<16x80xbf16>, vector<80x512xbf16>, vector<16x512xf32> -> vector<16x512xf32>
    %c1_i32_120 = arith.constant 1 : i32
    %159 = tpu.dynamic_rotate %158 by %c1_i32_120 dim 1 : vector<16x512xf32>, i32 -> vector<16x512xf32>
    %160 = vector.broadcast %18 : vector<1x512xf32> to vector<16x512xf32>
    %161 = arith.mulf %159, %160 : vector<16x512xf32>
    %162 = arith.addf %154, %161 : vector<16x512xf32>
    %c1_121 = arith.constant 1 : index
    %c2_122 = arith.constant 2 : index
    %c0_123 = arith.constant 0 : index
    %c0_124 = arith.constant 0 : index
    %163 = vector.load %arg8[%c1_121, %c2_122, %c0_123, %c0_124] : memref<4x5x16x80xbf16, #tpu.memory_space<vmem>>, vector<1x1x16x80xbf16>
    %164 = vector.shape_cast %163 : vector<1x1x16x80xbf16> to vector<16x80xbf16>
    %c0_125 = arith.constant 0 : index
    %c0_126 = arith.constant 0 : index
    %165 = vector.load %arg16[%c0_125, %c0_126] : memref<80x512xbf16, #tpu.memory_space<vmem>>, vector<80x512xbf16>
    %cst_127 = arith.constant dense<0.000000e+00> : vector<16x512xf32>
    %166 = tpu.matmul %164, %165, %cst_127 {dimension_numbers = #tpu.dot_dimension_numbers<[1], [0], [0], [1], [0, 0, 1, 1], [], []>} : vector<16x80xbf16>, vector<80x512xbf16>, vector<16x512xf32> -> vector<16x512xf32>
    %167 = vector.broadcast %19 : vector<1x512xf32> to vector<16x512xf32>
    %168 = arith.mulf %166, %167 : vector<16x512xf32>
    %169 = arith.addf %162, %168 : vector<16x512xf32>
    %c1_128 = arith.constant 1 : index
    %c3_129 = arith.constant 3 : index
    %c0_130 = arith.constant 0 : index
    %c0_131 = arith.constant 0 : index
    %170 = vector.load %arg8[%c1_128, %c3_129, %c0_130, %c0_131] : memref<4x5x16x80xbf16, #tpu.memory_space<vmem>>, vector<1x1x16x80xbf16>
    %171 = vector.shape_cast %170 : vector<1x1x16x80xbf16> to vector<16x80xbf16>
    %c0_132 = arith.constant 0 : index
    %c0_133 = arith.constant 0 : index
    %172 = vector.load %arg16[%c0_132, %c0_133] : memref<80x512xbf16, #tpu.memory_space<vmem>>, vector<80x512xbf16>
    %cst_134 = arith.constant dense<0.000000e+00> : vector<16x512xf32>
    %173 = tpu.matmul %171, %172, %cst_134 {dimension_numbers = #tpu.dot_dimension_numbers<[1], [0], [0], [1], [0, 0, 1, 1], [], []>} : vector<16x80xbf16>, vector<80x512xbf16>, vector<16x512xf32> -> vector<16x512xf32>
    %c511_i32_135 = arith.constant 511 : i32
    %174 = tpu.dynamic_rotate %173 by %c511_i32_135 dim 1 : vector<16x512xf32>, i32 -> vector<16x512xf32>
    %175 = vector.broadcast %20 : vector<1x512xf32> to vector<16x512xf32>
    %176 = arith.mulf %174, %175 : vector<16x512xf32>
    %177 = arith.addf %169, %176 : vector<16x512xf32>
    %c1_136 = arith.constant 1 : index
    %c4_137 = arith.constant 4 : index
    %c0_138 = arith.constant 0 : index
    %c0_139 = arith.constant 0 : index
    %178 = vector.load %arg8[%c1_136, %c4_137, %c0_138, %c0_139] : memref<4x5x16x80xbf16, #tpu.memory_space<vmem>>, vector<1x1x16x80xbf16>
    %179 = vector.shape_cast %178 : vector<1x1x16x80xbf16> to vector<16x80xbf16>
    %c0_140 = arith.constant 0 : index
    %c0_141 = arith.constant 0 : index
    %180 = vector.load %arg16[%c0_140, %c0_141] : memref<80x512xbf16, #tpu.memory_space<vmem>>, vector<80x512xbf16>
    %cst_142 = arith.constant dense<0.000000e+00> : vector<16x512xf32>
    %181 = tpu.matmul %179, %180, %cst_142 {dimension_numbers = #tpu.dot_dimension_numbers<[1], [0], [0], [1], [0, 0, 1, 1], [], []>} : vector<16x80xbf16>, vector<80x512xbf16>, vector<16x512xf32> -> vector<16x512xf32>
    %c510_i32_143 = arith.constant 510 : i32
    %182 = tpu.dynamic_rotate %181 by %c510_i32_143 dim 1 : vector<16x512xf32>, i32 -> vector<16x512xf32>
    %183 = vector.broadcast %21 : vector<1x512xf32> to vector<16x512xf32>
    %184 = arith.mulf %182, %183 : vector<16x512xf32>
    %185 = arith.addf %177, %184 : vector<16x512xf32>
    %cst_144 = arith.constant dense<0.000000e+00> : vector<16xf32>
    %186 = vector.multi_reduction <add>, %185, %cst_144 [1] : vector<16x512xf32> to vector<16xf32>
    %187 = vector.shape_cast %186 : vector<16xf32> to vector<16x1xf32>
    %cst_145 = arith.constant 5.120000e+02 : f32
    %188 = vector.broadcast %cst_145 : f32 to vector<16x1xf32>
    %189 = arith.divf %187, %188 : vector<16x1xf32>
    %190 = vector.broadcast %189 : vector<16x1xf32> to vector<16x512xf32>
    %191 = arith.subf %185, %190 : vector<16x512xf32>
    %192 = arith.mulf %191, %191 : vector<16x512xf32>
    %cst_146 = arith.constant dense<0.000000e+00> : vector<16xf32>
    %193 = vector.multi_reduction <add>, %192, %cst_146 [1] : vector<16x512xf32> to vector<16xf32>
    %194 = vector.shape_cast %193 : vector<16xf32> to vector<16x1xf32>
    %cst_147 = arith.constant 5.120000e+02 : f32
    %195 = vector.broadcast %cst_147 : f32 to vector<16x1xf32>
    %196 = arith.divf %194, %195 : vector<16x1xf32>
    %197 = vector.broadcast %189 : vector<16x1xf32> to vector<16x512xf32>
    %198 = arith.subf %185, %197 : vector<16x512xf32>
    %cst_148 = arith.constant 9.99999974E-6 : f32
    %199 = vector.broadcast %cst_148 : f32 to vector<16x1xf32>
    %200 = arith.addf %196, %199 : vector<16x1xf32>
    %201 = math.rsqrt %200 : vector<16x1xf32>
    %202 = vector.broadcast %201 : vector<16x1xf32> to vector<16x512xf32>
    %203 = arith.mulf %198, %202 : vector<16x512xf32>
    %c1_149 = arith.constant 1 : index
    %c0_150 = arith.constant 0 : index
    %c0_151 = arith.constant 0 : index
    %204 = vector.load %arg9[%c1_149, %c0_150, %c0_151] : memref<4x16x1xf32, #tpu.memory_space<vmem>>, vector<1x16x1xf32>
    %205 = vector.shape_cast %204 : vector<1x16x1xf32> to vector<16x1xf32>
    %206 = vector.broadcast %205 : vector<16x1xf32> to vector<16x512xf32>
    %207 = arith.mulf %203, %206 : vector<16x512xf32>
    %c1_152 = arith.constant 1 : index
    %c0_153 = arith.constant 0 : index
    %c0_154 = arith.constant 0 : index
    %208 = vector.load %arg10[%c1_152, %c0_153, %c0_154] : memref<4x16x1xf32, #tpu.memory_space<vmem>>, vector<1x16x1xf32>
    %209 = vector.shape_cast %208 : vector<1x16x1xf32> to vector<16x1xf32>
    %210 = vector.broadcast %209 : vector<16x1xf32> to vector<16x512xf32>
    %211 = arith.addf %207, %210 : vector<16x512xf32>
    %cst_155 = arith.constant 0.000000e+00 : f32
    %212 = vector.broadcast %cst_155 : f32 to vector<16x512xf32>
    %213 = arith.maximumf %211, %212 : vector<16x512xf32>
    %c1_156 = arith.constant 1 : index
    %c0_157 = arith.constant 0 : index
    %c0_158 = arith.constant 0 : index
    %214 = vector.load %arg11[%c1_156, %c0_157, %c0_158] : memref<4x16x16xbf16, #tpu.memory_space<vmem>>, vector<1x16x16xbf16>
    %215 = vector.shape_cast %214 : vector<1x16x16xbf16> to vector<16x16xbf16>
    %216 = arith.truncf %213 : vector<16x512xf32> to vector<16x512xbf16>
    %cst_159 = arith.constant dense<0.000000e+00> : vector<16x512xf32>
    %217 = tpu.matmul %215, %216, %cst_159 {dimension_numbers = #tpu.dot_dimension_numbers<[1], [0], [0], [1], [0, 0, 1, 1], [], []>} : vector<16x16xbf16>, vector<16x512xbf16>, vector<16x512xf32> -> vector<16x512xf32>
    %c1_160 = arith.constant 1 : index
    %c0_161 = arith.constant 0 : index
    %c0_162 = arith.constant 0 : index
    %218 = vector.load %arg12[%c1_160, %c0_161, %c0_162] : memref<4x16x1xf32, #tpu.memory_space<vmem>>, vector<1x16x1xf32>
    %219 = vector.shape_cast %218 : vector<1x16x1xf32> to vector<16x1xf32>
    %220 = vector.broadcast %219 : vector<16x1xf32> to vector<16x512xf32>
    %221 = arith.addf %217, %220 : vector<16x512xf32>
    %c32_i32_163 = arith.constant 32 : i32
    %222 = tpu.dynamic_rotate %221 by %c32_i32_163 dim 1 : vector<16x512xf32>, i32 -> vector<16x512xf32>
    %223 = vector.broadcast %12 : vector<1x512xf32> to vector<16x512xf32>
    %224 = arith.mulf %222, %223 : vector<16x512xf32>
    %225 = arith.truncf %224 : vector<16x512xf32> to vector<16x512xbf16>
    %c0_164 = arith.constant 0 : index
    %c0_165 = arith.constant 0 : index
    %226 = vector.load %arg16[%c0_164, %c0_165] : memref<80x512xbf16, #tpu.memory_space<vmem>>, vector<16x512xbf16>
    tpu.vector_store %arg16[%c0_164, %c0_165], %225 {strides = array<i32>} : memref<80x512xbf16, #tpu.memory_space<vmem>>, vector<16x512xbf16>,
    %c16_i32_166 = arith.constant 16 : i32
    %227 = tpu.dynamic_rotate %221 by %c16_i32_166 dim 1 : vector<16x512xf32>, i32 -> vector<16x512xf32>
    %228 = vector.broadcast %13 : vector<1x512xf32> to vector<16x512xf32>
    %229 = arith.mulf %227, %228 : vector<16x512xf32>
    %230 = arith.truncf %229 : vector<16x512xf32> to vector<16x512xbf16>
    %c16_167 = arith.constant 16 : index
    %c0_168 = arith.constant 0 : index
    %231 = vector.load %arg16[%c16_167, %c0_168] : memref<80x512xbf16, #tpu.memory_space<vmem>>, vector<16x512xbf16>
    tpu.vector_store %arg16[%c16_167, %c0_168], %230 {strides = array<i32>} : memref<80x512xbf16, #tpu.memory_space<vmem>>, vector<16x512xbf16>,
    %232 = vector.broadcast %14 : vector<1x512xf32> to vector<16x512xf32>
    %233 = arith.mulf %221, %232 : vector<16x512xf32>
    %234 = arith.truncf %233 : vector<16x512xf32> to vector<16x512xbf16>
    %c32_169 = arith.constant 32 : index
    %c0_170 = arith.constant 0 : index
    %235 = vector.load %arg16[%c32_169, %c0_170] : memref<80x512xbf16, #tpu.memory_space<vmem>>, vector<16x512xbf16>
    tpu.vector_store %arg16[%c32_169, %c0_170], %234 {strides = array<i32>} : memref<80x512xbf16, #tpu.memory_space<vmem>>, vector<16x512xbf16>,
    %c496_i32_171 = arith.constant 496 : i32
    %236 = tpu.dynamic_rotate %221 by %c496_i32_171 dim 1 : vector<16x512xf32>, i32 -> vector<16x512xf32>
    %237 = vector.broadcast %15 : vector<1x512xf32> to vector<16x512xf32>
    %238 = arith.mulf %236, %237 : vector<16x512xf32>
    %239 = arith.truncf %238 : vector<16x512xf32> to vector<16x512xbf16>
    %c48_172 = arith.constant 48 : index
    %c0_173 = arith.constant 0 : index
    %240 = vector.load %arg16[%c48_172, %c0_173] : memref<80x512xbf16, #tpu.memory_space<vmem>>, vector<16x512xbf16>
    tpu.vector_store %arg16[%c48_172, %c0_173], %239 {strides = array<i32>} : memref<80x512xbf16, #tpu.memory_space<vmem>>, vector<16x512xbf16>,
    %c480_i32_174 = arith.constant 480 : i32
    %241 = tpu.dynamic_rotate %221 by %c480_i32_174 dim 1 : vector<16x512xf32>, i32 -> vector<16x512xf32>
    %242 = vector.broadcast %16 : vector<1x512xf32> to vector<16x512xf32>
    %243 = arith.mulf %241, %242 : vector<16x512xf32>
    %244 = arith.truncf %243 : vector<16x512xf32> to vector<16x512xbf16>
    %c64_175 = arith.constant 64 : index
    %c0_176 = arith.constant 0 : index
    %245 = vector.load %arg16[%c64_175, %c0_176] : memref<80x512xbf16, #tpu.memory_space<vmem>>, vector<16x512xbf16>
    tpu.vector_store %arg16[%c64_175, %c0_176], %244 {strides = array<i32>} : memref<80x512xbf16, #tpu.memory_space<vmem>>, vector<16x512xbf16>,
    %cst_177 = arith.constant 0.000000e+00 : f32
    %246 = vector.broadcast %cst_177 : f32 to vector<16x512xf32>
    %c2_178 = arith.constant 2 : index
    %c0_179 = arith.constant 0 : index
    %c0_180 = arith.constant 0 : index
    %c0_181 = arith.constant 0 : index
    %247 = vector.load %arg8[%c2_178, %c0_179, %c0_180, %c0_181] : memref<4x5x16x80xbf16, #tpu.memory_space<vmem>>, vector<1x1x16x80xbf16>
    %248 = vector.shape_cast %247 : vector<1x1x16x80xbf16> to vector<16x80xbf16>
    %c0_182 = arith.constant 0 : index
    %c0_183 = arith.constant 0 : index
    %249 = vector.load %arg16[%c0_182, %c0_183] : memref<80x512xbf16, #tpu.memory_space<vmem>>, vector<80x512xbf16>
    %cst_184 = arith.constant dense<0.000000e+00> : vector<16x512xf32>
    %250 = tpu.matmul %248, %249, %cst_184 {dimension_numbers = #tpu.dot_dimension_numbers<[1], [0], [0], [1], [0, 0, 1, 1], [], []>} : vector<16x80xbf16>, vector<80x512xbf16>, vector<16x512xf32> -> vector<16x512xf32>
    %c2_i32_185 = arith.constant 2 : i32
    %251 = tpu.dynamic_rotate %250 by %c2_i32_185 dim 1 : vector<16x512xf32>, i32 -> vector<16x512xf32>
    %252 = vector.broadcast %17 : vector<1x512xf32> to vector<16x512xf32>
    %253 = arith.mulf %251, %252 : vector<16x512xf32>
    %254 = arith.addf %246, %253 : vector<16x512xf32>
    %c2_186 = arith.constant 2 : index
    %c1_187 = arith.constant 1 : index
    %c0_188 = arith.constant 0 : index
    %c0_189 = arith.constant 0 : index
    %255 = vector.load %arg8[%c2_186, %c1_187, %c0_188, %c0_189] : memref<4x5x16x80xbf16, #tpu.memory_space<vmem>>, vector<1x1x16x80xbf16>
    %256 = vector.shape_cast %255 : vector<1x1x16x80xbf16> to vector<16x80xbf16>
    %c0_190 = arith.constant 0 : index
    %c0_191 = arith.constant 0 : index
    %257 = vector.load %arg16[%c0_190, %c0_191] : memref<80x512xbf16, #tpu.memory_space<vmem>>, vector<80x512xbf16>
    %cst_192 = arith.constant dense<0.000000e+00> : vector<16x512xf32>
    %258 = tpu.matmul %256, %257, %cst_192 {dimension_numbers = #tpu.dot_dimension_numbers<[1], [0], [0], [1], [0, 0, 1, 1], [], []>} : vector<16x80xbf16>, vector<80x512xbf16>, vector<16x512xf32> -> vector<16x512xf32>
    %c1_i32_193 = arith.constant 1 : i32
    %259 = tpu.dynamic_rotate %258 by %c1_i32_193 dim 1 : vector<16x512xf32>, i32 -> vector<16x512xf32>
    %260 = vector.broadcast %18 : vector<1x512xf32> to vector<16x512xf32>
    %261 = arith.mulf %259, %260 : vector<16x512xf32>
    %262 = arith.addf %254, %261 : vector<16x512xf32>
    %c2_194 = arith.constant 2 : index
    %c2_195 = arith.constant 2 : index
    %c0_196 = arith.constant 0 : index
    %c0_197 = arith.constant 0 : index
    %263 = vector.load %arg8[%c2_194, %c2_195, %c0_196, %c0_197] : memref<4x5x16x80xbf16, #tpu.memory_space<vmem>>, vector<1x1x16x80xbf16>
    %264 = vector.shape_cast %263 : vector<1x1x16x80xbf16> to vector<16x80xbf16>
    %c0_198 = arith.constant 0 : index
    %c0_199 = arith.constant 0 : index
    %265 = vector.load %arg16[%c0_198, %c0_199] : memref<80x512xbf16, #tpu.memory_space<vmem>>, vector<80x512xbf16>
    %cst_200 = arith.constant dense<0.000000e+00> : vector<16x512xf32>
    %266 = tpu.matmul %264, %265, %cst_200 {dimension_numbers = #tpu.dot_dimension_numbers<[1], [0], [0], [1], [0, 0, 1, 1], [], []>} : vector<16x80xbf16>, vector<80x512xbf16>, vector<16x512xf32> -> vector<16x512xf32>
    %267 = vector.broadcast %19 : vector<1x512xf32> to vector<16x512xf32>
    %268 = arith.mulf %266, %267 : vector<16x512xf32>
    %269 = arith.addf %262, %268 : vector<16x512xf32>
    %c2_201 = arith.constant 2 : index
    %c3_202 = arith.constant 3 : index
    %c0_203 = arith.constant 0 : index
    %c0_204 = arith.constant 0 : index
    %270 = vector.load %arg8[%c2_201, %c3_202, %c0_203, %c0_204] : memref<4x5x16x80xbf16, #tpu.memory_space<vmem>>, vector<1x1x16x80xbf16>
    %271 = vector.shape_cast %270 : vector<1x1x16x80xbf16> to vector<16x80xbf16>
    %c0_205 = arith.constant 0 : index
    %c0_206 = arith.constant 0 : index
    %272 = vector.load %arg16[%c0_205, %c0_206] : memref<80x512xbf16, #tpu.memory_space<vmem>>, vector<80x512xbf16>
    %cst_207 = arith.constant dense<0.000000e+00> : vector<16x512xf32>
    %273 = tpu.matmul %271, %272, %cst_207 {dimension_numbers = #tpu.dot_dimension_numbers<[1], [0], [0], [1], [0, 0, 1, 1], [], []>} : vector<16x80xbf16>, vector<80x512xbf16>, vector<16x512xf32> -> vector<16x512xf32>
    %c511_i32_208 = arith.constant 511 : i32
    %274 = tpu.dynamic_rotate %273 by %c511_i32_208 dim 1 : vector<16x512xf32>, i32 -> vector<16x512xf32>
    %275 = vector.broadcast %20 : vector<1x512xf32> to vector<16x512xf32>
    %276 = arith.mulf %274, %275 : vector<16x512xf32>
    %277 = arith.addf %269, %276 : vector<16x512xf32>
    %c2_209 = arith.constant 2 : index
    %c4_210 = arith.constant 4 : index
    %c0_211 = arith.constant 0 : index
    %c0_212 = arith.constant 0 : index
    %278 = vector.load %arg8[%c2_209, %c4_210, %c0_211, %c0_212] : memref<4x5x16x80xbf16, #tpu.memory_space<vmem>>, vector<1x1x16x80xbf16>
    %279 = vector.shape_cast %278 : vector<1x1x16x80xbf16> to vector<16x80xbf16>
    %c0_213 = arith.constant 0 : index
    %c0_214 = arith.constant 0 : index
    %280 = vector.load %arg16[%c0_213, %c0_214] : memref<80x512xbf16, #tpu.memory_space<vmem>>, vector<80x512xbf16>
    %cst_215 = arith.constant dense<0.000000e+00> : vector<16x512xf32>
    %281 = tpu.matmul %279, %280, %cst_215 {dimension_numbers = #tpu.dot_dimension_numbers<[1], [0], [0], [1], [0, 0, 1, 1], [], []>} : vector<16x80xbf16>, vector<80x512xbf16>, vector<16x512xf32> -> vector<16x512xf32>
    %c510_i32_216 = arith.constant 510 : i32
    %282 = tpu.dynamic_rotate %281 by %c510_i32_216 dim 1 : vector<16x512xf32>, i32 -> vector<16x512xf32>
    %283 = vector.broadcast %21 : vector<1x512xf32> to vector<16x512xf32>
    %284 = arith.mulf %282, %283 : vector<16x512xf32>
    %285 = arith.addf %277, %284 : vector<16x512xf32>
    %cst_217 = arith.constant dense<0.000000e+00> : vector<16xf32>
    %286 = vector.multi_reduction <add>, %285, %cst_217 [1] : vector<16x512xf32> to vector<16xf32>
    %287 = vector.shape_cast %286 : vector<16xf32> to vector<16x1xf32>
    %cst_218 = arith.constant 5.120000e+02 : f32
    %288 = vector.broadcast %cst_218 : f32 to vector<16x1xf32>
    %289 = arith.divf %287, %288 : vector<16x1xf32>
    %290 = vector.broadcast %289 : vector<16x1xf32> to vector<16x512xf32>
    %291 = arith.subf %285, %290 : vector<16x512xf32>
    %292 = arith.mulf %291, %291 : vector<16x512xf32>
    %cst_219 = arith.constant dense<0.000000e+00> : vector<16xf32>
    %293 = vector.multi_reduction <add>, %292, %cst_219 [1] : vector<16x512xf32> to vector<16xf32>
    %294 = vector.shape_cast %293 : vector<16xf32> to vector<16x1xf32>
    %cst_220 = arith.constant 5.120000e+02 : f32
    %295 = vector.broadcast %cst_220 : f32 to vector<16x1xf32>
    %296 = arith.divf %294, %295 : vector<16x1xf32>
    %297 = vector.broadcast %289 : vector<16x1xf32> to vector<16x512xf32>
    %298 = arith.subf %285, %297 : vector<16x512xf32>
    %cst_221 = arith.constant 9.99999974E-6 : f32
    %299 = vector.broadcast %cst_221 : f32 to vector<16x1xf32>
    %300 = arith.addf %296, %299 : vector<16x1xf32>
    %301 = math.rsqrt %300 : vector<16x1xf32>
    %302 = vector.broadcast %301 : vector<16x1xf32> to vector<16x512xf32>
    %303 = arith.mulf %298, %302 : vector<16x512xf32>
    %c2_222 = arith.constant 2 : index
    %c0_223 = arith.constant 0 : index
    %c0_224 = arith.constant 0 : index
    %304 = vector.load %arg9[%c2_222, %c0_223, %c0_224] : memref<4x16x1xf32, #tpu.memory_space<vmem>>, vector<1x16x1xf32>
    %305 = vector.shape_cast %304 : vector<1x16x1xf32> to vector<16x1xf32>
    %306 = vector.broadcast %305 : vector<16x1xf32> to vector<16x512xf32>
    %307 = arith.mulf %303, %306 : vector<16x512xf32>
    %c2_225 = arith.constant 2 : index
    %c0_226 = arith.constant 0 : index
    %c0_227 = arith.constant 0 : index
    %308 = vector.load %arg10[%c2_225, %c0_226, %c0_227] : memref<4x16x1xf32, #tpu.memory_space<vmem>>, vector<1x16x1xf32>
    %309 = vector.shape_cast %308 : vector<1x16x1xf32> to vector<16x1xf32>
    %310 = vector.broadcast %309 : vector<16x1xf32> to vector<16x512xf32>
    %311 = arith.addf %307, %310 : vector<16x512xf32>
    %cst_228 = arith.constant 0.000000e+00 : f32
    %312 = vector.broadcast %cst_228 : f32 to vector<16x512xf32>
    %313 = arith.maximumf %311, %312 : vector<16x512xf32>
    %c2_229 = arith.constant 2 : index
    %c0_230 = arith.constant 0 : index
    %c0_231 = arith.constant 0 : index
    %314 = vector.load %arg11[%c2_229, %c0_230, %c0_231] : memref<4x16x16xbf16, #tpu.memory_space<vmem>>, vector<1x16x16xbf16>
    %315 = vector.shape_cast %314 : vector<1x16x16xbf16> to vector<16x16xbf16>
    %316 = arith.truncf %313 : vector<16x512xf32> to vector<16x512xbf16>
    %cst_232 = arith.constant dense<0.000000e+00> : vector<16x512xf32>
    %317 = tpu.matmul %315, %316, %cst_232 {dimension_numbers = #tpu.dot_dimension_numbers<[1], [0], [0], [1], [0, 0, 1, 1], [], []>} : vector<16x16xbf16>, vector<16x512xbf16>, vector<16x512xf32> -> vector<16x512xf32>
    %c2_233 = arith.constant 2 : index
    %c0_234 = arith.constant 0 : index
    %c0_235 = arith.constant 0 : index
    %318 = vector.load %arg12[%c2_233, %c0_234, %c0_235] : memref<4x16x1xf32, #tpu.memory_space<vmem>>, vector<1x16x1xf32>
    %319 = vector.shape_cast %318 : vector<1x16x1xf32> to vector<16x1xf32>
    %320 = vector.broadcast %319 : vector<16x1xf32> to vector<16x512xf32>
    %321 = arith.addf %317, %320 : vector<16x512xf32>
    %c32_i32_236 = arith.constant 32 : i32
    %322 = tpu.dynamic_rotate %321 by %c32_i32_236 dim 1 : vector<16x512xf32>, i32 -> vector<16x512xf32>
    %323 = vector.broadcast %12 : vector<1x512xf32> to vector<16x512xf32>
    %324 = arith.mulf %322, %323 : vector<16x512xf32>
    %325 = arith.truncf %324 : vector<16x512xf32> to vector<16x512xbf16>
    %c0_237 = arith.constant 0 : index
    %c0_238 = arith.constant 0 : index
    %326 = vector.load %arg16[%c0_237, %c0_238] : memref<80x512xbf16, #tpu.memory_space<vmem>>, vector<16x512xbf16>
    tpu.vector_store %arg16[%c0_237, %c0_238], %325 {strides = array<i32>} : memref<80x512xbf16, #tpu.memory_space<vmem>>, vector<16x512xbf16>,
    %c16_i32_239 = arith.constant 16 : i32
    %327 = tpu.dynamic_rotate %321 by %c16_i32_239 dim 1 : vector<16x512xf32>, i32 -> vector<16x512xf32>
    %328 = vector.broadcast %13 : vector<1x512xf32> to vector<16x512xf32>
    %329 = arith.mulf %327, %328 : vector<16x512xf32>
    %330 = arith.truncf %329 : vector<16x512xf32> to vector<16x512xbf16>
    %c16_240 = arith.constant 16 : index
    %c0_241 = arith.constant 0 : index
    %331 = vector.load %arg16[%c16_240, %c0_241] : memref<80x512xbf16, #tpu.memory_space<vmem>>, vector<16x512xbf16>
    tpu.vector_store %arg16[%c16_240, %c0_241], %330 {strides = array<i32>} : memref<80x512xbf16, #tpu.memory_space<vmem>>, vector<16x512xbf16>,
    %332 = vector.broadcast %14 : vector<1x512xf32> to vector<16x512xf32>
    %333 = arith.mulf %321, %332 : vector<16x512xf32>
    %334 = arith.truncf %333 : vector<16x512xf32> to vector<16x512xbf16>
    %c32_242 = arith.constant 32 : index
    %c0_243 = arith.constant 0 : index
    %335 = vector.load %arg16[%c32_242, %c0_243] : memref<80x512xbf16, #tpu.memory_space<vmem>>, vector<16x512xbf16>
    tpu.vector_store %arg16[%c32_242, %c0_243], %334 {strides = array<i32>} : memref<80x512xbf16, #tpu.memory_space<vmem>>, vector<16x512xbf16>,
    %c496_i32_244 = arith.constant 496 : i32
    %336 = tpu.dynamic_rotate %321 by %c496_i32_244 dim 1 : vector<16x512xf32>, i32 -> vector<16x512xf32>
    %337 = vector.broadcast %15 : vector<1x512xf32> to vector<16x512xf32>
    %338 = arith.mulf %336, %337 : vector<16x512xf32>
    %339 = arith.truncf %338 : vector<16x512xf32> to vector<16x512xbf16>
    %c48_245 = arith.constant 48 : index
    %c0_246 = arith.constant 0 : index
    %340 = vector.load %arg16[%c48_245, %c0_246] : memref<80x512xbf16, #tpu.memory_space<vmem>>, vector<16x512xbf16>
    tpu.vector_store %arg16[%c48_245, %c0_246], %339 {strides = array<i32>} : memref<80x512xbf16, #tpu.memory_space<vmem>>, vector<16x512xbf16>,
    %c480_i32_247 = arith.constant 480 : i32
    %341 = tpu.dynamic_rotate %321 by %c480_i32_247 dim 1 : vector<16x512xf32>, i32 -> vector<16x512xf32>
    %342 = vector.broadcast %16 : vector<1x512xf32> to vector<16x512xf32>
    %343 = arith.mulf %341, %342 : vector<16x512xf32>
    %344 = arith.truncf %343 : vector<16x512xf32> to vector<16x512xbf16>
    %c64_248 = arith.constant 64 : index
    %c0_249 = arith.constant 0 : index
    %345 = vector.load %arg16[%c64_248, %c0_249] : memref<80x512xbf16, #tpu.memory_space<vmem>>, vector<16x512xbf16>
    tpu.vector_store %arg16[%c64_248, %c0_249], %344 {strides = array<i32>} : memref<80x512xbf16, #tpu.memory_space<vmem>>, vector<16x512xbf16>,
    %cst_250 = arith.constant 0.000000e+00 : f32
    %346 = vector.broadcast %cst_250 : f32 to vector<16x512xf32>
    %c3_251 = arith.constant 3 : index
    %c0_252 = arith.constant 0 : index
    %c0_253 = arith.constant 0 : index
    %c0_254 = arith.constant 0 : index
    %347 = vector.load %arg8[%c3_251, %c0_252, %c0_253, %c0_254] : memref<4x5x16x80xbf16, #tpu.memory_space<vmem>>, vector<1x1x16x80xbf16>
    %348 = vector.shape_cast %347 : vector<1x1x16x80xbf16> to vector<16x80xbf16>
    %c0_255 = arith.constant 0 : index
    %c0_256 = arith.constant 0 : index
    %349 = vector.load %arg16[%c0_255, %c0_256] : memref<80x512xbf16, #tpu.memory_space<vmem>>, vector<80x512xbf16>
    %cst_257 = arith.constant dense<0.000000e+00> : vector<16x512xf32>
    %350 = tpu.matmul %348, %349, %cst_257 {dimension_numbers = #tpu.dot_dimension_numbers<[1], [0], [0], [1], [0, 0, 1, 1], [], []>} : vector<16x80xbf16>, vector<80x512xbf16>, vector<16x512xf32> -> vector<16x512xf32>
    %c2_i32_258 = arith.constant 2 : i32
    %351 = tpu.dynamic_rotate %350 by %c2_i32_258 dim 1 : vector<16x512xf32>, i32 -> vector<16x512xf32>
    %352 = vector.broadcast %17 : vector<1x512xf32> to vector<16x512xf32>
    %353 = arith.mulf %351, %352 : vector<16x512xf32>
    %354 = arith.addf %346, %353 : vector<16x512xf32>
    %c3_259 = arith.constant 3 : index
    %c1_260 = arith.constant 1 : index
    %c0_261 = arith.constant 0 : index
    %c0_262 = arith.constant 0 : index
    %355 = vector.load %arg8[%c3_259, %c1_260, %c0_261, %c0_262] : memref<4x5x16x80xbf16, #tpu.memory_space<vmem>>, vector<1x1x16x80xbf16>
    %356 = vector.shape_cast %355 : vector<1x1x16x80xbf16> to vector<16x80xbf16>
    %c0_263 = arith.constant 0 : index
    %c0_264 = arith.constant 0 : index
    %357 = vector.load %arg16[%c0_263, %c0_264] : memref<80x512xbf16, #tpu.memory_space<vmem>>, vector<80x512xbf16>
    %cst_265 = arith.constant dense<0.000000e+00> : vector<16x512xf32>
    %358 = tpu.matmul %356, %357, %cst_265 {dimension_numbers = #tpu.dot_dimension_numbers<[1], [0], [0], [1], [0, 0, 1, 1], [], []>} : vector<16x80xbf16>, vector<80x512xbf16>, vector<16x512xf32> -> vector<16x512xf32>
    %c1_i32_266 = arith.constant 1 : i32
    %359 = tpu.dynamic_rotate %358 by %c1_i32_266 dim 1 : vector<16x512xf32>, i32 -> vector<16x512xf32>
    %360 = vector.broadcast %18 : vector<1x512xf32> to vector<16x512xf32>
    %361 = arith.mulf %359, %360 : vector<16x512xf32>
    %362 = arith.addf %354, %361 : vector<16x512xf32>
    %c3_267 = arith.constant 3 : index
    %c2_268 = arith.constant 2 : index
    %c0_269 = arith.constant 0 : index
    %c0_270 = arith.constant 0 : index
    %363 = vector.load %arg8[%c3_267, %c2_268, %c0_269, %c0_270] : memref<4x5x16x80xbf16, #tpu.memory_space<vmem>>, vector<1x1x16x80xbf16>
    %364 = vector.shape_cast %363 : vector<1x1x16x80xbf16> to vector<16x80xbf16>
    %c0_271 = arith.constant 0 : index
    %c0_272 = arith.constant 0 : index
    %365 = vector.load %arg16[%c0_271, %c0_272] : memref<80x512xbf16, #tpu.memory_space<vmem>>, vector<80x512xbf16>
    %cst_273 = arith.constant dense<0.000000e+00> : vector<16x512xf32>
    %366 = tpu.matmul %364, %365, %cst_273 {dimension_numbers = #tpu.dot_dimension_numbers<[1], [0], [0], [1], [0, 0, 1, 1], [], []>} : vector<16x80xbf16>, vector<80x512xbf16>, vector<16x512xf32> -> vector<16x512xf32>
    %367 = vector.broadcast %19 : vector<1x512xf32> to vector<16x512xf32>
    %368 = arith.mulf %366, %367 : vector<16x512xf32>
    %369 = arith.addf %362, %368 : vector<16x512xf32>
    %c3_274 = arith.constant 3 : index
    %c3_275 = arith.constant 3 : index
    %c0_276 = arith.constant 0 : index
    %c0_277 = arith.constant 0 : index
    %370 = vector.load %arg8[%c3_274, %c3_275, %c0_276, %c0_277] : memref<4x5x16x80xbf16, #tpu.memory_space<vmem>>, vector<1x1x16x80xbf16>
    %371 = vector.shape_cast %370 : vector<1x1x16x80xbf16> to vector<16x80xbf16>
    %c0_278 = arith.constant 0 : index
    %c0_279 = arith.constant 0 : index
    %372 = vector.load %arg16[%c0_278, %c0_279] : memref<80x512xbf16, #tpu.memory_space<vmem>>, vector<80x512xbf16>
    %cst_280 = arith.constant dense<0.000000e+00> : vector<16x512xf32>
    %373 = tpu.matmul %371, %372, %cst_280 {dimension_numbers = #tpu.dot_dimension_numbers<[1], [0], [0], [1], [0, 0, 1, 1], [], []>} : vector<16x80xbf16>, vector<80x512xbf16>, vector<16x512xf32> -> vector<16x512xf32>
    %c511_i32_281 = arith.constant 511 : i32
    %374 = tpu.dynamic_rotate %373 by %c511_i32_281 dim 1 : vector<16x512xf32>, i32 -> vector<16x512xf32>
    %375 = vector.broadcast %20 : vector<1x512xf32> to vector<16x512xf32>
    %376 = arith.mulf %374, %375 : vector<16x512xf32>
    %377 = arith.addf %369, %376 : vector<16x512xf32>
    %c3_282 = arith.constant 3 : index
    %c4_283 = arith.constant 4 : index
    %c0_284 = arith.constant 0 : index
    %c0_285 = arith.constant 0 : index
    %378 = vector.load %arg8[%c3_282, %c4_283, %c0_284, %c0_285] : memref<4x5x16x80xbf16, #tpu.memory_space<vmem>>, vector<1x1x16x80xbf16>
    %379 = vector.shape_cast %378 : vector<1x1x16x80xbf16> to vector<16x80xbf16>
    %c0_286 = arith.constant 0 : index
    %c0_287 = arith.constant 0 : index
    %380 = vector.load %arg16[%c0_286, %c0_287] : memref<80x512xbf16, #tpu.memory_space<vmem>>, vector<80x512xbf16>
    %cst_288 = arith.constant dense<0.000000e+00> : vector<16x512xf32>
    %381 = tpu.matmul %379, %380, %cst_288 {dimension_numbers = #tpu.dot_dimension_numbers<[1], [0], [0], [1], [0, 0, 1, 1], [], []>} : vector<16x80xbf16>, vector<80x512xbf16>, vector<16x512xf32> -> vector<16x512xf32>
    %c510_i32_289 = arith.constant 510 : i32
    %382 = tpu.dynamic_rotate %381 by %c510_i32_289 dim 1 : vector<16x512xf32>, i32 -> vector<16x512xf32>
    %383 = vector.broadcast %21 : vector<1x512xf32> to vector<16x512xf32>
    %384 = arith.mulf %382, %383 : vector<16x512xf32>
    %385 = arith.addf %377, %384 : vector<16x512xf32>
    %cst_290 = arith.constant dense<0.000000e+00> : vector<16xf32>
    %386 = vector.multi_reduction <add>, %385, %cst_290 [1] : vector<16x512xf32> to vector<16xf32>
    %387 = vector.shape_cast %386 : vector<16xf32> to vector<16x1xf32>
    %cst_291 = arith.constant 5.120000e+02 : f32
    %388 = vector.broadcast %cst_291 : f32 to vector<16x1xf32>
    %389 = arith.divf %387, %388 : vector<16x1xf32>
    %390 = vector.broadcast %389 : vector<16x1xf32> to vector<16x512xf32>
    %391 = arith.subf %385, %390 : vector<16x512xf32>
    %392 = arith.mulf %391, %391 : vector<16x512xf32>
    %cst_292 = arith.constant dense<0.000000e+00> : vector<16xf32>
    %393 = vector.multi_reduction <add>, %392, %cst_292 [1] : vector<16x512xf32> to vector<16xf32>
    %394 = vector.shape_cast %393 : vector<16xf32> to vector<16x1xf32>
    %cst_293 = arith.constant 5.120000e+02 : f32
    %395 = vector.broadcast %cst_293 : f32 to vector<16x1xf32>
    %396 = arith.divf %394, %395 : vector<16x1xf32>
    %397 = vector.broadcast %389 : vector<16x1xf32> to vector<16x512xf32>
    %398 = arith.subf %385, %397 : vector<16x512xf32>
    %cst_294 = arith.constant 9.99999974E-6 : f32
    %399 = vector.broadcast %cst_294 : f32 to vector<16x1xf32>
    %400 = arith.addf %396, %399 : vector<16x1xf32>
    %401 = math.rsqrt %400 : vector<16x1xf32>
    %402 = vector.broadcast %401 : vector<16x1xf32> to vector<16x512xf32>
    %403 = arith.mulf %398, %402 : vector<16x512xf32>
    %c3_295 = arith.constant 3 : index
    %c0_296 = arith.constant 0 : index
    %c0_297 = arith.constant 0 : index
    %404 = vector.load %arg9[%c3_295, %c0_296, %c0_297] : memref<4x16x1xf32, #tpu.memory_space<vmem>>, vector<1x16x1xf32>
    %405 = vector.shape_cast %404 : vector<1x16x1xf32> to vector<16x1xf32>
    %406 = vector.broadcast %405 : vector<16x1xf32> to vector<16x512xf32>
    %407 = arith.mulf %403, %406 : vector<16x512xf32>
    %c3_298 = arith.constant 3 : index
    %c0_299 = arith.constant 0 : index
    %c0_300 = arith.constant 0 : index
    %408 = vector.load %arg10[%c3_298, %c0_299, %c0_300] : memref<4x16x1xf32, #tpu.memory_space<vmem>>, vector<1x16x1xf32>
    %409 = vector.shape_cast %408 : vector<1x16x1xf32> to vector<16x1xf32>
    %410 = vector.broadcast %409 : vector<16x1xf32> to vector<16x512xf32>
    %411 = arith.addf %407, %410 : vector<16x512xf32>
    %cst_301 = arith.constant 0.000000e+00 : f32
    %412 = vector.broadcast %cst_301 : f32 to vector<16x512xf32>
    %413 = arith.maximumf %411, %412 : vector<16x512xf32>
    %c3_302 = arith.constant 3 : index
    %c0_303 = arith.constant 0 : index
    %c0_304 = arith.constant 0 : index
    %414 = vector.load %arg11[%c3_302, %c0_303, %c0_304] : memref<4x16x16xbf16, #tpu.memory_space<vmem>>, vector<1x16x16xbf16>
    %415 = vector.shape_cast %414 : vector<1x16x16xbf16> to vector<16x16xbf16>
    %416 = arith.truncf %413 : vector<16x512xf32> to vector<16x512xbf16>
    %cst_305 = arith.constant dense<0.000000e+00> : vector<16x512xf32>
    %417 = tpu.matmul %415, %416, %cst_305 {dimension_numbers = #tpu.dot_dimension_numbers<[1], [0], [0], [1], [0, 0, 1, 1], [], []>} : vector<16x16xbf16>, vector<16x512xbf16>, vector<16x512xf32> -> vector<16x512xf32>
    %c3_306 = arith.constant 3 : index
    %c0_307 = arith.constant 0 : index
    %c0_308 = arith.constant 0 : index
    %418 = vector.load %arg12[%c3_306, %c0_307, %c0_308] : memref<4x16x1xf32, #tpu.memory_space<vmem>>, vector<1x16x1xf32>
    %419 = vector.shape_cast %418 : vector<1x16x1xf32> to vector<16x1xf32>
    %420 = vector.broadcast %419 : vector<16x1xf32> to vector<16x512xf32>
    %421 = arith.addf %417, %420 : vector<16x512xf32>
    %c0_309 = arith.constant 0 : index
    %c0_310 = arith.constant 0 : index
    %422 = vector.load %arg13[%c0_309, %c0_310] : memref<3x16xbf16, #tpu.memory_space<vmem>>, vector<3x16xbf16>
    %423 = arith.truncf %421 : vector<16x512xf32> to vector<16x512xbf16>
    %cst_311 = arith.constant dense<0.000000e+00> : vector<3x512xf32>
    %424 = tpu.matmul %422, %423, %cst_311 {dimension_numbers = #tpu.dot_dimension_numbers<[1], [0], [0], [1], [0, 0, 1, 1], [], []>} : vector<3x16xbf16>, vector<16x512xbf16>, vector<3x512xf32> -> vector<3x512xf32>
    %c0_312 = arith.constant 0 : index
    %c0_313 = arith.constant 0 : index
    %425 = vector.load %arg14[%c0_312, %c0_313] : memref<3x1xf32, #tpu.memory_space<vmem>>, vector<3x1xf32>
    %426 = vector.broadcast %425 : vector<3x1xf32> to vector<3x512xf32>
    %427 = arith.addf %424, %426 : vector<3x512xf32>
    %c0_314 = arith.constant 0 : index
    %c0_315 = arith.constant 0 : index
    %428 = vector.load %arg15[%c0_314, %c0_315] : memref<3x512xf32, #tpu.memory_space<vmem>>, vector<3x512xf32>
    tpu.vector_store %arg15[%c0_314, %c0_315], %427 {strides = array<i32>} : memref<3x512xf32, #tpu.memory_space<vmem>>, vector<3x512xf32>,
    return
  }
}

</mosaic_0001>

<bundles_post_ra>
// kernel: conv_refiner_forward.1
= control target key start
LH: loop header
LB: loop body
LE: loop exit
PB: predicated region body
PF: predicated region fallthrough
CT: control target
= control target key end

     0   :  { %v9382_v18 = vmov 0   ;;  %v6390_v37 = vmov 1983009808   ;;  %v185_v39 = vlaneseq  ;;  %vm1036_vm0 = vcmask 1041408   ;;  %s6394_s29 = smov 112   ;;  %s6395_s30 = smov 96   ;;  %s9366_s2 = inlined_call_operand.vmem [shape: bf16[512,512], index: 2, kind: input, shape index: {}]   ;;  %s9367_s1 = inlined_call_operand.vmem [shape: bf16[4,512], index: 1, kind: input, shape index: {}]   ;;  %s9368_s7 = inlined_call_operand.vmem [shape: f32[4,1], index: 7, kind: input, shape index: {}]   ;;  %s9369_s3 = inlined_call_operand.vmem [shape: f32[2,512], index: 3, kind: input, shape index: {}]   ;;  %s9370_s6 = inlined_call_operand.vmem [shape: f32[4,2], index: 6, kind: input, shape index: {}]   ;;  %s9371_s0 = inlined_call_operand.vmem [shape: f32[4,512], index: 0, kind: input, shape index: {}]   ;;  %s9372_s4 = inlined_call_operand.vmem [shape: f32[5,512], index: 4, kind: input, shape index: {}]   ;;  %s9373_s8 = inlined_call_operand.vmem [shape: bf16[4,5,16,80], index: 8, kind: input, shape index: {}]   ;;  %s9374_s5 = inlined_call_operand.vmem [shape: f32[5,512], index: 5, kind: input, shape index: {}]   ;;  %s9375_s9 = inlined_call_operand.vmem [shape: f32[4,16,1], index: 9, kind: input, shape index: {}]   ;;  %s9376_s10 = inlined_call_operand.vmem [shape: f32[4,16,1], index: 10, kind: input, shape index: {}]   ;;  %s9377_s12 = inlined_call_operand.vmem [shape: f32[4,16,1], index: 12, kind: input, shape index: {}]   ;;  %s9378_s11 = inlined_call_operand.vmem [shape: bf16[4,16,16], index: 11, kind: input, shape index: {}]   ;;  %s9379_s14 = inlined_call_operand.vmem [shape: f32[3,1], index: 14, kind: input, shape index: {}]   ;;  %s9380_s13 = inlined_call_operand.vmem [shape: bf16[3,16], index: 13, kind: input, shape index: {}]   ;;  %s9381_s15 = inlined_call_operand.vmem [shape: f32[3,512], index: 15, kind: output, shape index: {}]  }
   0x1   :  { %v6153_v0 = vld [vmem:[%s9366_s2 + $0x4] ss:$16 sps:$4 sm:$0xff]   ;;  %v6155_v1 = vld [vmem:[%s9366_s2 + $0xc] ss:$16 sps:$4 sm:$0xff]   ;;  %v6157_v2 = vld [vmem:[%s9366_s2] ss:$16 sps:$4 sm:$0xff]   ;;  %6151 = vset.pattern.permute.xlu0 %v9382_v18  ;;  %6152 = vset.pattern.permute.xlu1 %v9382_v18  ;;  %v183_v38 = vunpack.c.l.s4 %v6390_v37 }
   0x2   :  { %842 = vmatprep.subr.bf16.mxu0 %v6153_v0  ;;  %v6158_v3 = vld [vmem:[%s9366_s2 + $0x8] ss:$16 sps:$4 sm:$0xff]   ;;  %924 = vmatprep.subr.bf16.mxu1 %v6155_v1  ;;  %v6159_v4 = vld [vmem:[%s9366_s2 + $0x24] ss:$16 sps:$4 sm:$0xff]   ;;  %v6161_v5 = vld [vmem:[%s9366_s2 + $0x2c] ss:$16 sps:$4 sm:$0xff]  }
   0x3   :  { %843 = vmatpush1.bf16.msra.mxu0 %v6157_v2  ;;  %925 = vmatpush1.bf16.msra.mxu1 %v6158_v3  ;;  %v6163_v6 = vld [vmem:[%s9366_s2 + $0x20] ss:$16 sps:$4 sm:$0xff]   ;;  %v6164_v7 = vld [vmem:[%s9366_s2 + $0x28] ss:$16 sps:$4 sm:$0xff]   ;;  %v6165_v8 = vld [vmem:[%s9366_s2 + $0x44] ss:$16 sps:$4 sm:$0xff]   ;;  %v184_v43 = vunpack.c.0.s8 %v183_v38 }
   0x4   :  { %844 = vmatprep.subr.bf16.mxu0 %v6159_v4  ;;  %926 = vmatprep.subr.bf16.mxu1 %v6161_v5  ;;  %v6167_v9 = vld [vmem:[%s9366_s2 + $0x4c] ss:$16 sps:$4 sm:$0xff]   ;;  %v6169_v10 = vld [vmem:[%s9366_s2 + $0x40] ss:$16 sps:$4 sm:$0xff]   ;;  %v6170_v11 = vld [vmem:[%s9366_s2 + $0x48] ss:$16 sps:$4 sm:$0xff]  }
   0x5   :  { %v6171_v12 = vld [vmem:[%s9366_s2 + $0x64] ss:$16 sps:$4 sm:$0xff]   ;;  %v6173_v13 = vld [vmem:[%s9366_s2 + $0x6c] ss:$16 sps:$4 sm:$0xff]   ;;  %v6175_v14 = vld [vmem:[%s9366_s2 + $0x60] ss:$16 sps:$4 sm:$0xff]  }
   0x6   :  { %v6176_v15 = vld [vmem:[%s9366_s2 + $0x68] ss:$16 sps:$4 sm:$0xff]   ;;  %v6177_v16 = vld [vmem:[%s9366_s2 + $0x84] ss:$16 sps:$4 sm:$0xff]   ;;  %v6179_v17 = vld [vmem:[%s9366_s2 + $0x8c] ss:$16 sps:$4 sm:$0xff]  }
   0x7   :  { %845 = vmatpush1.bf16.msra.mxu0 %v6163_v6  ;;  %927 = vmatpush1.bf16.msra.mxu1 %v6164_v7  ;;  %v6181_v19 = vld [vmem:[%s9366_s2 + $0x80] ss:$16 sps:$4 sm:$0xff]   ;;  %v6182_v20 = vld [vmem:[%s9366_s2 + $0x88] ss:$16 sps:$4 sm:$0xff]   ;;  %v6183_v21 = vld [vmem:[%s9366_s2 + $0xa4] ss:$16 sps:$4 sm:$0xff]  }
   0x8   :  { %846 = vmatprep.subr.bf16.mxu0 %v6165_v8  ;;  %928 = vmatprep.subr.bf16.mxu1 %v6167_v9  ;;  %v6185_v22 = vld [vmem:[%s9366_s2 + $0xac] ss:$16 sps:$4 sm:$0xff]   ;;  %v6187_v23 = vld [vmem:[%s9366_s2 + $0xa0] ss:$16 sps:$4 sm:$0xff]   ;;  %v6188_v24 = vld [vmem:[%s9366_s2 + $0xa8] ss:$16 sps:$4 sm:$0xff]  }
   0x9   :  { %v6189_v25 = vld [vmem:[%s9366_s2 + $0xc4] ss:$16 sps:$4 sm:$0xff]   ;;  %v6191_v26 = vld [vmem:[%s9366_s2 + $0xcc] ss:$16 sps:$4 sm:$0xff]   ;;  %v6193_v27 = vld [vmem:[%s9366_s2 + $0xc0] ss:$16 sps:$4 sm:$0xff]  }
   0xa   :  { %v6194_v28 = vld [vmem:[%s9366_s2 + $0xc8] ss:$16 sps:$4 sm:$0xff]   ;;  %v6195_v29 = vld [vmem:[%s9366_s2 + $0xe4] ss:$16 sps:$4 sm:$0xff]   ;;  %v6197_v30 = vld [vmem:[%s9366_s2 + $0xec] ss:$16 sps:$4 sm:$0xff]  }
   0xb   :  { %847 = vmatpush1.bf16.msra.mxu0 %v6169_v10  ;;  %929 = vmatpush1.bf16.msra.mxu1 %v6170_v11  ;;  %v6199_v31 = vld [vmem:[%s9366_s2 + $0xe0] ss:$16 sps:$4 sm:$0xff]   ;;  %v6200_v32 = vld [vmem:[%s9366_s2 + $0xe8] ss:$16 sps:$4 sm:$0xff]   ;;  %v6201_v33 = vld [vmem:[%s9366_s2 + $0x104] ss:$16 sps:$4 sm:$0xff]  }
   0xc   :  { %848 = vmatprep.subr.bf16.mxu0 %v6171_v12  ;;  %930 = vmatprep.subr.bf16.mxu1 %v6173_v13  ;;  %v6203_v34 = vld [vmem:[%s9366_s2 + $0x10c] ss:$16 sps:$4 sm:$0xff]   ;;  %v6205_v35 = vld [vmem:[%s9366_s2 + $0x100] ss:$16 sps:$4 sm:$0xff]   ;;  %v6206_v36 = vld [vmem:[%s9366_s2 + $0x108] ss:$16 sps:$4 sm:$0xff]  }
   0xd   :  { %v6207_v40 = vld [vmem:[%s9366_s2 + $0x124] ss:$16 sps:$4 sm:$0xff]   ;;  %v6209_v41 = vld [vmem:[%s9366_s2 + $0x12c] ss:$16 sps:$4 sm:$0xff]   ;;  %v6211_v42 = vld [vmem:[%s9366_s2 + $0x120] ss:$16 sps:$4 sm:$0xff]  }
   0xe   :  { %v6600_v44 = vshrl.u32 %v185_v39, 7  ;;  %v6212_v45 = vld [vmem:[%s9366_s2 + $0x128] ss:$16 sps:$4 sm:$0xff]   ;;  %v6213_v46 = vld [vmem:[%s9366_s2 + $0x144] ss:$16 sps:$4 sm:$0xff]   ;;  %vm1032_vm1 = vcmask 15360  }
   0xf   :  { %849 = vmatpush1.bf16.msra.mxu0 %v6175_v14  ;;  %931 = vmatpush1.bf16.msra.mxu1 %v6176_v15  ;;  %v6215_v47 = vld [vmem:[%s9366_s2 + $0x14c] ss:$16 sps:$4 sm:$0xff]   ;;  %v6217_v48 = vld [vmem:[%s9366_s2 + $0x140] ss:$16 sps:$4 sm:$0xff]   ;;  %v6218_v49 = vld [vmem:[%s9366_s2 + $0x148] ss:$16 sps:$4 sm:$0xff]  }
  0x10   :  { %850 = vmatprep.subr.bf16.mxu0 %v6177_v16  ;;  %932 = vmatprep.subr.bf16.mxu1 %v6179_v17  ;;  %v6618_v50 = vsub.s32 %v184_v43, %v6600_v44  ;;  %v6219_v51 = vld [vmem:[%s9366_s2 + $0x164] ss:$16 sps:$4 sm:$0xff]   ;;  %v6221_v52 = vld [vmem:[%s9366_s2 + $0x16c] ss:$16 sps:$4 sm:$0xff]   ;;  %v6223_v54 = vld [vmem:[%s9366_s2 + $0x160] ss:$16 sps:$4 sm:$0xff]  }
  0x11   :  { %v51_v53 = vld [vmem:[%s9367_s1] sm:$0xff]  ;;  %v6224_v56 = vld [vmem:[%s9366_s2 + $0x168] ss:$16 sps:$4 sm:$0xff]   ;;  %v6227_v58 = vld [vmem:[%s9366_s2 + $0x18c] ss:$16 sps:$4 sm:$0xff]   ;;  %vm1207_vm2 = vcmask 1043456  }
  0x12   :  { %v188_v55 = vrot.slane %v51_v53, %v6618_v50  ;;  %v6225_v57 = vld [vmem:[%s9366_s2 + $0x184] ss:$16 sps:$4 sm:$0xff]   ;;  %v6229_v60 = vld [vmem:[%s9366_s2 + $0x180] ss:$16 sps:$4 sm:$0xff]   ;;  %v6230_v61 = vld [vmem:[%s9366_s2 + $0x188] ss:$16 sps:$4 sm:$0xff]   ;;  %v181_v8 = vcombine.high %v51_v53, %v51_v53 }
  0x13   :  { %851 = vmatpush1.bf16.msra.mxu0 %v6181_v19  ;;  %933 = vmatpush1.bf16.msra.mxu1 %v6182_v20  ;;  %v6231_v62 = vld [vmem:[%s9366_s2 + $0x1a4] ss:$16 sps:$4 sm:$0xff]   ;;  %v6233_v63 = vld [vmem:[%s9366_s2 + $0x1ac] ss:$16 sps:$4 sm:$0xff]   ;;  %v6235_v0 = vld [vmem:[%s9366_s2 + $0x1a0] ss:$16 sps:$4 sm:$0xff]  }
  0x14   :  { %852 = vmatprep.subr.bf16.mxu0 %v6183_v21  ;;  %934 = vmatprep.subr.bf16.mxu1 %v6185_v22  ;;  %v196_v59 = vcombine.high %v188_v55, %v188_v55  ;;  %v6236_v1 = vld [vmem:[%s9366_s2 + $0x1a8] ss:$16 sps:$4 sm:$0xff]   ;;  %v6237_v2 = vld [vmem:[%s9366_s2 + $0x1c4] ss:$16 sps:$4 sm:$0xff]   ;;  %v6239_v3 = vld [vmem:[%s9366_s2 + $0x1cc] ss:$16 sps:$4 sm:$0xff]   ;;  %v6691_v13 = vrot.slane %v181_v8, %v6618_v50 }
  0x15   :  { %v6241_v4 = vld [vmem:[%s9366_s2 + $0x1c0] ss:$16 sps:$4 sm:$0xff]   ;;  %v6242_v5 = vld [vmem:[%s9366_s2 + $0x1c8] ss:$16 sps:$4 sm:$0xff]   ;;  %v6243_v6 = vld [vmem:[%s9366_s2 + $0x1e4] ss:$16 sps:$4 sm:$0xff]  }
  0x16   :  { %874 = vmatprep.mubr.bf16.mxu0 %v196_v59  ;;  %956 = vmatprep.mubr.bf16.mxu1 %v196_v59  ;;  %v6245_v7 = vld [vmem:[%s9366_s2 + $0x1ec] ss:$16 sps:$4 sm:$0xff]   ;;  %v6247_v9 = vld [vmem:[%s9366_s2 + $0x1e0] ss:$16 sps:$4 sm:$0xff]   ;;  %v6248_v10 = vld [vmem:[%s9366_s2 + $0x1e8] ss:$16 sps:$4 sm:$0xff]   ;;  %v197_v19 = vcombine.high %v6691_v13, %v6691_v13 }
  0x17   :  { %853 = vmatpush1.bf16.msra.mxu0 %v6187_v23  ;;  %935 = vmatpush1.bf16.msra.mxu1 %v6188_v24  ;;  %v6252_v11 = vld [vmem:[%s9366_s2 + $0x204] ss:$16 sps:$4 sm:$0xff]   ;;  %v6255_v12 = vld [vmem:[%s9366_s2 + $0x20c] ss:$16 sps:$4 sm:$0xff]   ;;  %v6250_v14 = vld [vmem:[%s9366_s2 + $0x200] ss:$16 sps:$4 sm:$0xff]  }
  0x18   :  { %854 = vmatprep.subr.bf16.mxu0 %v6189_v25  ;;  %936 = vmatprep.subr.bf16.mxu1 %v6191_v26  ;;  %v6253_v15 = vld [vmem:[%s9366_s2 + $0x208] ss:$16 sps:$4 sm:$0xff]   ;;  %v6258_v16 = vld [vmem:[%s9366_s2 + $0x224] ss:$16 sps:$4 sm:$0xff]   ;;  %v6261_v17 = vld [vmem:[%s9366_s2 + $0x22c] ss:$16 sps:$4 sm:$0xff]  }
  0x19   :  { %v6256_v20 = vld [vmem:[%s9366_s2 + $0x220] ss:$16 sps:$4 sm:$0xff]   ;;  %v6259_v21 = vld [vmem:[%s9366_s2 + $0x228] ss:$16 sps:$4 sm:$0xff]   ;;  %v6264_v22 = vld [vmem:[%s9366_s2 + $0x244] ss:$16 sps:$4 sm:$0xff]  }
  0x1a   :  { %v6267_v23 = vld [vmem:[%s9366_s2 + $0x24c] ss:$16 sps:$4 sm:$0xff]   ;;  %v6262_v24 = vld [vmem:[%s9366_s2 + $0x240] ss:$16 sps:$4 sm:$0xff]   ;;  %v6265_v25 = vld [vmem:[%s9366_s2 + $0x248] ss:$16 sps:$4 sm:$0xff]  }
  0x1b   :  { %855 = vmatpush1.bf16.msra.mxu0 %v6193_v27  ;;  %937 = vmatpush1.bf16.msra.mxu1 %v6194_v28  ;;  %v6270_v26 = vld [vmem:[%s9366_s2 + $0x264] ss:$16 sps:$4 sm:$0xff]   ;;  %v6273_v27 = vld [vmem:[%s9366_s2 + $0x26c] ss:$16 sps:$4 sm:$0xff]   ;;  %v6268_v28 = vld [vmem:[%s9366_s2 + $0x260] ss:$16 sps:$4 sm:$0xff]  }
  0x1c   :  { %856 = vmatprep.subr.bf16.mxu0 %v6195_v29  ;;  %938 = vmatprep.subr.bf16.mxu1 %v6197_v30  ;;  %v6271_v29 = vld [vmem:[%s9366_s2 + $0x268] ss:$16 sps:$4 sm:$0xff]   ;;  %v6276_v30 = vld [vmem:[%s9366_s2 + $0x284] ss:$16 sps:$4 sm:$0xff]   ;;  %v6315_v59 = vld [vmem:[%s9366_s2 + $0x34c] ss:$16 sps:$4 sm:$0xff]  }
  0x1d   :  { %v6283_v37 = vld [vmem:[%s9366_s2 + $0x2a8] ss:$16 sps:$4 sm:$0xff]   ;;  %v6288_v38 = vld [vmem:[%s9366_s2 + $0x2c4] ss:$16 sps:$4 sm:$0xff]   ;;  %s6392_s1 = smov 32   ;;  %vm1548_vm7 = vcmask 654336  }
  0x1e   :  { %v6289_v43 = vld [vmem:[%s9366_s2 + $0x2c8] ss:$16 sps:$4 sm:$0xff]   ;;  %v1007_v8 = vld [vmem:[%s9369_s3] sm:$0xff]  ;;  %s6393_s3 = smov 16   ;;  %s6396_s16 = smov 2   ;;  %vm2435_vm12 = vcmask 130048  }
  0x1f   :  { %857 = vmatpush1.bf16.msra.mxu0 %v6199_v31  ;;  %939 = vmatpush1.bf16.msra.mxu1 %v6200_v32  ;;  %v6279_v31 = vld [vmem:[%s9366_s2 + $0x28c] ss:$16 sps:$4 sm:$0xff]   ;;  %v6274_v32 = vld [vmem:[%s9366_s2 + $0x280] ss:$16 sps:$4 sm:$0xff]   ;;  %v6301_v53 = vld [vmem:[%s9366_s2 + $0x308] ss:$16 sps:$4 sm:$0xff]  }
  0x20   :  { %858 = vmatprep.subr.bf16.mxu0 %v6201_v33  ;;  %940 = vmatprep.subr.bf16.mxu1 %v6203_v34  ;;  %v6277_v33 = vld [vmem:[%s9366_s2 + $0x288] ss:$16 sps:$4 sm:$0xff]   ;;  %v6282_v34 = vld [vmem:[%s9366_s2 + $0x2a4] ss:$16 sps:$4 sm:$0xff]   ;;  %s6397_s17 = smov 1   ;;  %s6398_s18 = smov 127  }
  0x21   :  { %s6399_s19 = smov 126  }
  0x23   :  { %859 = vmatpush1.bf16.msra.mxu0 %v6205_v35  ;;  %941 = vmatpush1.bf16.msra.mxu1 %v6206_v36  ;;  %v6285_v35 = vld [vmem:[%s9366_s2 + $0x2ac] ss:$16 sps:$4 sm:$0xff]   ;;  %v6280_v36 = vld [vmem:[%s9366_s2 + $0x2a0] ss:$16 sps:$4 sm:$0xff]  }
  0x24   :  { %860 = vmatprep.subr.bf16.mxu0 %v6207_v40  ;;  %942 = vmatprep.subr.bf16.mxu1 %v6209_v41  ;;  %v6291_v40 = vld [vmem:[%s9366_s2 + $0x2cc] ss:$16 sps:$4 sm:$0xff]   ;;  %v1008_v41 = vld [vmem:[%s9368_s7] sm:$0xf] }
  0x25   :  { %1011 = vperm.xlu0 %6151, %v1008_v41  }
  0x27   :  { %861 = vmatpush1.bf16.msra.mxu0 %v6211_v42  ;;  %943 = vmatpush1.bf16.msra.mxu1 %v6212_v45  ;;  %v6286_v42 = vld [vmem:[%s9366_s2 + $0x2c0] ss:$16 sps:$4 sm:$0xff]   ;;  %v6294_v45 = vld [vmem:[%s9366_s2 + $0x2e4] ss:$16 sps:$4 sm:$0xff]  }
  0x28   :  { %862 = vmatprep.subr.bf16.mxu0 %v6213_v46  ;;  %944 = vmatprep.subr.bf16.mxu1 %v6215_v47  ;;  %v6297_v46 = vld [vmem:[%s9366_s2 + $0x2ec] ss:$16 sps:$4 sm:$0xff]   ;;  %v6292_v47 = vld [vmem:[%s9366_s2 + $0x2e0] ss:$16 sps:$4 sm:$0xff]  }
  0x2b   :  { %863 = vmatpush1.bf16.msra.mxu0 %v6217_v48  ;;  %945 = vmatpush1.bf16.msra.mxu1 %v6218_v49  ;;  %v6295_v48 = vld [vmem:[%s9366_s2 + $0x2e8] ss:$16 sps:$4 sm:$0xff]   ;;  %v6300_v49 = vld [vmem:[%s9366_s2 + $0x304] ss:$16 sps:$4 sm:$0xff]  }
  0x2c   :  { %864 = vmatprep.subr.bf16.mxu0 %v6219_v51  ;;  %946 = vmatprep.subr.bf16.mxu1 %v6221_v52  ;;  %v6303_v51 = vld [vmem:[%s9366_s2 + $0x30c] ss:$16 sps:$4 sm:$0xff]   ;;  %v6298_v52 = vld [vmem:[%s9366_s2 + $0x300] ss:$16 sps:$4 sm:$0xff]  }
  0x2f   :  { %865 = vmatpush1.bf16.msra.mxu0 %v6223_v54  ;;  %947 = vmatpush1.bf16.msra.mxu1 %v6224_v56  ;;  %v6306_v54 = vld [vmem:[%s9366_s2 + $0x324] ss:$16 sps:$4 sm:$0xff]   ;;  %v6304_v56 = vld [vmem:[%s9366_s2 + $0x320] ss:$16 sps:$4 sm:$0xff]  }
  0x30   :  { %866 = vmatprep.subr.bf16.mxu0 %v6225_v57  ;;  %948 = vmatprep.subr.bf16.mxu1 %v6227_v58  ;;  %v6307_v57 = vld [vmem:[%s9366_s2 + $0x328] ss:$16 sps:$4 sm:$0xff]   ;;  %v6312_v58 = vld [vmem:[%s9366_s2 + $0x344] ss:$16 sps:$4 sm:$0xff]  }
  0x33   :  { %867 = vmatpush1.bf16.msra.mxu0 %v6229_v60  ;;  %949 = vmatpush1.bf16.msra.mxu1 %v6230_v61  ;;  %v6310_v60 = vld [vmem:[%s9366_s2 + $0x340] ss:$16 sps:$4 sm:$0xff]   ;;  %v6313_v61 = vld [vmem:[%s9366_s2 + $0x348] ss:$16 sps:$4 sm:$0xff]  }
  0x34   :  { %868 = vmatprep.subr.bf16.mxu0 %v6231_v62  ;;  %950 = vmatprep.subr.bf16.mxu1 %v6233_v63  ;;  %v6318_v62 = vld [vmem:[%s9366_s2 + $0x364] ss:$16 sps:$4 sm:$0xff]   ;;  %v6321_v63 = vld [vmem:[%s9366_s2 + $0x36c] ss:$16 sps:$4 sm:$0xff]  }
  0x37   :  { %869 = vmatpush1.bf16.msra.mxu0 %v6235_v0  ;;  %951 = vmatpush1.bf16.msra.mxu1 %v6236_v1  ;;  %v6316_v0 = vld [vmem:[%s9366_s2 + $0x360] ss:$16 sps:$4 sm:$0xff]   ;;  %v6319_v1 = vld [vmem:[%s9366_s2 + $0x368] ss:$16 sps:$4 sm:$0xff]  }
  0x38   :  { %870 = vmatprep.subr.bf16.mxu0 %v6237_v2  ;;  %952 = vmatprep.subr.bf16.mxu1 %v6239_v3  ;;  %v6324_v2 = vld [vmem:[%s9366_s2 + $0x384] ss:$16 sps:$4 sm:$0xff]   ;;  %v6327_v3 = vld [vmem:[%s9366_s2 + $0x38c] ss:$16 sps:$4 sm:$0xff]  }
  0x3b   :  { %871 = vmatpush1.bf16.msra.mxu0 %v6241_v4  ;;  %953 = vmatpush1.bf16.msra.mxu1 %v6242_v5  ;;  %v6322_v4 = vld [vmem:[%s9366_s2 + $0x380] ss:$16 sps:$4 sm:$0xff]   ;;  %v6325_v5 = vld [vmem:[%s9366_s2 + $0x388] ss:$16 sps:$4 sm:$0xff]  }
  0x3c   :  { %872 = vmatprep.subr.bf16.mxu0 %v6243_v6  ;;  %954 = vmatprep.subr.bf16.mxu1 %v6245_v7  ;;  %v6330_v6 = vld [vmem:[%s9366_s2 + $0x3a4] ss:$16 sps:$4 sm:$0xff]   ;;  %v6333_v7 = vld [vmem:[%s9366_s2 + $0x3ac] ss:$16 sps:$4 sm:$0xff]  }
  0x3f   :  { %873 = vmatpush1.bf16.msra.mxu0 %v6247_v9  ;;  %955 = vmatpush1.bf16.msra.mxu1 %v6248_v10  ;;  %v6328_v9 = vld [vmem:[%s9366_s2 + $0x3a0] ss:$16 sps:$4 sm:$0xff]   ;;  %v6331_v10 = vld [vmem:[%s9366_s2 + $0x3a8] ss:$16 sps:$4 sm:$0xff]  }
  0x40   :  { %883 = vmatprep.subr.bf16.mxu0 %v6252_v11  ;;  %965 = vmatprep.subr.bf16.mxu1 %v6255_v12  ;;  %v6336_v11 = vld [vmem:[%s9366_s2 + $0x3c4] ss:$16 sps:$4 sm:$0xff]   ;;  %v6339_v12 = vld [vmem:[%s9366_s2 + $0x3cc] ss:$16 sps:$4 sm:$0xff]  }
  0x42   :  { %875 = vmatmul.mubr.bf16.vlgmr.msra.gmra.mrb[0].mxu0 %v188_v55  ;;  %957 = vmatmul.mubr.bf16.vlgmr.msra.gmra.mrb[0].mxu1 %v188_v55  ;;  %v6309_v55 = vld [vmem:[%s9366_s2 + $0x32c] ss:$16 sps:$4 sm:$0xff]  }
  0x43   :  { %884 = vmatpush1.bf16.msra.mxu0 %v6250_v14  ;;  %966 = vmatpush1.bf16.msra.mxu1 %v6253_v15  ;;  %v1015_v14 = vcombine.high %v1007_v8, %v1007_v8  ;;  %v6334_v15 = vld [vmem:[%s9366_s2 + $0x3c0] ss:$16 sps:$4 sm:$0xff]  }
  0x44   :  { %885 = vmatprep.subr.bf16.mxu0 %v6258_v16  ;;  %967 = vmatprep.subr.bf16.mxu1 %v6261_v17  ;;  %v6337_v16 = vld [vmem:[%s9366_s2 + $0x3c8] ss:$16 sps:$4 sm:$0xff]   ;;  %v6342_v17 = vld [vmem:[%s9366_s2 + $0x3e4] ss:$16 sps:$4 sm:$0xff]  }
  0x45   :  { %915 = vmatprep.mubr.bf16.mxu0 %v197_v19  ;;  %997 = vmatprep.mubr.bf16.mxu1 %v197_v19  ;;  %v6345_v19 = vld [vmem:[%s9366_s2 + $0x3ec] ss:$16 sps:$4 sm:$0xff]  }
  0x47   :  { %886 = vmatpush1.bf16.msra.mxu0 %v6256_v20  ;;  %968 = vmatpush1.bf16.msra.mxu1 %v6259_v21  ;;  %v1029_v20 = vrot.slane %v1015_v14, %v6618_v50  ;;  %v1022_v21 = vrot.slane %v1007_v8, %v6618_v50  ;;  %v6391_v50 = vmov 0.0  }
  0x48   :  { %887 = vmatprep.subr.bf16.mxu0 %v6264_v22  ;;  %969 = vmatprep.subr.bf16.mxu1 %v6267_v23  ;;  %v6340_v22 = vld [vmem:[%s9366_s2 + $0x3e0] ss:$16 sps:$4 sm:$0xff]   ;;  %v6343_v23 = vld [vmem:[%s9366_s2 + $0x3e8] ss:$16 sps:$4 sm:$0xff]  }
  0x4b   :  { %888 = vmatpush1.bf16.msra.mxu0 %v6262_v24  ;;  %970 = vmatpush1.bf16.msra.mxu1 %v6265_v25  ;;  %v1031_v24 = vcombine.high %v1029_v20, %v1029_v20  ;;  %v1030_v25 = vcombine.high %v1022_v21, %v1022_v21 }
  0x4c   :  { %889 = vmatprep.subr.bf16.mxu0 %v6270_v26  ;;  %971 = vmatprep.subr.bf16.mxu1 %v6273_v27  ;;  %v1006_v26 = vld [vmem:[%s9370_s6] sm:$0xf] }
  0x4f   :  { %890 = vmatpush1.bf16.msra.mxu0 %v6268_v28  ;;  %972 = vmatpush1.bf16.msra.mxu1 %v6271_v29  ;;  %v1188_v29 = vld [vmem:[%s9371_s0 + $0x8] sm:$0xff] }
  0x50   :  { %891 = vmatprep.subr.bf16.mxu0 %v6276_v30  ;;  %973 = vmatprep.subr.bf16.mxu1 %v6279_v31 }
  0x53   :  { %892 = vmatpush1.bf16.msra.mxu0 %v6274_v32  ;;  %974 = vmatpush1.bf16.msra.mxu1 %v6277_v33 }
  0x54   :  { %893 = vmatprep.subr.bf16.mxu0 %v6282_v34  ;;  %975 = vmatprep.subr.bf16.mxu1 %v6285_v35 }
  0x57   :  { %894 = vmatpush1.bf16.msra.mxu0 %v6280_v36  ;;  %976 = vmatpush1.bf16.msra.mxu1 %v6283_v37  ;;  %v6903_v36 = vsub.s32 0, %v6600_v44  ;;  %v6906_v37 = vsub.s32 2, %v6600_v44 }
  0x58   :  { %895 = vmatprep.subr.bf16.mxu0 %v6288_v38  ;;  %977 = vmatprep.subr.bf16.mxu1 %v6291_v40 }
  0x5b   :  { %896 = vmatpush1.bf16.msra.mxu0 %v6286_v42  ;;  %978 = vmatpush1.bf16.msra.mxu1 %v6289_v43  ;;  %v5989_v43 = vld [vmem:[%s9372_s4 + $0x2] ss:$8 sm:$0xf] }
  0x5c   :  { %897 = vmatprep.subr.bf16.mxu0 %v6294_v45  ;;  %979 = vmatprep.subr.bf16.mxu1 %v6297_v46  ;;  %v6920_v45 = vsub.s32 1, %v6600_v44  ;;  %v6923_v46 = vsub.s32 3, %v6600_v44 }
  0x5e   :  { %v6936_v44 = vrot.slane %v5989_v43, %v6920_v45 }
  0x5f   :  { %898 = vmatpush1.bf16.msra.mxu0 %v6292_v47  ;;  %980 = vmatpush1.bf16.msra.mxu1 %v6295_v48  ;;  %v1192_v48 = vcombine.high %v1188_v29, %v1188_v29 }
  0x60   :  { %899 = vmatprep.subr.bf16.mxu0 %v6300_v49  ;;  %981 = vmatprep.subr.bf16.mxu1 %v6303_v51  ;;  %9475 = vst [vmem:[#allocation4_spill] sm:$0xff] %v6936_v44 }
  0x63   :  { %900 = vmatpush1.bf16.msra.mxu0 %v6298_v52  ;;  %982 = vmatpush1.bf16.msra.mxu1 %v6301_v53  ;;  %v6928_v53 = vrot.slane %v5989_v43, %v6903_v36 }
  0x64   :  { %901 = vmatprep.subr.bf16.mxu0 %v6306_v54  ;;  %983 = vmatprep.subr.bf16.mxu1 %v6309_v55  ;;  %v6931_v54 = vrot.slane %v5989_v43, %v6906_v37 }
  0x66   :  { %9474 = vst [vmem:[#allocation3_spill] sm:$0xff] %v6931_v54 }
  0x67   :  { %902 = vmatpush1.bf16.msra.mxu0 %v6304_v56  ;;  %984 = vmatpush1.bf16.msra.mxu1 %v6307_v57  ;;  %v6939_v57 = vrot.slane %v5989_v43, %v6923_v46 }
  0x68   :  { %903 = vmatprep.subr.bf16.mxu0 %v6312_v58  ;;  %985 = vmatprep.subr.bf16.mxu1 %v6315_v59 }
  0x69   :  { %9476 = vst [vmem:[#allocation5_spill] sm:$0xff] %v6939_v57 }
  0x6b   :  { %904 = vmatpush1.bf16.msra.mxu0 %v6310_v60  ;;  %986 = vmatpush1.bf16.msra.mxu1 %v6313_v61 }
  0x6c   :  { %905 = vmatprep.subr.bf16.mxu0 %v6318_v62  ;;  %987 = vmatprep.subr.bf16.mxu1 %v6321_v63 }
  0x6f   :  { %906 = vmatpush1.bf16.msra.mxu0 %v6316_v0  ;;  %988 = vmatpush1.bf16.msra.mxu1 %v6319_v1 }
  0x70   :  { %907 = vmatprep.subr.bf16.mxu0 %v6324_v2  ;;  %989 = vmatprep.subr.bf16.mxu1 %v6327_v3 }
  0x73   :  { %908 = vmatpush1.bf16.msra.mxu0 %v6322_v4  ;;  %990 = vmatpush1.bf16.msra.mxu1 %v6325_v5 }
  0x74   :  { %909 = vmatprep.subr.bf16.mxu0 %v6330_v6  ;;  %991 = vmatprep.subr.bf16.mxu1 %v6333_v7 }
  0x77   :  { %910 = vmatpush1.bf16.msra.mxu0 %v6328_v9  ;;  %992 = vmatpush1.bf16.msra.mxu1 %v6331_v10 }
  0x78   :  { %911 = vmatprep.subr.bf16.mxu0 %v6336_v11  ;;  %993 = vmatprep.subr.bf16.mxu1 %v6339_v12 }
  0x7b   :  { %912 = vmatpush1.bf16.msra.mxu0 %v6334_v15  ;;  %994 = vmatpush1.bf16.msra.mxu1 %v6337_v16 }
  0x7c   :  { %913 = vmatprep.subr.bf16.mxu0 %v6342_v17  ;;  %995 = vmatprep.subr.bf16.mxu1 %v6345_v19 }
  0x7f   :  { %914 = vmatpush1.bf16.msra.mxu0 %v6340_v22  ;;  %996 = vmatpush1.bf16.msra.mxu1 %v6343_v23 }
  0x80   :  { %5985 = vmatprep.subr.msk.mxu1 %vm1036_vm0, %v1031_v24  ;;  %5982 = vmatprep.subr.msk.mxu0 %vm1036_vm0, %v1030_v25 }
  0x82   :  { %916 = vmatmul.mubr.bf16.vlgmr.msra.gmra.mrb[0].mxu0 %v6691_v13  ;;  %998 = vmatmul.mubr.bf16.vlgmr.msra.gmra.mrb[0].mxu1 %v6691_v13  ;;  %v1187_v13 = vld [vmem:[%s9371_s0] sm:$0xff] }
  0x83   :  { %5986 = vmatpush1.msk.msra.mxu1 %vm1036_vm0, %v1029_v20  ;;  %5983 = vmatpush1.msk.msra.mxu0 %vm1036_vm0, %v1022_v21  ;;  %v1191_v47 = vcombine.high %v1187_v13, %v1187_v13 }
  0x84   :  { %1109 = vmatprep.mubr.f32.mxu0 %v6391_v50  ;;  %1180 = vmatprep.mubr.f32.mxu1 %v6391_v50 }
  0x8a   :  { %5984 = vmatmul.mubr.msk.f32.vlgmr.msra.gmra.mrb[4].mxu0 %vm1032_vm1, %v1006_v26  ;;  %5987 = vmatmul.mubr.msk.f32.vlgmr.msra.gmra.mrb[4].mxu1 %vm1032_vm1, %v1006_v26 }
  0x8b   :  { %1584 = vmatprep.mubr.bf16.mxu0 %v9382_v18  ;;  %1627 = vmatprep.mubr.bf16.mxu1 %v9382_v18 }
  0xa4   :  { %v1012_v52 = vpop.permute.xlu0 %1011 }
 0x155   :  { %v917_v27 = vpop.f32.mrb[0].mxu0  ;;  %v999_v28 = vpop.f32.mrb[0].mxu1 }
 0x156   :  { %v1199_v30 = vrot.slane %v917_v27, 4  ;;  %v1201_v31 = vrot.slane %v999_v28, 4  ;;  %v919_v32 = vpop.f32.mrb[1].mxu0  ;;  %v1001_v33 = vpop.f32.mrb[1].mxu1 }
 0x157   :  { %v921_v34 = vpop.f32.mrb[2].mxu0  ;;  %v1003_v35 = vpop.f32.mrb[2].mxu1  ;;  %v1200_v49 = vrot.slane %v919_v32, 4  ;;  %v1202_v51 = vrot.slane %v1001_v33, 4  ;;  %v7018_v33 = vand.u32 127, %v185_v39 }
 0x158   :  { %v6909_v38 = vsel %vm1207_vm2, %v1187_v13, %v1199_v30  ;;  %v6912_v40 = vsel %vm1207_vm2, %v1188_v29, %v1201_v31  ;;  %v922_v41 = vpop.f32.mrb[3].mxu0  ;;  %v1004_v42 = vpop.f32.mrb[3].mxu1 }
 0x159   :  { %1242 = vrot.lane.b32.xlu1 %v6912_v40, %s6392_s1  ;;  %1234 = vrot.lane.b32.xlu0 %v6909_v38, %s6392_s1  ;;  %v1209_v62 = vsel %vm1207_vm2, %v1191_v47, %v1200_v49  ;;  %v1211_v63 = vsel %vm1207_vm2, %v1192_v48, %v1202_v51  ;;  %v1381_v2 = vmul.f32 %v6928_v53, %v6909_v38  ;;  %vm1252_vm3 = vcmp.lt.s32.totalorder %v7018_v33, 32  ;;  %v5988_v49 = vld [vmem:[%s9372_s4 + $0x1] ss:$8 sm:$0xf] }
 0x15a   :  { %v1383_v3 = vmul.f32 %v6931_v54, %v6912_v40  ;;  %v1382_v10 = vmul.f32 %v6936_v44, %v1209_v62  ;;  %v1384_v11 = vmul.f32 %v6939_v57, %v1211_v63  ;;  %vm1314_vm4 = vcmp.lt.s32.totalorder %v7018_v33, 16 }
 0x15b   :  { %vm1413_vm5 = vcmp.lt.s32.totalorder %v7018_v33, 112  ;;  %vm1475_vm6 = vcmp.lt.s32.totalorder %v7018_v33, 96  ;;  %vm1654_vm8 = vcmp.lt.s32.totalorder %v7018_v33, 2  ;;  %vm1813_vm9 = vcmp.lt.s32.totalorder %v7018_v33, 1 }
 0x15c   :  { %vm2106_vm10 = vcmp.lt.s32.totalorder %v7018_v33, 127  ;;  %vm2265_vm11 = vcmp.lt.s32.totalorder %v7018_v33, 126  ;;  %v6120_v33 = vld [vmem:[%s9375_s9 + $0x38] sm:$0xff] }
 0x15d   :  { %v1111_v55 = vpop.f32.mrb[4].mxu0  ;;  %v1182_v56 = vpop.f32.mrb[4].mxu1  ;;  %1298 = vrot.lane.b32.xlu1 %v6909_v38, %s6393_s3 }
 0x15e   :  { %v1112_v58 = vadd.f32 %v1111_v55, %v1012_v52  ;;  %v1183_v59 = vadd.f32 %v1182_v56, %v1012_v52  ;;  %v1113_v60 = vpop.f32.mrb[5].mxu0  ;;  %v1184_v61 = vpop.f32.mrb[5].mxu1 }
 0x15f   :  { %v1114_v0 = vadd.f32 %v1113_v60, %v1012_v52  ;;  %v1185_v1 = vadd.f32 %v1184_v61, %v1012_v52  ;;  %v7057_v60 = vrot.slane %v5988_v49, %v6920_v45 }
 0x160   :  { %v1212_v4 = vsel %vm1207_vm2, %v1112_v58, 0.0  ;;  %v1214_v5 = vsel %vm1207_vm2, %v1183_v59, 0.0 }
 0x161   :  { %v1385_v6 = vmul.f32 %v6928_v53, %v1212_v4  ;;  %v1387_v7 = vmul.f32 %v6931_v54, %v1214_v5  ;;  %v1213_v8 = vsel %vm1207_vm2, %v1114_v0, 0.0  ;;  %v1215_v9 = vsel %vm1207_vm2, %v1185_v1, 0.0  ;;  %1306 = vrot.lane.b32.xlu1 %v6912_v40, %s6393_s3  ;;  %1244 = vrot.lane.b32.xlu0 %v1214_v5, %s6392_s1  ;;  %9481 = vst [vmem:[#allocation10_spill] sm:$0xff] %v7057_v60 }
 0x162   :  { %v1386_v12 = vmul.f32 %v6936_v44, %v1213_v8  ;;  %v1388_v14 = vmul.f32 %v6939_v57, %v1215_v9 }
 0x163   :  { %v6960_v15 = vpack.c.bf16 %v1385_v6, %v1381_v2  ;;  %v6962_v16 = vpack.c.bf16 %v1387_v7, %v1383_v3 }
 0x164   :  { %v6964_v17 = vpack.c.bf16 %v1386_v12, %v1382_v10  ;;  %v6966_v19 = vpack.c.bf16 %v1388_v14, %v1384_v11 }
 0x165   :  { %1405 = vrot.lane.b32.xlu1 %v6912_v40, %s6394_s29  ;;  %1300 = vrot.lane.b32.xlu0 %v1212_v4, %s6393_s3 }
 0x169   :  { %1397 = vrot.lane.b32.xlu1 %v6909_v38, %s6394_s29  ;;  %1308 = vrot.lane.b32.xlu0 %v1214_v5, %s6393_s3 }
 0x16d   :  { %1407 = vrot.lane.b32.xlu0 %v1214_v5, %s6394_s29  ;;  %1238 = vrot.lane.b32.xlu1 %v1209_v62, %s6392_s1 }
 0x171   :  { %1399 = vrot.lane.b32.xlu0 %v1212_v4, %s6394_s29  ;;  %1246 = vrot.lane.b32.xlu1 %v1211_v63, %s6392_s1 }
 0x175   :  { %1469 = vrot.lane.b32.xlu0 %v1214_v5, %s6395_s30  ;;  %1302 = vrot.lane.b32.xlu1 %v1209_v62, %s6393_s3 }
 0x179   :  { %1461 = vrot.lane.b32.xlu0 %v1212_v4, %s6395_s30  ;;  %1310 = vrot.lane.b32.xlu1 %v1211_v63, %s6393_s3 }
 0x17d   :  { %1240 = vrot.lane.b32.xlu0 %v1213_v8, %s6392_s1  ;;  %1401 = vrot.lane.b32.xlu1 %v1209_v62, %s6394_s29 }
 0x181   :  { %1248 = vrot.lane.b32.xlu0 %v1215_v9, %s6392_s1  ;;  %1236 = vrot.lane.b32.xlu1 %v1212_v4, %s6392_s1 }
 0x185   :  { %1304 = vrot.lane.b32.xlu0 %v1213_v8, %s6393_s3  ;;  %1409 = vrot.lane.b32.xlu1 %v1211_v63, %s6394_s29 }
 0x189   :  { %1312 = vrot.lane.b32.xlu0 %v1215_v9, %s6393_s3  ;;  %1463 = vrot.lane.b32.xlu1 %v1209_v62, %s6395_s30 }
 0x18d   :  { %1403 = vrot.lane.b32.xlu0 %v1213_v8, %s6394_s29  ;;  %1467 = vrot.lane.b32.xlu1 %v6912_v40, %s6395_s30 }
 0x191   :  { %1411 = vrot.lane.b32.xlu0 %v1215_v9, %s6394_s29  ;;  %1459 = vrot.lane.b32.xlu1 %v6909_v38, %s6395_s30  ;;  %v1216_v38 = vld [vmem:[%s9372_s4] ss:$8 sm:$0xf] }
 0x192   :  { %v7027_v40 = vrot.slane %v1216_v38, %v6920_v45  ;;  %v7030_v41 = vrot.slane %v1216_v38, %v6903_v36  ;;  %v7037_v47 = vrot.slane %v1216_v38, %v6923_v46  ;;  %v7048_v52 = vrot.slane %v1216_v38, %v6906_v37  ;;  %v5990_v38 = vld [vmem:[%s9372_s4 + $0x3] ss:$8 sm:$0xf] }
 0x194   :  { %9477 = vst [vmem:[#allocation6_spill] sm:$0xff] %v7027_v40  ;;  %9478 = vst [vmem:[#allocation7_spill] sm:$0xff] %v7030_v41 }
 0x195   :  { %1465 = vrot.lane.b32.xlu0 %v1213_v8, %s6395_s30  ;;  %1471 = vrot.lane.b32.xlu1 %v1211_v63, %s6395_s30  ;;  %9479 = vst [vmem:[#allocation8_spill] sm:$0xff] %v7037_v47  ;;  %9480 = vst [vmem:[#allocation9_spill] sm:$0xff] %v7048_v52 }
 0x199   :  { %1473 = vrot.lane.b32.xlu0 %v1215_v9, %s6395_s30 }
 0x1cb   :  { %v1243_v20 = vpop.permute.xlu1 %1242  ;;  %v1235_v21 = vpop.permute.xlu0 %1234 }
 0x1cf   :  { %v6999_v22 = vpop.permute.xlu1 %1298 }
 0x1d3   :  { %v7001_v23 = vpop.permute.xlu1 %1306  ;;  %v1245_v24 = vpop.permute.xlu0 %1244 }
 0x1d7   :  { %v7003_v25 = vpop.permute.xlu1 %1405  ;;  %v7005_v50 = vpop.permute.xlu0 %1300 }
 0x1db   :  { %v7007_v26 = vpop.permute.xlu1 %1397  ;;  %v7009_v27 = vpop.permute.xlu0 %1308 }
 0x1df   :  { %v7011_v13 = vpop.permute.xlu0 %1407  ;;  %v1239_v28 = vpop.permute.xlu1 %1238 }
 0x1e0   :  { %v1257_v39 = vsel %vm1252_vm3, %v1235_v21, %v1239_v28  ;;  %v1255_v56 = vsel %vm1252_vm3, %v1239_v28, %v1243_v20 }
 0x1e1   :  { %v1283_v58 = vmul.f32 %v7027_v40, %v1257_v39  ;;  %v1284_v8 = vmul.f32 %v7048_v52, %v1255_v56 }
 0x1e3   :  { %v7013_v29 = vpop.permute.xlu0 %1399  ;;  %v1247_v30 = vpop.permute.xlu1 %1246 }
 0x1e4   :  { %v1259_v48 = vsel %vm1252_vm3, %v1247_v30, %v1235_v21  ;;  %v1253_v51 = vsel %vm1252_vm3, %v1243_v20, %v1247_v30  ;;  %v7081_v20 = vrot.slane %v5988_v49, %v6903_v36  ;;  %v7084_v21 = vrot.slane %v5988_v49, %v6923_v46 }
 0x1e5   :  { %v1282_v59 = vmul.f32 %v7030_v41, %v1259_v48  ;;  %v1285_v63 = vmul.f32 %v7037_v47, %v1253_v51  ;;  %v7101_v48 = vrot.slane %v5988_v49, %v6906_v37 }
 0x1e6   :  { %9482 = vst [vmem:[#allocation11_spill] sm:$0xff] %v7081_v20  ;;  %9483 = vst [vmem:[#allocation12_spill] sm:$0xff] %v7084_v21 }
 0x1e7   :  { %v7015_v31 = vpop.permute.xlu0 %1469  ;;  %v1303_v32 = vpop.permute.xlu1 %1302  ;;  %9484 = vst [vmem:[#allocation13_spill] sm:$0xff] %v7101_v48 }
 0x1e8   :  { %v1319_v7 = vsel %vm1314_vm4, %v6999_v22, %v1303_v32  ;;  %v1317_v56 = vsel %vm1314_vm4, %v1303_v32, %v7001_v23 }
 0x1e9   :  { %v1345_v28 = vmul.f32 %v7057_v60, %v1319_v7 }
 0x1eb   :  { %v7020_v34 = vpop.permute.xlu0 %1461  ;;  %v1311_v35 = vpop.permute.xlu1 %1310 }
 0x1ec   :  { %v1315_v51 = vsel %vm1314_vm4, %v7001_v23, %v1311_v35 }
 0x1ed   :  { %v1347_v32 = vmul.f32 %v7084_v21, %v1315_v51 }
 0x1ef   :  { %v1241_v42 = vpop.permute.xlu0 %1240  ;;  %v7032_v43 = vpop.permute.xlu1 %1401 }
 0x1f0   :  { %v1256_v55 = vsel %vm1252_vm3, %v1241_v42, %v1245_v24 }
 0x1f1   :  { %v1288_v3 = vmul.f32 %v7048_v52, %v1256_v55  ;;  %v1321_v55 = vsel %vm1314_vm4, %v1311_v35, %v6999_v22 }
 0x1f2   :  { %v1344_v23 = vmul.f32 %v7081_v20, %v1321_v55 }
 0x1f3   :  { %v1249_v61 = vpop.permute.xlu0 %1248  ;;  %v1237_v62 = vpop.permute.xlu1 %1236  ;;  %v7090_v30 = vpack.c.bf16 %v1288_v3, %v1284_v8  ;;  %v7151_v8 = vrot.slane %v5990_v38, %v6923_v46 }
 0x1f4   :  { %v1254_v0 = vsel %vm1252_vm3, %v1245_v24, %v1249_v61  ;;  %v1258_v1 = vsel %vm1252_vm3, %v1237_v62, %v1241_v42  ;;  %v1260_v2 = vsel %vm1252_vm3, %v1249_v61, %v1237_v62  ;;  %v7119_v61 = vrot.slane %v5990_v38, %v6920_v45 }
 0x1f5   :  { %v1289_v4 = vmul.f32 %v7037_v47, %v1254_v0  ;;  %v1286_v5 = vmul.f32 %v7030_v41, %v1260_v2  ;;  %v1287_v6 = vmul.f32 %v7027_v40, %v1258_v1  ;;  %v1346_v1 = vmul.f32 %v7101_v48, %v1317_v56  ;;  %9488 = vst [vmem:[#allocation17_spill] sm:$0xff] %v7151_v8 }
 0x1f6   :  { %9485 = vst [vmem:[#allocation14_spill] sm:$0xff] %v7119_v61  ;;  %v7139_v2 = vrot.slane %v5990_v38, %v6903_v36 }
 0x1f7   :  { %v7074_v9 = vpack.c.bf16 %v1289_v4, %v1285_v63  ;;  %v7076_v10 = vpack.c.bf16 %v1286_v5, %v1282_v59  ;;  %v7078_v11 = vpack.c.bf16 %v1287_v6, %v1283_v58  ;;  %v1305_v12 = vpop.permute.xlu0 %1304  ;;  %v1410_v14 = vpop.permute.xlu1 %1409 }
 0x1f8   :  { %v1320_v24 = vsel %vm1314_vm4, %v7005_v50, %v1305_v12  ;;  %v1318_v42 = vsel %vm1314_vm4, %v1305_v12, %v7009_v27  ;;  %9486 = vst [vmem:[#allocation15_spill] sm:$0xff] %v7139_v2  ;;  %v1414_v51 = vsel %vm1413_vm5, %v7003_v25, %v1410_v14  ;;  %v1420_v55 = vsel %vm1413_vm5, %v1410_v14, %v7007_v26 }
 0x1f9   :  { %v1349_v39 = vmul.f32 %v7057_v60, %v1320_v24  ;;  %1552 = vmatprep.subr.bf16.mxu0 %v7078_v11  ;;  %1595 = vmatprep.subr.bf16.mxu1 %v7074_v9  ;;  %v1350_v22 = vmul.f32 %v7101_v48, %v1318_v42  ;;  %v1418_v42 = vsel %vm1413_vm5, %v7007_v26, %v7032_v43 }
 0x1fa   :  { %1553 = vmatpush1.bf16.msra.mxu0 %v7076_v10  ;;  %1596 = vmatpush1.bf16.msra.mxu1 %v7090_v30 }
 0x1fb   :  { %v7115_v49 = vpack.c.bf16 %v1349_v39, %v1345_v28  ;;  %v1313_v58 = vpop.permute.xlu0 %1312  ;;  %v1464_v59 = vpop.permute.xlu1 %1463  ;;  %v7148_v7 = vpack.c.bf16 %v1350_v22, %v1346_v1  ;;  %v5991_v28 = vld [vmem:[%s9372_s4 + $0x4] ss:$8 sm:$0xf] }
 0x1fc   :  { %v1316_v35 = vsel %vm1314_vm4, %v7009_v27, %v1313_v58  ;;  %v1322_v62 = vsel %vm1314_vm4, %v1313_v58, %v7005_v50  ;;  %v1416_v27 = vsel %vm1413_vm5, %v7032_v43, %v7003_v25  ;;  %v7142_v50 = vrot.slane %v5990_v38, %v6906_v37 }
 0x1fd   :  { %v1348_v63 = vmul.f32 %v7081_v20, %v1322_v62  ;;  %v1351_v0 = vmul.f32 %v7084_v21, %v1316_v35  ;;  %1554 = vmatprep.subr.bf16.mxu0 %v7115_v49  ;;  %v1444_v38 = vmul.f32 %v7119_v61, %v1416_v27  ;;  %v7183_v58 = vrot.slane %v5991_v28, %v6920_v45 }
 0x1fe   :  { %9487 = vst [vmem:[#allocation16_spill] sm:$0xff] %v7142_v50  ;;  %v1443_v35 = vmul.f32 %v7139_v2, %v1418_v42  ;;  %v7194_v62 = vrot.slane %v5991_v28, %v6903_v36 }
 0x1ff   :  { %v7144_v3 = vpack.c.bf16 %v1348_v63, %v1344_v23  ;;  %v7146_v4 = vpack.c.bf16 %v1351_v0, %v1347_v32  ;;  %v1404_v5 = vpop.permute.xlu0 %1403  ;;  %v1468_v6 = vpop.permute.xlu1 %1467  ;;  %9489 = vst [vmem:[#allocation18_spill] sm:$0xff] %v7183_v58  ;;  %v1445_v23 = vmul.f32 %v7142_v50, %v1414_v51  ;;  %v1446_v32 = vmul.f32 %v7151_v8, %v1420_v55 }
 0x200   :  { %v1417_v12 = vsel %vm1413_vm5, %v1404_v5, %v7011_v13  ;;  %v1419_v24 = vsel %vm1413_vm5, %v7013_v29, %v1404_v5  ;;  %9490 = vst [vmem:[#allocation19_spill] sm:$0xff] %v7194_v62 }
 0x201   :  { %v1448_v39 = vmul.f32 %v7119_v61, %v1417_v12  ;;  %1555 = vmatpush1.bf16.msra.mxu0 %v7144_v3  ;;  %1597 = vmatprep.subr.bf16.mxu1 %v7146_v4  ;;  %v1447_v43 = vmul.f32 %v7139_v2, %v1419_v24  ;;  %v7515_v61 = vld [vmem:[%s9374_s5 + $0x4] ss:$8 sm:$0xf] }
 0x202   :  { %1556 = vmatprep.subr.bf16.mxu0 %v6964_v17  ;;  %1598 = vmatpush1.bf16.msra.mxu1 %v7148_v7 }
 0x203   :  { %v7180_v56 = vpack.c.bf16 %v1448_v39, %v1444_v38  ;;  %v1412_v22 = vpop.permute.xlu0 %1411  ;;  %1599 = vmatprep.subr.bf16.mxu1 %v6966_v19  ;;  %v1460_v25 = vpop.permute.xlu1 %1459  ;;  %v7220_v38 = vrot.slane %v5991_v28, %v6906_v37  ;;  %v7223_v39 = vrot.slane %v5991_v28, %v6923_v46 }
 0x204   :  { %v1415_v26 = vsel %vm1413_vm5, %v7011_v13, %v1412_v22  ;;  %v1421_v14 = vsel %vm1413_vm5, %v1412_v22, %v7013_v29  ;;  %v1478_v13 = vsel %vm1475_vm6, %v1464_v59, %v1468_v6  ;;  %v1480_v1 = vsel %vm1475_vm6, %v1460_v25, %v1464_v59 }
 0x205   :  { %v1449_v63 = vmul.f32 %v7142_v50, %v1415_v26  ;;  %v1450_v0 = vmul.f32 %v7151_v8, %v1421_v14  ;;  %1557 = vmatpush1.bf16.msra.mxu0 %v6960_v15  ;;  %v7207_v29 = vpack.c.bf16 %v1447_v43, %v1443_v35  ;;  %9491 = vst [vmem:[#allocation20_spill] sm:$0xff] %v7220_v38  ;;  %9492 = vst [vmem:[#allocation21_spill] sm:$0xff] %v7223_v39 }
 0x206   :  { %1558 = vmatprep.subr.bf16.mxu0 %v7180_v56  ;;  %1600 = vmatpush1.bf16.msra.mxu1 %v6962_v16  ;;  %v1506_v51 = vmul.f32 %v7183_v58, %v1478_v13  ;;  %v1505_v55 = vmul.f32 %v7194_v62, %v1480_v1  ;;  %v6349_v1 = vld [vmem:[%s9373_s8] sm:$0xff]  }
 0x207   :  { %v7209_v27 = vpack.c.bf16 %v1449_v63, %v1445_v23  ;;  %v7211_v5 = vpack.c.bf16 %v1450_v0, %v1446_v32  ;;  %v1466_v12 = vpop.permute.xlu0 %1465  ;;  %v1472_v24 = vpop.permute.xlu1 %1471 }
 0x208   :  { %v1479_v42 = vsel %vm1475_vm6, %v1466_v12, %v7015_v31  ;;  %v1481_v59 = vsel %vm1475_vm6, %v7020_v34, %v1466_v12  ;;  %v1476_v35 = vsel %vm1475_vm6, %v1468_v6, %v1472_v24  ;;  %v1482_v26 = vsel %vm1475_vm6, %v1472_v24, %v1460_v25  ;;  %v6350_v12 = vld [vmem:[%s9373_s8 + $0x8] sm:$0xff]   ;;  %v6351_v24 = vld [vmem:[%s9373_s8 + $0x10] sm:$0xff]  }
 0x209   :  { %v1509_v43 = vmul.f32 %v7194_v62, %v1481_v59  ;;  %v1510_v22 = vmul.f32 %v7183_v58, %v1479_v42  ;;  %1559 = vmatpush1.bf16.msra.mxu0 %v7207_v29  ;;  %1601 = vmatprep.subr.bf16.mxu1 %v7211_v5  ;;  %v1507_v63 = vmul.f32 %v7220_v38, %v1476_v35  ;;  %v6352_v42 = vld [vmem:[%s9373_s8 + $0x18] sm:$0xff]  }
 0x20a   :  { %1602 = vmatpush1.bf16.msra.mxu1 %v7209_v27  ;;  %v1508_v25 = vmul.f32 %v7223_v39, %v1482_v26 }
 0x20b   :  { %v7235_v28 = vpack.c.bf16 %v1509_v43, %v1505_v55  ;;  %v7237_v14 = vpack.c.bf16 %v1510_v22, %v1506_v51  ;;  %v1474_v23 = vpop.permute.xlu0 %1473 }
 0x20c   :  { %v1477_v32 = vsel %vm1475_vm6, %v7015_v31, %v1474_v23  ;;  %v1483_v6 = vsel %vm1475_vm6, %v1474_v23, %v7020_v34 }
 0x20d   :  { %v1511_v0 = vmul.f32 %v7220_v38, %v1477_v32  ;;  %v1512_v13 = vmul.f32 %v7223_v39, %v1483_v6  ;;  %1560 = vmatprep.subr.bf16.mxu0 %v7237_v14 }
 0x20e   :  { %1561 = vmatpush1.bf16.msra.mxu0 %v7235_v28 }
 0x20f   :  { %v7255_v31 = vpack.c.bf16 %v1511_v0, %v1507_v63  ;;  %v7257_v34 = vpack.c.bf16 %v1512_v13, %v1508_v25  ;;  %1711 = vmatprep.subr.bf16.mxu0 %v7078_v11 }
 0x211   :  { %5997 = vmatmul.mubr.msk.bf16.vlgmr.msra.gmra.mrb[8].mxu0 %vm1548_vm7, %v6349_v1  ;;  %1603 = vmatprep.subr.bf16.mxu1 %v7257_v34 }
 0x212   :  { %1604 = vmatpush1.bf16.msra.mxu1 %v7255_v31  ;;  %1712 = vmatpush1.bf16.msra.mxu0 %v7076_v10 }
 0x213   :  { %1713 = vmatprep.subr.bf16.mxu0 %v7115_v49  ;;  %1754 = vmatprep.subr.bf16.mxu1 %v7074_v9 }
 0x214   :  { %1743 = vmatprep.mubr.bf16.mxu0 %v9382_v18 }
 0x215   :  { %5998 = vmatmul.mubr.msk.bf16.vlgmr.msra.gmra.mrb[8].mxu1 %vm1548_vm7, %v6349_v1 }
 0x216   :  { %1714 = vmatpush1.bf16.msra.mxu0 %v7144_v3  ;;  %1755 = vmatpush1.bf16.msra.mxu1 %v7090_v30 }
 0x217   :  { %1715 = vmatprep.subr.bf16.mxu0 %v6964_v17  ;;  %1756 = vmatprep.subr.bf16.mxu1 %v7146_v4 }
 0x218   :  { %1786 = vmatprep.mubr.bf16.mxu1 %v9382_v18 }
 0x21a   :  { %1716 = vmatpush1.bf16.msra.mxu0 %v6960_v15  ;;  %1757 = vmatpush1.bf16.msra.mxu1 %v7148_v7 }
 0x21b   :  { %1717 = vmatprep.subr.bf16.mxu0 %v7180_v56  ;;  %1758 = vmatprep.subr.bf16.mxu1 %v6966_v19 }
 0x21e   :  { %1718 = vmatpush1.bf16.msra.mxu0 %v7207_v29  ;;  %1759 = vmatpush1.bf16.msra.mxu1 %v6962_v16 }
 0x21f   :  { %1719 = vmatprep.subr.bf16.mxu0 %v7237_v14  ;;  %1760 = vmatprep.subr.bf16.mxu1 %v7211_v5 }
 0x222   :  { %1720 = vmatpush1.bf16.msra.mxu0 %v7235_v28  ;;  %1761 = vmatpush1.bf16.msra.mxu1 %v7209_v27 }
 0x223   :  { %1762 = vmatprep.subr.bf16.mxu1 %v7257_v34  ;;  %1870 = vmatprep.subr.bf16.mxu0 %v7078_v11 }
 0x225   :  { %6002 = vmatmul.mubr.msk.bf16.vlgmr.msra.gmra.mrb[12].mxu0 %vm1548_vm7, %v6350_v12 }
 0x226   :  { %1763 = vmatpush1.bf16.msra.mxu1 %v7255_v31  ;;  %1871 = vmatpush1.bf16.msra.mxu0 %v7076_v10 }
 0x227   :  { %1872 = vmatprep.subr.bf16.mxu0 %v7115_v49  ;;  %1913 = vmatprep.subr.bf16.mxu1 %v7074_v9 }
 0x228   :  { %1902 = vmatprep.mubr.bf16.mxu0 %v9382_v18 }
 0x229   :  { %6003 = vmatmul.mubr.msk.bf16.vlgmr.msra.gmra.mrb[12].mxu1 %vm1548_vm7, %v6350_v12 }
 0x22a   :  { %1873 = vmatpush1.bf16.msra.mxu0 %v7144_v3  ;;  %1914 = vmatpush1.bf16.msra.mxu1 %v7090_v30 }
 0x22b   :  { %1874 = vmatprep.subr.bf16.mxu0 %v6964_v17  ;;  %1915 = vmatprep.subr.bf16.mxu1 %v7146_v4 }
 0x22c   :  { %1945 = vmatprep.mubr.bf16.mxu1 %v9382_v18 }
 0x22e   :  { %1875 = vmatpush1.bf16.msra.mxu0 %v6960_v15  ;;  %1916 = vmatpush1.bf16.msra.mxu1 %v7148_v7 }
 0x22f   :  { %1876 = vmatprep.subr.bf16.mxu0 %v7180_v56  ;;  %1917 = vmatprep.subr.bf16.mxu1 %v6966_v19 }
 0x232   :  { %1877 = vmatpush1.bf16.msra.mxu0 %v7207_v29  ;;  %1918 = vmatpush1.bf16.msra.mxu1 %v6962_v16 }
 0x233   :  { %1878 = vmatprep.subr.bf16.mxu0 %v7237_v14  ;;  %1919 = vmatprep.subr.bf16.mxu1 %v7211_v5 }
 0x236   :  { %1879 = vmatpush1.bf16.msra.mxu0 %v7235_v28  ;;  %1920 = vmatpush1.bf16.msra.mxu1 %v7209_v27 }
 0x237   :  { %1921 = vmatprep.subr.bf16.mxu1 %v7257_v34  ;;  %2004 = vmatprep.subr.bf16.mxu0 %v7078_v11 }
 0x239   :  { %6007 = vmatmul.mubr.msk.bf16.vlgmr.msra.gmra.mrb[16].mxu0 %vm1548_vm7, %v6351_v24 }
 0x23a   :  { %1922 = vmatpush1.bf16.msra.mxu1 %v7255_v31  ;;  %2005 = vmatpush1.bf16.msra.mxu0 %v7076_v10 }
 0x23b   :  { %2006 = vmatprep.subr.bf16.mxu0 %v7115_v49  ;;  %2047 = vmatprep.subr.bf16.mxu1 %v7074_v9 }
 0x23c   :  { %2036 = vmatprep.mubr.bf16.mxu0 %v9382_v18 }
 0x23d   :  { %6008 = vmatmul.mubr.msk.bf16.vlgmr.msra.gmra.mrb[16].mxu1 %vm1548_vm7, %v6351_v24 }
 0x23e   :  { %2007 = vmatpush1.bf16.msra.mxu0 %v7144_v3  ;;  %2048 = vmatpush1.bf16.msra.mxu1 %v7090_v30 }
 0x23f   :  { %2008 = vmatprep.subr.bf16.mxu0 %v6964_v17  ;;  %2049 = vmatprep.subr.bf16.mxu1 %v7146_v4 }
 0x240   :  { %2079 = vmatprep.mubr.bf16.mxu1 %v9382_v18 }
 0x242   :  { %2009 = vmatpush1.bf16.msra.mxu0 %v6960_v15  ;;  %2050 = vmatpush1.bf16.msra.mxu1 %v7148_v7 }
 0x243   :  { %2010 = vmatprep.subr.bf16.mxu0 %v7180_v56  ;;  %2051 = vmatprep.subr.bf16.mxu1 %v6966_v19 }
 0x246   :  { %2011 = vmatpush1.bf16.msra.mxu0 %v7207_v29  ;;  %2052 = vmatpush1.bf16.msra.mxu1 %v6962_v16 }
 0x247   :  { %2012 = vmatprep.subr.bf16.mxu0 %v7237_v14  ;;  %2053 = vmatprep.subr.bf16.mxu1 %v7211_v5 }
 0x24a   :  { %2013 = vmatpush1.bf16.msra.mxu0 %v7235_v28  ;;  %2054 = vmatpush1.bf16.msra.mxu1 %v7209_v27 }
 0x24b   :  { %2055 = vmatprep.subr.bf16.mxu1 %v7257_v34  ;;  %2163 = vmatprep.subr.bf16.mxu0 %v7078_v11 }
 0x24d   :  { %6012 = vmatmul.mubr.msk.bf16.vlgmr.msra.gmra.mrb[20].mxu0 %vm1548_vm7, %v6352_v42 }
 0x24e   :  { %2056 = vmatpush1.bf16.msra.mxu1 %v7255_v31  ;;  %2164 = vmatpush1.bf16.msra.mxu0 %v7076_v10 }
 0x24f   :  { %2165 = vmatprep.subr.bf16.mxu0 %v7115_v49  ;;  %2206 = vmatprep.subr.bf16.mxu1 %v7074_v9 }
 0x250   :  { %2195 = vmatprep.mubr.bf16.mxu0 %v9382_v18 }
 0x251   :  { %6013 = vmatmul.mubr.msk.bf16.vlgmr.msra.gmra.mrb[20].mxu1 %vm1548_vm7, %v6352_v42 }
 0x252   :  { %2166 = vmatpush1.bf16.msra.mxu0 %v7144_v3  ;;  %2207 = vmatpush1.bf16.msra.mxu1 %v7090_v30 }
 0x253   :  { %2167 = vmatprep.subr.bf16.mxu0 %v6964_v17  ;;  %2208 = vmatprep.subr.bf16.mxu1 %v7146_v4  ;;  %v6353_v17 = vld [vmem:[%s9373_s8 + $0x20] sm:$0xff]  }
 0x254   :  { %2238 = vmatprep.mubr.bf16.mxu1 %v9382_v18 }
 0x256   :  { %2168 = vmatpush1.bf16.msra.mxu0 %v6960_v15  ;;  %2209 = vmatpush1.bf16.msra.mxu1 %v7148_v7 }
 0x257   :  { %2169 = vmatprep.subr.bf16.mxu0 %v7180_v56  ;;  %2210 = vmatprep.subr.bf16.mxu1 %v6966_v19 }
 0x25a   :  { %2170 = vmatpush1.bf16.msra.mxu0 %v7207_v29  ;;  %2211 = vmatpush1.bf16.msra.mxu1 %v6962_v16 }
 0x25b   :  { %2171 = vmatprep.subr.bf16.mxu0 %v7237_v14  ;;  %2212 = vmatprep.subr.bf16.mxu1 %v7211_v5 }
 0x25e   :  { %2172 = vmatpush1.bf16.msra.mxu0 %v7235_v28  ;;  %2213 = vmatpush1.bf16.msra.mxu1 %v7209_v27 }
 0x25f   :  { %2214 = vmatprep.subr.bf16.mxu1 %v7257_v34 }
 0x261   :  { %6017 = vmatmul.mubr.msk.bf16.vlgmr.msra.gmra.mrb[24].mxu0 %vm1548_vm7, %v6353_v17 }
 0x262   :  { %2215 = vmatpush1.bf16.msra.mxu1 %v7255_v31  ;;  %2471 = vmatprep.mubr.bf16.mxu0 %v9382_v18 }
 0x265   :  { %6018 = vmatmul.mubr.msk.bf16.vlgmr.msra.gmra.mrb[24].mxu1 %vm1548_vm7, %v6353_v17 }
 0x266   :  { %2514 = vmatprep.mubr.bf16.mxu1 %v9382_v18 }
 0x2e4   :  { %v1586_v15 = vpop.f32.mrb[8].mxu0 }
 0x2e5   :  { %1638 = vrot.lane.b32.xlu1 %v1586_v15, %s6396_s16  ;;  %v1588_v16 = vpop.f32.mrb[9].mxu0 }
 0x2e6   :  { %v1590_v19 = vpop.f32.mrb[10].mxu0 }
 0x2e7   :  { %1640 = vrot.lane.b32.xlu0 %v1590_v19, %s6396_s16  ;;  %v1592_v9 = vpop.f32.mrb[11].mxu0 }
 0x2e8   :  { %v1629_v10 = vpop.f32.mrb[8].mxu1 }
 0x2e9   :  { %v1631_v11 = vpop.f32.mrb[9].mxu1  ;;  %1646 = vrot.lane.b32.xlu1 %v1629_v10, %s6396_s16 }
 0x2ea   :  { %v1633_v30 = vpop.f32.mrb[10].mxu1 }
 0x2eb   :  { %v1635_v49 = vpop.f32.mrb[11].mxu1  ;;  %1648 = vrot.lane.b32.xlu0 %v1633_v30, %s6396_s16 }
 0x2ed   :  { %1642 = vrot.lane.b32.xlu1 %v1588_v16, %s6396_s16 }
 0x2ef   :  { %1644 = vrot.lane.b32.xlu0 %v1592_v9, %s6396_s16 }
 0x2f1   :  { %1650 = vrot.lane.b32.xlu1 %v1631_v11, %s6396_s16 }
 0x2f3   :  { %1652 = vrot.lane.b32.xlu0 %v1635_v49, %s6396_s16 }
 0x2f8   :  { %v1745_v3 = vpop.f32.mrb[12].mxu0 }
 0x2f9   :  { %1797 = vrot.lane.b32.xlu1 %v1745_v3, %s6397_s17  ;;  %v1747_v4 = vpop.f32.mrb[13].mxu0 }
 0x2fa   :  { %v1749_v7 = vpop.f32.mrb[14].mxu0 }
 0x2fb   :  { %1799 = vrot.lane.b32.xlu0 %v1749_v7, %s6397_s17  ;;  %v1751_v56 = vpop.f32.mrb[15].mxu0 }
 0x2fc   :  { %v1788_v29 = vpop.f32.mrb[12].mxu1 }
 0x2fd   :  { %v1790_v27 = vpop.f32.mrb[13].mxu1  ;;  %1805 = vrot.lane.b32.xlu1 %v1788_v29, %s6397_s17 }
 0x2fe   :  { %v1792_v5 = vpop.f32.mrb[14].mxu1 }
 0x2ff   :  { %v1794_v59 = vpop.f32.mrb[15].mxu1  ;;  %1807 = vrot.lane.b32.xlu0 %v1792_v5, %s6397_s17 }
 0x301   :  { %1801 = vrot.lane.b32.xlu1 %v1747_v4, %s6397_s17 }
 0x303   :  { %1803 = vrot.lane.b32.xlu0 %v1751_v56, %s6397_s17 }
 0x305   :  { %1809 = vrot.lane.b32.xlu1 %v1790_v27, %s6397_s17 }
 0x307   :  { %1811 = vrot.lane.b32.xlu0 %v1794_v59, %s6397_s17 }
 0x30c   :  { %v7389_v51 = vpop.f32.mrb[16].mxu0 }
 0x30d   :  { %v7391_v55 = vpop.f32.mrb[17].mxu0 }
 0x30e   :  { %v7393_v43 = vpop.f32.mrb[18].mxu0 }
 0x30f   :  { %v7395_v22 = vpop.f32.mrb[19].mxu0 }
 0x310   :  { %v7397_v35 = vpop.f32.mrb[16].mxu1 }
 0x311   :  { %v7399_v26 = vpop.f32.mrb[17].mxu1 }
 0x312   :  { %v7401_v28 = vpop.f32.mrb[18].mxu1 }
 0x313   :  { %v7403_v14 = vpop.f32.mrb[19].mxu1 }
 0x320   :  { %v2038_v23 = vpop.f32.mrb[20].mxu0 }
 0x321   :  { %2090 = vrot.lane.b32.xlu1 %v2038_v23, %s6398_s18  ;;  %v2040_v32 = vpop.f32.mrb[21].mxu0 }
 0x322   :  { %v2042_v6 = vpop.f32.mrb[22].mxu0 }
 0x323   :  { %2092 = vrot.lane.b32.xlu0 %v2042_v6, %s6398_s18  ;;  %v2044_v63 = vpop.f32.mrb[23].mxu0 }
 0x324   :  { %v2081_v25 = vpop.f32.mrb[20].mxu1 }
 0x325   :  { %v2083_v0 = vpop.f32.mrb[21].mxu1  ;;  %2098 = vrot.lane.b32.xlu1 %v2081_v25, %s6398_s18 }
 0x326   :  { %v2085_v13 = vpop.f32.mrb[22].mxu1 }
 0x327   :  { %v2087_v1 = vpop.f32.mrb[23].mxu1  ;;  %2100 = vrot.lane.b32.xlu0 %v2085_v13, %s6398_s18 }
 0x329   :  { %2094 = vrot.lane.b32.xlu1 %v2040_v32, %s6398_s18 }
 0x32b   :  { %2096 = vrot.lane.b32.xlu0 %v2044_v63, %s6398_s18  ;;  %v5993_v63 = vld [vmem:[%s9374_s5 + $0x2] ss:$8 sm:$0xf] }
 0x32d   :  { %2102 = vrot.lane.b32.xlu1 %v2083_v0, %s6398_s18  ;;  %v1225_v0 = vld [vmem:[%s9374_s5] ss:$8 sm:$0xf] }
 0x32e   :  { %v7476_v18 = vrot.slane %v1225_v0, %v6923_v46 }
 0x32f   :  { %2104 = vrot.lane.b32.xlu0 %v2087_v1, %s6398_s18  ;;  %v7448_v1 = vrot.slane %v5993_v63, %v6903_v36 }
 0x330   :  { %9497 = vst [vmem:[#allocation26_spill] sm:$0xff] %v7476_v18 }
 0x331   :  { %9493 = vst [vmem:[#allocation22_spill] sm:$0xff] %v7448_v1  ;;  %v7483_v38 = vmul.f32 %v7448_v1, %v7389_v51  ;;  %v7504_v51 = vmul.f32 %v7448_v1, %v7393_v43 }
 0x334   :  { %v2197_v31 = vpop.f32.mrb[24].mxu0 }
 0x335   :  { %2249 = vrot.lane.b32.xlu1 %v2197_v31, %s6399_s19  ;;  %v2199_v34 = vpop.f32.mrb[25].mxu0  ;;  %v5992_v31 = vld [vmem:[%s9374_s5 + $0x1] ss:$8 sm:$0xf] }
 0x336   :  { %v2201_v12 = vpop.f32.mrb[26].mxu0  ;;  %v7479_v39 = vrot.slane %v5992_v31, %v6920_v45  ;;  %v7489_v58 = vrot.slane %v5992_v31, %v6903_v36  ;;  %v7492_v62 = vrot.slane %v5992_v31, %v6923_v46 }
 0x337   :  { %2251 = vrot.lane.b32.xlu0 %v2201_v12, %s6399_s19  ;;  %v2203_v24 = vpop.f32.mrb[27].mxu0 }
 0x338   :  { %v2240_v42 = vpop.f32.mrb[24].mxu1 }
 0x339   :  { %v2242_v17 = vpop.f32.mrb[25].mxu1  ;;  %2257 = vrot.lane.b32.xlu1 %v2240_v42, %s6399_s19  ;;  %v7464_v42 = vrot.slane %v5993_v63, %v6923_v46 }
 0x33a   :  { %v2244_v15 = vpop.f32.mrb[26].mxu1 }
 0x33b   :  { %v2246_v16 = vpop.f32.mrb[27].mxu1  ;;  %2259 = vrot.lane.b32.xlu0 %v2244_v15, %s6399_s19  ;;  %9496 = vst [vmem:[#allocation25_spill] sm:$0xff] %v7464_v42  ;;  %v7470_v15 = vrot.slane %v1225_v0, %v6906_v37  ;;  %v7527_v1 = vmul.f32 %v7464_v42, %v7399_v26  ;;  %v7535_v21 = vmul.f32 %v7464_v42, %v7403_v14 }
 0x33c   :  { %v7553_v14 = vrot.slane %v7515_v61, %v6903_v36 }
 0x33d   :  { %2253 = vrot.lane.b32.xlu1 %v2199_v34, %s6399_s19  ;;  %v7455_v34 = vrot.slane %v5993_v63, %v6920_v45 }
 0x33f   :  { %2255 = vrot.lane.b32.xlu0 %v2203_v24, %s6399_s19  ;;  %9494 = vst [vmem:[#allocation23_spill] sm:$0xff] %v7455_v34  ;;  %v7461_v24 = vrot.slane %v5993_v63, %v6906_v37  ;;  %v7486_v63 = vrot.slane %v5992_v31, %v6906_v37  ;;  %v7500_v8 = vmul.f32 %v7455_v34, %v7391_v55 }
 0x340   :  { %v7519_v55 = vmul.f32 %v7455_v34, %v7395_v22 }
 0x341   :  { %2261 = vrot.lane.b32.xlu1 %v2242_v17, %s6399_s19  ;;  %9495 = vst [vmem:[#allocation24_spill] sm:$0xff] %v7461_v24  ;;  %v7467_v17 = vrot.slane %v1225_v0, %v6920_v45  ;;  %9498 = vst [vmem:[#allocation27_spill] sm:$0xff] %v7486_v63  ;;  %v7523_v43 = vmul.f32 %v7461_v24, %v7397_v35 }
 0x343   :  { %2263 = vrot.lane.b32.xlu0 %v2246_v16, %s6399_s19  ;;  %v7473_v16 = vrot.slane %v1225_v0, %v6903_v36  ;;  %v5994_v0 = vld [vmem:[%s9374_s5 + $0x3] ss:$8 sm:$0xf] }
 0x344   :  { %v7538_v20 = vrot.slane %v5994_v0, %v6903_v36  ;;  %v7541_v22 = vrot.slane %v5994_v0, %v6920_v45  ;;  %v7544_v34 = vrot.slane %v5994_v0, %v6906_v37 }
 0x357   :  { %v7421_v19 = vpop.permute.xlu1 %1638 }
 0x359   :  { %v7423_v9 = vpop.permute.xlu0 %1640 }
 0x35b   :  { %v7425_v10 = vpop.permute.xlu1 %1646 }
 0x35d   :  { %v7427_v11 = vpop.permute.xlu0 %1648 }
 0x35f   :  { %v1643_v30 = vpop.permute.xlu1 %1642 }
 0x360   :  { %v1657_v50 = vsel %vm1654_vm8, %v1643_v30, %v7425_v10  ;;  %v1659_v31 = vsel %vm1654_vm8, %v7421_v19, %v1643_v30  ;;  %v7531_v30 = vmul.f32 %v7461_v24, %v7401_v28  ;;  %v7549_v28 = vrot.slane %v5994_v0, %v6923_v46 }
 0x361   :  { %v1645_v49 = vpop.permute.xlu0 %1644  ;;  %v1685_v26 = vmul.f32 %v7467_v17, %v1659_v31  ;;  %v1686_v48 = vmul.f32 %v7470_v15, %v1657_v50 }
 0x362   :  { %v1658_v42 = vsel %vm1654_vm8, %v1645_v49, %v7427_v11  ;;  %v1660_v24 = vsel %vm1654_vm8, %v7423_v9, %v1645_v49 }
 0x363   :  { %v7429_v3 = vpop.permute.xlu1 %1650 }
 0x364   :  { %v1655_v36 = vsel %vm1654_vm8, %v7425_v10, %v7429_v3 }
 0x365   :  { %v7431_v4 = vpop.permute.xlu0 %1652 }
 0x36b   :  { %v1798_v7 = vpop.permute.xlu1 %1797 }
 0x36d   :  { %v7433_v56 = vpop.permute.xlu0 %1799 }
 0x36f   :  { %v1806_v29 = vpop.permute.xlu1 %1805 }
 0x371   :  { %v1808_v27 = vpop.permute.xlu0 %1807 }
 0x373   :  { %v1802_v5 = vpop.permute.xlu1 %1801 }
 0x374   :  { %v1816_v31 = vsel %vm1813_vm9, %v1802_v5, %v1806_v29  ;;  %v1818_v50 = vsel %vm1813_vm9, %v1798_v7, %v1802_v5  ;;  %v1661_v5 = vsel %vm1654_vm8, %v7429_v3, %v7421_v19  ;;  %v1662_v19 = vsel %vm1654_vm8, %v7431_v4, %v7423_v9 }
 0x375   :  { %v1804_v59 = vpop.permute.xlu0 %1803  ;;  %v1844_v3 = vmul.f32 %v7479_v39, %v1818_v50  ;;  %v1687_v50 = vmul.f32 %v7476_v18, %v1655_v36 }
 0x376   :  { %v1817_v0 = vsel %vm1813_vm9, %v1804_v59, %v1808_v27  ;;  %v1819_v60 = vsel %vm1813_vm9, %v7433_v56, %v1804_v59 }
 0x377   :  { %v1810_v23 = vpop.permute.xlu1 %1809  ;;  %v1849_v59 = vmul.f32 %v7486_v63, %v1817_v0 }
 0x378   :  { %v1820_v49 = vsel %vm1813_vm9, %v1810_v23, %v1798_v7  ;;  %v1814_v47 = vsel %vm1813_vm9, %v1806_v29, %v1810_v23  ;;  %v1656_v7 = vsel %vm1654_vm8, %v7427_v11, %v7431_v4  ;;  %v1845_v29 = vmul.f32 %v7486_v63, %v1816_v31 }
 0x379   :  { %v1812_v32 = vpop.permute.xlu0 %1811  ;;  %v1843_v23 = vmul.f32 %v7489_v58, %v1820_v49  ;;  %v1846_v40 = vmul.f32 %v7492_v62, %v1814_v47  ;;  %v1684_v31 = vmul.f32 %v7473_v16, %v1661_v5  ;;  %v1852_v63 = vadd.f32 %v1844_v3, %v1685_v26 }
 0x37a   :  { %v1815_v10 = vsel %vm1813_vm9, %v1808_v27, %v1812_v32  ;;  %v1821_v41 = vsel %vm1813_vm9, %v1812_v32, %v7433_v56  ;;  %v1689_v27 = vmul.f32 %v7467_v17, %v1660_v24  ;;  %v1848_v56 = vmul.f32 %v7479_v39, %v1819_v60 }
 0x37b   :  { %v1690_v32 = vmul.f32 %v7470_v15, %v1658_v42  ;;  %v1847_v9 = vmul.f32 %v7489_v58, %v1821_v41  ;;  %v1850_v4 = vmul.f32 %v7492_v62, %v1815_v10  ;;  %v1688_v24 = vmul.f32 %v7473_v16, %v1662_v19 }
 0x37c   :  { %v1691_v60 = vmul.f32 %v7476_v18, %v1656_v7  ;;  %v1853_v49 = vadd.f32 %v1845_v29, %v1686_v48  ;;  %v1856_v47 = vadd.f32 %v1848_v56, %v1689_v27  ;;  %v1851_v5 = vadd.f32 %v1843_v23, %v1684_v31 }
 0x37d   :  { %v1857_v10 = vadd.f32 %v1849_v59, %v1690_v32  ;;  %v1854_v7 = vadd.f32 %v1846_v40, %v1687_v50  ;;  %v1855_v18 = vadd.f32 %v1847_v9, %v1688_v24  ;;  %v7626_v27 = vrot.slane %v7515_v61, %v6920_v45 }
 0x37e   :  { %v1858_v26 = vadd.f32 %v1850_v4, %v1691_v60  ;;  %v7630_v56 = vrot.slane %v7515_v61, %v6906_v37  ;;  %v1986_v40 = vadd.f32 %v7500_v8, %v1852_v63  ;;  %v1987_v23 = vadd.f32 %v7523_v43, %v1853_v49 }
 0x37f   :  { %v1985_v32 = vadd.f32 %v7483_v38, %v1851_v5  ;;  %v1990_v9 = vadd.f32 %v7519_v55, %v1856_v47  ;;  %v1989_v8 = vadd.f32 %v7504_v51, %v1855_v18  ;;  %v1991_v63 = vadd.f32 %v7531_v30, %v1857_v10 }
 0x380   :  { %v1988_v43 = vadd.f32 %v7527_v1, %v1854_v7 }
 0x393   :  { %v7435_v6 = vpop.permute.xlu1 %2090 }
 0x395   :  { %v7440_v25 = vpop.permute.xlu0 %2092 }
 0x397   :  { %v7445_v13 = vpop.permute.xlu1 %2098 }
 0x399   :  { %v7457_v12 = vpop.permute.xlu0 %2100 }
 0x39b   :  { %v2095_v2 = vpop.permute.xlu1 %2094 }
 0x39c   :  { %v2109_v42 = vsel %vm2106_vm10, %v2095_v2, %v7445_v13  ;;  %v2111_v41 = vsel %vm2106_vm10, %v7435_v6, %v2095_v2 }
 0x39d   :  { %v2097_v35 = vpop.permute.xlu0 %2096  ;;  %v2136_v3 = vmul.f32 %v7538_v20, %v2111_v41  ;;  %v2137_v29 = vmul.f32 %v7541_v22, %v2109_v42 }
 0x39e   :  { %v2112_v36 = vsel %vm2106_vm10, %v7440_v25, %v2097_v35  ;;  %v2110_v48 = vsel %vm2106_vm10, %v2097_v35, %v7457_v12  ;;  %v7637_v35 = vrot.slane %v7515_v61, %v6923_v46  ;;  %v1992_v46 = vadd.f32 %v7535_v21, %v1858_v26 }
 0x39f   :  { %v2103_v52 = vpop.permute.xlu1 %2102  ;;  %v2140_v59 = vmul.f32 %v7538_v20, %v2112_v36  ;;  %v2141_v45 = vmul.f32 %v7541_v22, %v2110_v48  ;;  %v2144_v61 = vadd.f32 %v2136_v3, %v1985_v32  ;;  %v2145_v31 = vadd.f32 %v2137_v29, %v1986_v40 }
 0x3a0   :  { %v2107_v37 = vsel %vm2106_vm10, %v7445_v13, %v2103_v52  ;;  %v2113_v38 = vsel %vm2106_vm10, %v2103_v52, %v7435_v6 }
 0x3a1   :  { %v2105_v11 = vpop.permute.xlu0 %2104  ;;  %v2148_v50 = vadd.f32 %v2140_v59, %v1989_v8  ;;  %v2138_v18 = vmul.f32 %v7544_v34, %v2107_v37  ;;  %v2149_v1 = vadd.f32 %v2141_v45, %v1990_v9  ;;  %v2139_v24 = vmul.f32 %v7549_v28, %v2113_v38 }
 0x3a2   :  { %v2108_v55 = vsel %vm2106_vm10, %v7457_v12, %v2105_v11  ;;  %v2114_v30 = vsel %vm2106_vm10, %v2105_v11, %v7440_v25 }
 0x3a3   :  { %v2142_v60 = vmul.f32 %v7544_v34, %v2108_v55  ;;  %v2146_v5 = vadd.f32 %v2138_v18, %v1987_v23  ;;  %v2143_v36 = vmul.f32 %v7549_v28, %v2114_v30  ;;  %v2147_v45 = vadd.f32 %v2139_v24, %v1988_v43  ;;  %v2364_v43 = vld [vmem:[%s9375_s9] sm:$0xff] }
 0x3a5   :  { %v2150_v32 = vadd.f32 %v2142_v60, %v1991_v63 }
 0x3a7   :  { %v2250_v0 = vpop.permute.xlu1 %2249 }
 0x3a9   :  { %v2252_v19 = vpop.permute.xlu0 %2251 }
 0x3ab   :  { %v2258_v2 = vpop.permute.xlu1 %2257 }
 0x3ad   :  { %v2260_v4 = vpop.permute.xlu0 %2259 }
 0x3af   :  { %v2254_v13 = vpop.permute.xlu1 %2253 }
 0x3b0   :  { %v2268_v51 = vsel %vm2265_vm11, %v2254_v13, %v2258_v2  ;;  %v2270_v21 = vsel %vm2265_vm11, %v2250_v0, %v2254_v13 }
 0x3b1   :  { %v2295_v52 = vmul.f32 %v7553_v14, %v2270_v21  ;;  %v2296_v6 = vmul.f32 %v7626_v27, %v2268_v51  ;;  %v2256_v12 = vpop.permute.xlu0 %2255 }
 0x3b2   :  { %v2269_v49 = vsel %vm2265_vm11, %v2256_v12, %v2260_v4  ;;  %v2271_v42 = vsel %vm2265_vm11, %v2252_v19, %v2256_v12 }
 0x3b3   :  { %v2303_v41 = vadd.f32 %v2295_v52, %v2144_v61  ;;  %v2304_v47 = vadd.f32 %v2296_v6, %v2145_v31  ;;  %v2299_v10 = vmul.f32 %v7553_v14, %v2271_v42  ;;  %v2300_v25 = vmul.f32 %v7626_v27, %v2269_v49  ;;  %v2262_v11 = vpop.permute.xlu1 %2261 }
 0x3b4   :  { %v2266_v7 = vsel %vm2265_vm11, %v2258_v2, %v2262_v11  ;;  %v2272_v26 = vsel %vm2265_vm11, %v2262_v11, %v2250_v0  ;;  %v2151_v61 = vadd.f32 %v2143_v36, %v1992_v46 }
 0x3b5   :  { %v2307_v48 = vadd.f32 %v2299_v10, %v2148_v50  ;;  %v2308_v3 = vadd.f32 %v2300_v25, %v2149_v1  ;;  %v2297_v29 = vmul.f32 %v7630_v56, %v2266_v7  ;;  %v2298_v40 = vmul.f32 %v7637_v35, %v2272_v26  ;;  %v2264_v59 = vpop.permute.xlu0 %2263 }
 0x3b6   :  { %v2267_v9 = vsel %vm2265_vm11, %v2260_v4, %v2264_v59  ;;  %v2273_v23 = vsel %vm2265_vm11, %v2264_v59, %v2252_v19  ;;  %v2311_v8 = vadd.f32 %v2304_v47, %v2303_v41  ;;  %v2365_v19 = vld [vmem:[%s9375_s9 + $0x8] sm:$0xff] }
 0x3b7   :  { %v2301_v2 = vmul.f32 %v7630_v56, %v2267_v9  ;;  %v2302_v37 = vmul.f32 %v7637_v35, %v2273_v23  ;;  %v2305_v0 = vadd.f32 %v2297_v29, %v2146_v5  ;;  %v2306_v31 = vadd.f32 %v2298_v40, %v2147_v45  ;;  %v2418_v23 = vld [vmem:[%s9377_s12] sm:$0xff]  ;;  %v2419_v45 = vld [vmem:[%s9377_s12 + $0x8] sm:$0xff] }
 0x3b8   :  { %v2316_v13 = vadd.f32 %v2308_v3, %v2307_v48 }
 0x3b9   :  { %v2312_v38 = vadd.f32 %v2311_v8, %v2305_v0  ;;  %v2309_v55 = vadd.f32 %v2301_v2, %v2150_v32  ;;  %v2310_v63 = vadd.f32 %v2302_v37, %v2151_v61 }
 0x3bb   :  { %v2313_v50 = vadd.f32 %v2312_v38, %v2306_v31  ;;  %v2317_v18 = vadd.f32 %v2316_v13, %v2309_v55 }
 0x3bd   :  { %2314 = vadd.xlane.f32.xlu1 %v2313_v50  ;;  %v2318_v4 = vadd.f32 %v2317_v18, %v2310_v63 }
 0x3bf   :  { %2319 = vadd.xlane.f32.xlu0 %v2318_v4 }
 0x3ce   :  { %2373 = vperm.xlu1 %6152, %v2365_v19  }
 0x3d5   :  { %2368 = vperm.xlu0 %6151, %v2364_v43  }
 0x44a   :  { %v2315_v46 = vpop.xlane.xlu1 %2314 }
 0x44b   :  { %v2322_v51 = vmul.f32 0.001953125, %v2315_v46 }
 0x44c   :  { %v2320_v21 = vpop.xlane.xlu0 %2319 }
 0x44d   :  { %v2323_v1 = vmul.f32 0.001953125, %v2320_v21  ;;  %v2324_v30 = vsub.f32 %v2303_v41, %v2322_v51  ;;  %v2325_v52 = vsub.f32 %v2304_v47, %v2322_v51  ;;  %v2326_v6 = vsub.f32 %v2305_v0, %v2322_v51 }
 0x44e   :  { %v2327_v12 = vsub.f32 %v2306_v31, %v2322_v51  ;;  %v2374_v37 = vpop.permute.xlu1 %2373 }
 0x44f   :  { %v2332_v24 = vmul.f32 %v2324_v30, %v2324_v30  ;;  %v2333_v60 = vmul.f32 %v2325_v52, %v2325_v52  ;;  %v2328_v49 = vsub.f32 %v2307_v48, %v2323_v1  ;;  %v2329_v42 = vsub.f32 %v2308_v3, %v2323_v1  ;;  %v2384_v48 = vld [vmem:[%s9376_s10] sm:$0xff]  ;;  %v2385_v3 = vld [vmem:[%s9376_s10 + $0x8] sm:$0xff] }
 0x450   :  { %v2330_v10 = vsub.f32 %v2309_v55, %v2323_v1  ;;  %v2334_v25 = vmul.f32 %v2326_v6, %v2326_v6  ;;  %v2331_v36 = vsub.f32 %v2310_v63, %v2323_v1  ;;  %v2335_v26 = vmul.f32 %v2327_v12, %v2327_v12 }
 0x451   :  { %v2340_v11 = vadd.f32 %v2333_v60, %v2332_v24  ;;  %v2336_v5 = vmul.f32 %v2328_v49, %v2328_v49  ;;  %v2337_v7 = vmul.f32 %v2329_v42, %v2329_v42 }
 0x452   :  { %v2338_v40 = vmul.f32 %v2330_v10, %v2330_v10  ;;  %v2339_v9 = vmul.f32 %v2331_v36, %v2331_v36 }
 0x453   :  { %v2341_v29 = vadd.f32 %v2340_v11, %v2334_v25  ;;  %v2345_v59 = vadd.f32 %v2337_v7, %v2336_v5 }
 0x454   :  { %v2369_v2 = vpop.permute.xlu0 %2368 }
 0x455   :  { %v2342_v32 = vadd.f32 %v2341_v29, %v2335_v26  ;;  %v2346_v41 = vadd.f32 %v2345_v59, %v2338_v40 }
 0x457   :  { %2343 = vadd.xlane.f32.xlu0 %v2342_v32  ;;  %v2347_v47 = vadd.f32 %v2346_v41, %v2339_v9 }
 0x459   :  { %2348 = vadd.xlane.f32.xlu1 %v2347_v47 }
 0x46a   :  { %2388 = vperm.xlu1 %6152, %v2384_v48  }
 0x46d   :  { %2393 = vperm.xlu0 %6151, %v2385_v3  }
 0x46e   :  { %2422 = vperm.xlu1 %6152, %v2418_v23  }
 0x471   :  { %2427 = vperm.xlu0 %6151, %v2419_v45  }
 0x4e4   :  { %v2344_v0 = vpop.xlane.xlu0 %2343 }
 0x4e5   :  { %v2350_v8 = vmul.f32 0.001953125, %v2344_v0 }
 0x4e6   :  { %v2349_v31 = vpop.xlane.xlu1 %2348 }
 0x4e7   :  { %v2352_v61 = vadd.f32 1e-05, %v2350_v8  ;;  %v2351_v38 = vmul.f32 0.001953125, %v2349_v31 }
 0x4e9   :  { %6373 = vrsqrt.f32 %v2352_v61  ;;  %v2353_v55 = vadd.f32 1e-05, %v2351_v38  ;;  %v9499_v61 = vmov 0  }
 0x4ea   :  { %v2389_v1 = vpop.permute.xlu1 %2388 }
 0x4eb   :  { %6375 = vrsqrt.f32 %v2353_v55 }
 0x4ee   :  { %v2423_v31 = vpop.permute.xlu1 %2422 }
 0x4f3   :  { %v6374_v13 = vpop.eup %6373 }
 0x4f4   :  { %v2356_v50 = vmul.f32 %v6374_v13, %v2324_v30  ;;  %v2358_v63 = vmul.f32 %v6374_v13, %v2326_v6  ;;  %v2357_v18 = vmul.f32 %v6374_v13, %v2325_v52  ;;  %v2359_v4 = vmul.f32 %v6374_v13, %v2327_v12  ;;  %v2394_v52 = vpop.permute.xlu0 %2393 }
 0x4f5   :  { %v6376_v19 = vpop.eup %6375 }
 0x4f6   :  { %v2376_v43 = vmul.f32 %v2369_v2, %v2356_v50  ;;  %v2378_v46 = vmul.f32 %v2369_v2, %v2358_v63  ;;  %v2377_v51 = vmul.f32 %v2369_v2, %v2357_v18  ;;  %v2379_v21 = vmul.f32 %v2369_v2, %v2359_v4 }
 0x4f7   :  { %v2360_v24 = vmul.f32 %v6376_v19, %v2328_v49  ;;  %v2362_v60 = vmul.f32 %v6376_v19, %v2330_v10  ;;  %v2361_v25 = vmul.f32 %v6376_v19, %v2329_v42  ;;  %v2363_v11 = vmul.f32 %v6376_v19, %v2331_v36 }
 0x4f8   :  { %v2396_v5 = vadd.f32 %v2389_v1, %v2376_v43  ;;  %v2398_v7 = vadd.f32 %v2389_v1, %v2378_v46  ;;  %v2397_v26 = vadd.f32 %v2389_v1, %v2377_v51  ;;  %v2399_v29 = vadd.f32 %v2389_v1, %v2379_v21  ;;  %v2428_v38 = vpop.permute.xlu0 %2427 }
 0x4f9   :  { %v2380_v40 = vmul.f32 %v2374_v37, %v2360_v24  ;;  %v2382_v59 = vmul.f32 %v2374_v37, %v2362_v60  ;;  %v2381_v30 = vmul.f32 %v2374_v37, %v2361_v25  ;;  %v2383_v6 = vmul.f32 %v2374_v37, %v2363_v11  ;;  %v6354_v37 = vld [vmem:[%s9378_s11] sm:$0xff]  }
 0x4fa   :  { %v2404_v47 = vmax.f32 %v2396_v5, 0.0  ;;  %v2406_v48 = vmax.f32 %v2398_v7, 0.0  ;;  %v2405_v3 = vmax.f32 %v2397_v26, 0.0  ;;  %v2407_v49 = vmax.f32 %v2399_v29, 0.0 }
 0x4fb   :  { %v2400_v12 = vadd.f32 %v2394_v52, %v2380_v40  ;;  %v2402_v32 = vadd.f32 %v2394_v52, %v2382_v59  ;;  %v2401_v9 = vadd.f32 %v2394_v52, %v2381_v30  ;;  %v2403_v41 = vadd.f32 %v2394_v52, %v2383_v6 }
 0x4fd   :  { %v2408_v10 = vmax.f32 %v2400_v12, 0.0  ;;  %v2410_v42 = vmax.f32 %v2402_v32, 0.0  ;;  %v2409_v36 = vmax.f32 %v2401_v9, 0.0  ;;  %v2411_v23 = vmax.f32 %v2403_v41, 0.0 }
 0x4ff   :  { %v2415_v45 = vpack.c.bf16 %v2409_v36, %v2405_v3  ;;  %v2417_v2 = vpack.c.bf16 %v2411_v23, %v2407_v49  ;;  %v2414_v0 = vpack.c.bf16 %v2408_v10, %v2404_v47  ;;  %v2416_v8 = vpack.c.bf16 %v2410_v42, %v2406_v48 }
 0x501   :  { %2439 = vmatprep.subr.bf16.mxu0 %v2415_v45  ;;  %2482 = vmatprep.subr.bf16.mxu1 %v2417_v2 }
 0x502   :  { %2440 = vmatpush1.bf16.msra.mxu0 %v2414_v0  ;;  %2483 = vmatpush1.bf16.msra.mxu1 %v2416_v8 }
 0x505   :  { %6020 = vmatmul.mubr.msk.bf16.vlgmr.msra.gmra.mrb[28].mxu0 %vm2435_vm12, %v6354_v37  ;;  %6021 = vmatmul.mubr.msk.bf16.vlgmr.msra.gmra.mrb[28].mxu1 %vm2435_vm12, %v6354_v37 }
 0x506   :  { %2764 = vmatprep.mubr.bf16.mxu0 %v9499_v61  ;;  %2807 = vmatprep.mubr.bf16.mxu1 %v9499_v61 }
 0x5d8   :  { %v2473_v55 = vpop.f32.mrb[28].mxu0  ;;  %v2516_v13 = vpop.f32.mrb[28].mxu1 }
 0x5d9   :  { %v2474_v50 = vadd.f32 %v2473_v55, %v2423_v31  ;;  %v2517_v63 = vadd.f32 %v2516_v13, %v2423_v31  ;;  %v2475_v18 = vpop.f32.mrb[29].mxu0  ;;  %v2518_v4 = vpop.f32.mrb[29].mxu1 }
 0x5da   :  { %v2476_v19 = vadd.f32 %v2475_v18, %v2423_v31  ;;  %v2519_v43 = vadd.f32 %v2518_v4, %v2423_v31  ;;  %v2477_v46 = vpop.f32.mrb[30].mxu0  ;;  %v2520_v51 = vpop.f32.mrb[30].mxu1  ;;  %v9500_v18 = vld [vmem:[#allocation6_spill] sm:$0xff] }
 0x5db   :  { %v2478_v21 = vadd.f32 %v2477_v46, %v2428_v38  ;;  %v2521_v1 = vadd.f32 %v2520_v51, %v2428_v38  ;;  %v2479_v24 = vpop.f32.mrb[31].mxu0  ;;  %v2522_v60 = vpop.f32.mrb[31].mxu1  ;;  %2525 = vrot.lane.b32.xlu1 %v2474_v50, %s6392_s1  ;;  %v2605_v5 = vmul.f32 %v2474_v50, %v6928_v53  ;;  %v2607_v7 = vmul.f32 %v2517_v63, %v6931_v54 }
 0x5dc   :  { %v2480_v25 = vadd.f32 %v2479_v24, %v2428_v38  ;;  %v2523_v11 = vadd.f32 %v2522_v60, %v2428_v38  ;;  %v2606_v40 = vmul.f32 %v2476_v19, %v6936_v44  ;;  %v2608_v59 = vmul.f32 %v2519_v43, %v6939_v57 }
 0x5dd   :  { %v2609_v26 = vmul.f32 %v2478_v21, %v6928_v53  ;;  %v2611_v29 = vmul.f32 %v2521_v1, %v6931_v54  ;;  %2527 = vrot.lane.b32.xlu0 %v2478_v21, %s6392_s1 }
 0x5de   :  { %v2610_v30 = vmul.f32 %v2480_v25, %v6936_v44  ;;  %v2612_v6 = vmul.f32 %v2523_v11, %v6939_v57 }
 0x5df   :  { %2533 = vrot.lane.b32.xlu1 %v2517_v63, %s6392_s1  ;;  %v7722_v52 = vpack.c.bf16 %v2609_v26, %v2605_v5  ;;  %v7724_v12 = vpack.c.bf16 %v2611_v29, %v2607_v7  ;;  %v9502_v26 = vld [vmem:[#allocation7_spill] sm:$0xff] }
 0x5e0   :  { %v7726_v32 = vpack.c.bf16 %v2610_v30, %v2606_v40  ;;  %v7728_v9 = vpack.c.bf16 %v2612_v6, %v2608_v59  ;;  %v9503_v40 = vld [vmem:[#allocation8_spill] sm:$0xff] }
 0x5e1   :  { %2535 = vrot.lane.b32.xlu0 %v2521_v1, %s6392_s1 }
 0x5e3   :  { %2565 = vrot.lane.b32.xlu1 %v2474_v50, %s6393_s3 }
 0x5e5   :  { %2567 = vrot.lane.b32.xlu0 %v2478_v21, %s6393_s3 }
 0x5e7   :  { %2573 = vrot.lane.b32.xlu1 %v2517_v63, %s6393_s3 }
 0x5e9   :  { %2575 = vrot.lane.b32.xlu0 %v2521_v1, %s6393_s3 }
 0x5eb   :  { %2629 = vrot.lane.b32.xlu1 %v2517_v63, %s6394_s29 }
 0x5ed   :  { %2631 = vrot.lane.b32.xlu0 %v2521_v1, %s6394_s29 }
 0x5ef   :  { %2621 = vrot.lane.b32.xlu1 %v2474_v50, %s6394_s29 }
 0x5f1   :  { %2623 = vrot.lane.b32.xlu0 %v2478_v21, %s6394_s29 }
 0x5f3   :  { %2669 = vrot.lane.b32.xlu1 %v2517_v63, %s6395_s30 }
 0x5f5   :  { %2671 = vrot.lane.b32.xlu0 %v2521_v1, %s6395_s30 }
 0x5f7   :  { %2661 = vrot.lane.b32.xlu1 %v2474_v50, %s6395_s30 }
 0x5f9   :  { %2663 = vrot.lane.b32.xlu0 %v2478_v21, %s6395_s30 }
 0x5fb   :  { %2529 = vrot.lane.b32.xlu1 %v2476_v19, %s6392_s1 }
 0x5fd   :  { %2531 = vrot.lane.b32.xlu0 %v2480_v25, %s6392_s1 }
 0x5ff   :  { %2537 = vrot.lane.b32.xlu1 %v2519_v43, %s6392_s1 }
 0x601   :  { %2539 = vrot.lane.b32.xlu0 %v2523_v11, %s6392_s1 }
 0x603   :  { %2569 = vrot.lane.b32.xlu1 %v2476_v19, %s6393_s3 }
 0x605   :  { %2571 = vrot.lane.b32.xlu0 %v2480_v25, %s6393_s3 }
 0x607   :  { %2577 = vrot.lane.b32.xlu1 %v2519_v43, %s6393_s3 }
 0x609   :  { %2579 = vrot.lane.b32.xlu0 %v2523_v11, %s6393_s3 }
 0x60b   :  { %2625 = vrot.lane.b32.xlu1 %v2476_v19, %s6394_s29 }
 0x60d   :  { %2627 = vrot.lane.b32.xlu0 %v2480_v25, %s6394_s29 }
 0x60f   :  { %2633 = vrot.lane.b32.xlu1 %v2519_v43, %s6394_s29 }
 0x611   :  { %2635 = vrot.lane.b32.xlu0 %v2523_v11, %s6394_s29 }
 0x613   :  { %2665 = vrot.lane.b32.xlu1 %v2476_v19, %s6395_s30 }
 0x615   :  { %2667 = vrot.lane.b32.xlu0 %v2480_v25, %s6395_s30  ;;  %v9501_v25 = vld [vmem:[#allocation9_spill] sm:$0xff] }
 0x617   :  { %2673 = vrot.lane.b32.xlu1 %v2519_v43, %s6395_s30 }
 0x619   :  { %2675 = vrot.lane.b32.xlu0 %v2523_v11, %s6395_s30 }
 0x64d   :  { %v2526_v41 = vpop.permute.xlu1 %2525 }
 0x64f   :  { %v2528_v47 = vpop.permute.xlu0 %2527 }
 0x651   :  { %v2534_v48 = vpop.permute.xlu1 %2533 }
 0x653   :  { %v2536_v3 = vpop.permute.xlu0 %2535 }
 0x655   :  { %v2566_v49 = vpop.permute.xlu1 %2565 }
 0x657   :  { %v2568_v10 = vpop.permute.xlu0 %2567 }
 0x659   :  { %v2574_v42 = vpop.permute.xlu1 %2573 }
 0x65b   :  { %v2576_v36 = vpop.permute.xlu0 %2575 }
 0x65d   :  { %v7759_v23 = vpop.permute.xlu1 %2629 }
 0x65f   :  { %v7761_v45 = vpop.permute.xlu0 %2631 }
 0x661   :  { %v7763_v2 = vpop.permute.xlu1 %2621 }
 0x663   :  { %v7765_v0 = vpop.permute.xlu0 %2623 }
 0x665   :  { %v7767_v8 = vpop.permute.xlu1 %2669 }
 0x667   :  { %v7769_v37 = vpop.permute.xlu0 %2671 }
 0x669   :  { %v7771_v31 = vpop.permute.xlu1 %2661 }
 0x66b   :  { %v7773_v38 = vpop.permute.xlu0 %2663 }
 0x66d   :  { %v2530_v55 = vpop.permute.xlu1 %2529 }
 0x66e   :  { %v2545_v13 = vsel %vm1252_vm3, %v2526_v41, %v2530_v55  ;;  %v2543_v1 = vsel %vm1252_vm3, %v2530_v55, %v2534_v48 }
 0x66f   :  { %v2532_v50 = vpop.permute.xlu0 %2531  ;;  %v2550_v4 = vmul.f32 %v2545_v13, %v9500_v18 }
 0x670   :  { %v2546_v63 = vsel %vm1252_vm3, %v2528_v47, %v2532_v50  ;;  %v2544_v19 = vsel %vm1252_vm3, %v2532_v50, %v2536_v3 }
 0x671   :  { %v2554_v43 = vmul.f32 %v2546_v63, %v9500_v18  ;;  %v2538_v46 = vpop.permute.xlu1 %2537  ;;  %v2555_v11 = vmul.f32 %v2544_v19, %v9501_v25  ;;  %v9519_v18 = vld [vmem:[#allocation27_spill] sm:$0xff] }
 0x672   :  { %v2541_v51 = vsel %vm1252_vm3, %v2534_v48, %v2538_v46  ;;  %v2547_v21 = vsel %vm1252_vm3, %v2538_v46, %v2526_v41  ;;  %v2551_v48 = vmul.f32 %v2543_v1, %v9501_v25 }
 0x673   :  { %v7789_v24 = vpack.c.bf16 %v2554_v43, %v2550_v4  ;;  %v2540_v60 = vpop.permute.xlu0 %2539  ;;  %v2549_v29 = vmul.f32 %v2547_v21, %v9502_v26  ;;  %v2552_v59 = vmul.f32 %v2541_v51, %v9503_v40  ;;  %v9504_v4 = vld [vmem:[#allocation10_spill] sm:$0xff] }
 0x674   :  { %v2542_v5 = vsel %vm1252_vm3, %v2536_v3, %v2540_v60  ;;  %v2548_v7 = vsel %vm1252_vm3, %v2540_v60, %v2528_v47  ;;  %v7808_v50 = vpack.c.bf16 %v2555_v11, %v2551_v48 }
 0x675   :  { %v2553_v30 = vmul.f32 %v2548_v7, %v9502_v26  ;;  %v2556_v6 = vmul.f32 %v2542_v5, %v9503_v40  ;;  %v2570_v41 = vpop.permute.xlu1 %2569  ;;  %2732 = vmatprep.subr.bf16.mxu0 %v7789_v24  ;;  %v9505_v7 = vld [vmem:[#allocation13_spill] sm:$0xff] }
 0x676   :  { %v2585_v55 = vsel %vm1314_vm4, %v2566_v49, %v2570_v41  ;;  %v2583_v60 = vsel %vm1314_vm4, %v2570_v41, %v2574_v42 }
 0x677   :  { %v7804_v3 = vpack.c.bf16 %v2553_v30, %v2549_v29  ;;  %v7806_v13 = vpack.c.bf16 %v2556_v6, %v2552_v59  ;;  %v2572_v47 = vpop.permute.xlu0 %2571  ;;  %v2590_v19 = vmul.f32 %v2585_v55, %v9504_v4  ;;  %v9506_v6 = vld [vmem:[#allocation11_spill] sm:$0xff]  ;;  %v9507_v55 = vld [vmem:[#allocation12_spill] sm:$0xff]  ;;  %v2591_v41 = vmul.f32 %v2583_v60, %v9505_v7  ;;  %v9508_v60 = vld [vmem:[#allocation14_spill] sm:$0xff] }
 0x678   :  { %v2586_v63 = vsel %vm1314_vm4, %v2568_v10, %v2572_v47  ;;  %v2584_v43 = vsel %vm1314_vm4, %v2572_v47, %v2576_v36 }
 0x679   :  { %v2594_v46 = vmul.f32 %v2586_v63, %v9504_v4  ;;  %v2578_v51 = vpop.permute.xlu1 %2577  ;;  %2733 = vmatpush1.bf16.msra.mxu0 %v7804_v3  ;;  %2775 = vmatprep.subr.bf16.mxu1 %v7806_v13  ;;  %v2595_v29 = vmul.f32 %v2584_v43, %v9505_v7  ;;  %v9518_v7 = vld [vmem:[#allocation24_spill] sm:$0xff] }
 0x67a   :  { %v2581_v21 = vsel %vm1314_vm4, %v2574_v42, %v2578_v51  ;;  %v2587_v1 = vsel %vm1314_vm4, %v2578_v51, %v2566_v49  ;;  %2776 = vmatpush1.bf16.msra.mxu1 %v7808_v50 }
 0x67b   :  { %v7825_v11 = vpack.c.bf16 %v2594_v46, %v2590_v19  ;;  %v2580_v5 = vpop.permute.xlu0 %2579  ;;  %v2589_v48 = vmul.f32 %v2587_v1, %v9506_v6  ;;  %v2592_v49 = vmul.f32 %v2581_v21, %v9507_v55  ;;  %v7845_v46 = vpack.c.bf16 %v2595_v29, %v2591_v41 }
 0x67c   :  { %v2582_v59 = vsel %vm1314_vm4, %v2576_v36, %v2580_v5  ;;  %v2588_v30 = vsel %vm1314_vm4, %v2580_v5, %v2568_v10 }
 0x67d   :  { %v2593_v47 = vmul.f32 %v2588_v30, %v9506_v6  ;;  %v2596_v63 = vmul.f32 %v2582_v59, %v9507_v55  ;;  %v2626_v42 = vpop.permute.xlu1 %2625  ;;  %2734 = vmatprep.subr.bf16.mxu0 %v7825_v11 }
 0x67e   :  { %v2639_v36 = vsel %vm1413_vm5, %v2626_v42, %v7759_v23  ;;  %v2641_v1 = vsel %vm1413_vm5, %v7763_v2, %v2626_v42 }
 0x67f   :  { %v7841_v19 = vpack.c.bf16 %v2593_v47, %v2589_v48  ;;  %v7843_v10 = vpack.c.bf16 %v2596_v63, %v2592_v49  ;;  %v2628_v43 = vpop.permute.xlu0 %2627  ;;  %v2646_v5 = vmul.f32 %v2639_v36, %v9508_v60  ;;  %v9509_v49 = vld [vmem:[#allocation15_spill] sm:$0xff]  ;;  %v9510_v36 = vld [vmem:[#allocation16_spill] sm:$0xff] }
 0x680   :  { %v2640_v51 = vsel %vm1413_vm5, %v2628_v43, %v7761_v45  ;;  %v2642_v21 = vsel %vm1413_vm5, %v7765_v0, %v2628_v43  ;;  %v2645_v41 = vmul.f32 %v2641_v1, %v9509_v49 }
 0x681   :  { %v2650_v59 = vmul.f32 %v2640_v51, %v9508_v60  ;;  %v2634_v30 = vpop.permute.xlu1 %2633  ;;  %2735 = vmatpush1.bf16.msra.mxu0 %v7841_v19  ;;  %2777 = vmatprep.subr.bf16.mxu1 %v7843_v10  ;;  %v2649_v47 = vmul.f32 %v2642_v21, %v9509_v49  ;;  %v9511_v51 = vld [vmem:[#allocation17_spill] sm:$0xff] }
 0x682   :  { %v2637_v29 = vsel %vm1413_vm5, %v7759_v23, %v2634_v30  ;;  %v2643_v48 = vsel %vm1413_vm5, %v2634_v30, %v7763_v2  ;;  %2736 = vmatprep.subr.bf16.mxu0 %v7726_v32  ;;  %2778 = vmatpush1.bf16.msra.mxu1 %v7845_v46 }
 0x683   :  { %v7869_v63 = vpack.c.bf16 %v2650_v59, %v2646_v5  ;;  %2779 = vmatprep.subr.bf16.mxu1 %v7728_v9  ;;  %v2636_v42 = vpop.permute.xlu0 %2635  ;;  %v2647_v43 = vmul.f32 %v2637_v29, %v9510_v36  ;;  %v2648_v30 = vmul.f32 %v2643_v48, %v9511_v51 }
 0x684   :  { %v2638_v23 = vsel %vm1413_vm5, %v7761_v45, %v2636_v42  ;;  %v2644_v2 = vsel %vm1413_vm5, %v2636_v42, %v7765_v0  ;;  %v7892_v0 = vpack.c.bf16 %v2649_v47, %v2645_v41 }
 0x685   :  { %v2651_v21 = vmul.f32 %v2638_v23, %v9510_v36  ;;  %v2652_v5 = vmul.f32 %v2644_v2, %v9511_v51  ;;  %v2666_v59 = vpop.permute.xlu1 %2665  ;;  %2737 = vmatpush1.bf16.msra.mxu0 %v7722_v52  ;;  %v9512_v23 = vld [vmem:[#allocation19_spill] sm:$0xff]  ;;  %v9513_v36 = vld [vmem:[#allocation18_spill] sm:$0xff] }
 0x686   :  { %v2679_v1 = vsel %vm1475_vm6, %v2666_v59, %v7767_v8  ;;  %v2681_v45 = vsel %vm1475_vm6, %v7771_v31, %v2666_v59  ;;  %2738 = vmatprep.subr.bf16.mxu0 %v7869_v63  ;;  %2780 = vmatpush1.bf16.msra.mxu1 %v7724_v12 }
 0x687   :  { %v7894_v29 = vpack.c.bf16 %v2651_v21, %v2647_v43  ;;  %v7896_v48 = vpack.c.bf16 %v2652_v5, %v2648_v30  ;;  %v2668_v42 = vpop.permute.xlu0 %2667  ;;  %v2685_v2 = vmul.f32 %v2681_v45, %v9512_v23  ;;  %v2686_v49 = vmul.f32 %v2679_v1, %v9513_v36 }
 0x688   :  { %v2680_v51 = vsel %vm1475_vm6, %v2668_v42, %v7769_v37  ;;  %v2682_v59 = vsel %vm1475_vm6, %v7773_v38, %v2668_v42 }
 0x689   :  { %v2689_v47 = vmul.f32 %v2682_v59, %v9512_v23  ;;  %v2690_v41 = vmul.f32 %v2680_v51, %v9513_v36  ;;  %v2674_v43 = vpop.permute.xlu1 %2673  ;;  %2739 = vmatpush1.bf16.msra.mxu0 %v7892_v0  ;;  %2781 = vmatprep.subr.bf16.mxu1 %v7896_v48  ;;  %v9515_v36 = vld [vmem:[#allocation21_spill] sm:$0xff] }
 0x68a   :  { %v2677_v30 = vsel %vm1475_vm6, %v7767_v8, %v2674_v43  ;;  %v2683_v21 = vsel %vm1475_vm6, %v2674_v43, %v7771_v31  ;;  %2782 = vmatpush1.bf16.msra.mxu1 %v7894_v29  ;;  %v9514_v8 = vld [vmem:[#allocation20_spill] sm:$0xff] }
 0x68b   :  { %v7917_v5 = vpack.c.bf16 %v2689_v47, %v2685_v2  ;;  %v7919_v1 = vpack.c.bf16 %v2690_v41, %v2686_v49  ;;  %v2676_v51 = vpop.permute.xlu0 %2675  ;;  %v2687_v59 = vmul.f32 %v2677_v30, %v9514_v8  ;;  %v2688_v23 = vmul.f32 %v2683_v21, %v9515_v36  ;;  %v6355_v49 = vld [vmem:[%s9373_s8 + $0x28] sm:$0xff]   ;;  %v6358_v41 = vld [vmem:[%s9373_s8 + $0x40] sm:$0xff]  }
 0x68c   :  { %v2678_v45 = vsel %vm1475_vm6, %v7769_v37, %v2676_v51  ;;  %v2684_v42 = vsel %vm1475_vm6, %v2676_v51, %v7773_v38  ;;  %v6356_v38 = vld [vmem:[%s9373_s8 + $0x30] sm:$0xff]  }
 0x68d   :  { %v2691_v31 = vmul.f32 %v2678_v45, %v9514_v8  ;;  %v2692_v2 = vmul.f32 %v2684_v42, %v9515_v36  ;;  %2740 = vmatprep.subr.bf16.mxu0 %v7919_v1  ;;  %v9517_v36 = vld [vmem:[#allocation23_spill] sm:$0xff] }
 0x68e   :  { %2741 = vmatpush1.bf16.msra.mxu0 %v7917_v5 }
 0x68f   :  { %v7936_v37 = vpack.c.bf16 %v2691_v31, %v2687_v59  ;;  %v7938_v47 = vpack.c.bf16 %v2692_v2, %v2688_v23  ;;  %2869 = vmatprep.subr.bf16.mxu0 %v7789_v24  ;;  %v6357_v23 = vld [vmem:[%s9373_s8 + $0x38] sm:$0xff]  }
 0x691   :  { %6025 = vmatmul.mubr.msk.bf16.vlgmr.msra.gmra.mrb[32].mxu0 %vm1548_vm7, %v6355_v49  ;;  %2783 = vmatprep.subr.bf16.mxu1 %v7938_v47 }
 0x692   :  { %2784 = vmatpush1.bf16.msra.mxu1 %v7936_v37  ;;  %2870 = vmatpush1.bf16.msra.mxu0 %v7804_v3 }
 0x693   :  { %2871 = vmatprep.subr.bf16.mxu0 %v7825_v11  ;;  %2912 = vmatprep.subr.bf16.mxu1 %v7806_v13 }
 0x694   :  { %2901 = vmatprep.mubr.bf16.mxu0 %v9499_v61 }
 0x695   :  { %6026 = vmatmul.mubr.msk.bf16.vlgmr.msra.gmra.mrb[32].mxu1 %vm1548_vm7, %v6355_v49 }
 0x696   :  { %2872 = vmatpush1.bf16.msra.mxu0 %v7841_v19  ;;  %2913 = vmatpush1.bf16.msra.mxu1 %v7808_v50 }
 0x697   :  { %2873 = vmatprep.subr.bf16.mxu0 %v7726_v32  ;;  %2914 = vmatprep.subr.bf16.mxu1 %v7843_v10 }
 0x698   :  { %2944 = vmatprep.mubr.bf16.mxu1 %v9499_v61 }
 0x69a   :  { %2874 = vmatpush1.bf16.msra.mxu0 %v7722_v52  ;;  %2915 = vmatpush1.bf16.msra.mxu1 %v7845_v46 }
 0x69b   :  { %2875 = vmatprep.subr.bf16.mxu0 %v7869_v63  ;;  %2916 = vmatprep.subr.bf16.mxu1 %v7728_v9 }
 0x69e   :  { %2876 = vmatpush1.bf16.msra.mxu0 %v7892_v0  ;;  %2917 = vmatpush1.bf16.msra.mxu1 %v7724_v12 }
 0x69f   :  { %2877 = vmatprep.subr.bf16.mxu0 %v7919_v1  ;;  %2918 = vmatprep.subr.bf16.mxu1 %v7896_v48 }
 0x6a2   :  { %2878 = vmatpush1.bf16.msra.mxu0 %v7917_v5  ;;  %2919 = vmatpush1.bf16.msra.mxu1 %v7894_v29 }
 0x6a3   :  { %2920 = vmatprep.subr.bf16.mxu1 %v7938_v47  ;;  %3006 = vmatprep.subr.bf16.mxu0 %v7789_v24 }
 0x6a5   :  { %6030 = vmatmul.mubr.msk.bf16.vlgmr.msra.gmra.mrb[36].mxu0 %vm1548_vm7, %v6356_v38 }
 0x6a6   :  { %2921 = vmatpush1.bf16.msra.mxu1 %v7936_v37  ;;  %3007 = vmatpush1.bf16.msra.mxu0 %v7804_v3 }
 0x6a7   :  { %3008 = vmatprep.subr.bf16.mxu0 %v7825_v11  ;;  %3049 = vmatprep.subr.bf16.mxu1 %v7806_v13 }
 0x6a8   :  { %3038 = vmatprep.mubr.bf16.mxu0 %v9499_v61 }
 0x6a9   :  { %6031 = vmatmul.mubr.msk.bf16.vlgmr.msra.gmra.mrb[36].mxu1 %vm1548_vm7, %v6356_v38 }
 0x6aa   :  { %3009 = vmatpush1.bf16.msra.mxu0 %v7841_v19  ;;  %3050 = vmatpush1.bf16.msra.mxu1 %v7808_v50 }
 0x6ab   :  { %3010 = vmatprep.subr.bf16.mxu0 %v7726_v32  ;;  %3051 = vmatprep.subr.bf16.mxu1 %v7843_v10 }
 0x6ac   :  { %3081 = vmatprep.mubr.bf16.mxu1 %v9499_v61 }
 0x6ae   :  { %3011 = vmatpush1.bf16.msra.mxu0 %v7722_v52  ;;  %3052 = vmatpush1.bf16.msra.mxu1 %v7845_v46 }
 0x6af   :  { %3012 = vmatprep.subr.bf16.mxu0 %v7869_v63  ;;  %3053 = vmatprep.subr.bf16.mxu1 %v7728_v9 }
 0x6b2   :  { %3013 = vmatpush1.bf16.msra.mxu0 %v7892_v0  ;;  %3054 = vmatpush1.bf16.msra.mxu1 %v7724_v12 }
 0x6b3   :  { %3014 = vmatprep.subr.bf16.mxu0 %v7919_v1  ;;  %3055 = vmatprep.subr.bf16.mxu1 %v7896_v48 }
 0x6b6   :  { %3015 = vmatpush1.bf16.msra.mxu0 %v7917_v5  ;;  %3056 = vmatpush1.bf16.msra.mxu1 %v7894_v29 }
 0x6b7   :  { %3057 = vmatprep.subr.bf16.mxu1 %v7938_v47  ;;  %3119 = vmatprep.subr.bf16.mxu0 %v7789_v24 }
 0x6b9   :  { %6035 = vmatmul.mubr.msk.bf16.vlgmr.msra.gmra.mrb[40].mxu0 %vm1548_vm7, %v6357_v23 }
 0x6ba   :  { %3058 = vmatpush1.bf16.msra.mxu1 %v7936_v37  ;;  %3120 = vmatpush1.bf16.msra.mxu0 %v7804_v3 }
 0x6bb   :  { %3121 = vmatprep.subr.bf16.mxu0 %v7825_v11  ;;  %3162 = vmatprep.subr.bf16.mxu1 %v7806_v13 }
 0x6bc   :  { %3151 = vmatprep.mubr.bf16.mxu0 %v9499_v61 }
 0x6bd   :  { %6036 = vmatmul.mubr.msk.bf16.vlgmr.msra.gmra.mrb[40].mxu1 %vm1548_vm7, %v6357_v23 }
 0x6be   :  { %3122 = vmatpush1.bf16.msra.mxu0 %v7841_v19  ;;  %3163 = vmatpush1.bf16.msra.mxu1 %v7808_v50 }
 0x6bf   :  { %3123 = vmatprep.subr.bf16.mxu0 %v7726_v32  ;;  %3164 = vmatprep.subr.bf16.mxu1 %v7843_v10 }
 0x6c0   :  { %3194 = vmatprep.mubr.bf16.mxu1 %v9499_v61 }
 0x6c2   :  { %3124 = vmatpush1.bf16.msra.mxu0 %v7722_v52  ;;  %3165 = vmatpush1.bf16.msra.mxu1 %v7845_v46 }
 0x6c3   :  { %3125 = vmatprep.subr.bf16.mxu0 %v7869_v63  ;;  %3166 = vmatprep.subr.bf16.mxu1 %v7728_v9 }
 0x6c6   :  { %3126 = vmatpush1.bf16.msra.mxu0 %v7892_v0  ;;  %3167 = vmatpush1.bf16.msra.mxu1 %v7724_v12 }
 0x6c7   :  { %3127 = vmatprep.subr.bf16.mxu0 %v7919_v1  ;;  %3168 = vmatprep.subr.bf16.mxu1 %v7896_v48 }
 0x6ca   :  { %3128 = vmatpush1.bf16.msra.mxu0 %v7917_v5  ;;  %3169 = vmatpush1.bf16.msra.mxu1 %v7894_v29 }
 0x6cb   :  { %3170 = vmatprep.subr.bf16.mxu1 %v7938_v47  ;;  %3256 = vmatprep.subr.bf16.mxu0 %v7789_v24 }
 0x6cd   :  { %6040 = vmatmul.mubr.msk.bf16.vlgmr.msra.gmra.mrb[44].mxu0 %vm1548_vm7, %v6358_v41 }
 0x6ce   :  { %3171 = vmatpush1.bf16.msra.mxu1 %v7936_v37  ;;  %3257 = vmatpush1.bf16.msra.mxu0 %v7804_v3 }
 0x6cf   :  { %3258 = vmatprep.subr.bf16.mxu0 %v7825_v11  ;;  %3299 = vmatprep.subr.bf16.mxu1 %v7806_v13 }
 0x6d0   :  { %3288 = vmatprep.mubr.bf16.mxu0 %v9499_v61 }
 0x6d1   :  { %6041 = vmatmul.mubr.msk.bf16.vlgmr.msra.gmra.mrb[44].mxu1 %vm1548_vm7, %v6358_v41 }
 0x6d2   :  { %3259 = vmatpush1.bf16.msra.mxu0 %v7841_v19  ;;  %3300 = vmatpush1.bf16.msra.mxu1 %v7808_v50 }
 0x6d3   :  { %3260 = vmatprep.subr.bf16.mxu0 %v7726_v32  ;;  %3301 = vmatprep.subr.bf16.mxu1 %v7843_v10  ;;  %v6359_v32 = vld [vmem:[%s9373_s8 + $0x48] sm:$0xff]  }
 0x6d4   :  { %3331 = vmatprep.mubr.bf16.mxu1 %v9499_v61 }
 0x6d6   :  { %3261 = vmatpush1.bf16.msra.mxu0 %v7722_v52  ;;  %3302 = vmatpush1.bf16.msra.mxu1 %v7845_v46 }
 0x6d7   :  { %3262 = vmatprep.subr.bf16.mxu0 %v7869_v63  ;;  %3303 = vmatprep.subr.bf16.mxu1 %v7728_v9 }
 0x6da   :  { %3263 = vmatpush1.bf16.msra.mxu0 %v7892_v0  ;;  %3304 = vmatpush1.bf16.msra.mxu1 %v7724_v12 }
 0x6db   :  { %3264 = vmatprep.subr.bf16.mxu0 %v7919_v1  ;;  %3305 = vmatprep.subr.bf16.mxu1 %v7896_v48 }
 0x6de   :  { %3265 = vmatpush1.bf16.msra.mxu0 %v7917_v5  ;;  %3306 = vmatpush1.bf16.msra.mxu1 %v7894_v29 }
 0x6df   :  { %3307 = vmatprep.subr.bf16.mxu1 %v7938_v47 }
 0x6e1   :  { %6045 = vmatmul.mubr.msk.bf16.vlgmr.msra.gmra.mrb[48].mxu0 %vm1548_vm7, %v6359_v32 }
 0x6e2   :  { %3308 = vmatpush1.bf16.msra.mxu1 %v7936_v37  ;;  %3544 = vmatprep.mubr.bf16.mxu0 %v9499_v61 }
 0x6e5   :  { %6046 = vmatmul.mubr.msk.bf16.vlgmr.msra.gmra.mrb[48].mxu1 %vm1548_vm7, %v6359_v32 }
 0x6e6   :  { %3587 = vmatprep.mubr.bf16.mxu1 %v9499_v61 }
 0x764   :  { %v2766_v52 = vpop.f32.mrb[32].mxu0 }
 0x765   :  { %2818 = vrot.lane.b32.xlu1 %v2766_v52, %s6396_s16  ;;  %v2768_v12 = vpop.f32.mrb[33].mxu0 }
 0x766   :  { %v2770_v9 = vpop.f32.mrb[34].mxu0 }
 0x767   :  { %2820 = vrot.lane.b32.xlu0 %v2770_v9, %s6396_s16  ;;  %v2772_v24 = vpop.f32.mrb[35].mxu0 }
 0x768   :  { %v2809_v3 = vpop.f32.mrb[32].mxu1 }
 0x769   :  { %v2811_v13 = vpop.f32.mrb[33].mxu1  ;;  %2826 = vrot.lane.b32.xlu1 %v2809_v3, %s6396_s16 }
 0x76a   :  { %v2813_v50 = vpop.f32.mrb[34].mxu1 }
 0x76b   :  { %v2815_v11 = vpop.f32.mrb[35].mxu1  ;;  %2828 = vrot.lane.b32.xlu0 %v2813_v50, %s6396_s16 }
 0x76d   :  { %2822 = vrot.lane.b32.xlu1 %v2768_v12, %s6396_s16 }
 0x76f   :  { %2824 = vrot.lane.b32.xlu0 %v2772_v24, %s6396_s16 }
 0x771   :  { %2830 = vrot.lane.b32.xlu1 %v2811_v13, %s6396_s16 }
 0x773   :  { %2832 = vrot.lane.b32.xlu0 %v2815_v11, %s6396_s16 }
 0x778   :  { %v2903_v19 = vpop.f32.mrb[36].mxu0 }
 0x779   :  { %2955 = vrot.lane.b32.xlu1 %v2903_v19, %s6397_s17  ;;  %v2905_v10 = vpop.f32.mrb[37].mxu0 }
 0x77a   :  { %v2907_v46 = vpop.f32.mrb[38].mxu0 }
 0x77b   :  { %2957 = vrot.lane.b32.xlu0 %v2907_v46, %s6397_s17  ;;  %v2909_v63 = vpop.f32.mrb[39].mxu0 }
 0x77c   :  { %v2946_v0 = vpop.f32.mrb[36].mxu1 }
 0x77d   :  { %v2948_v29 = vpop.f32.mrb[37].mxu1  ;;  %2963 = vrot.lane.b32.xlu1 %v2946_v0, %s6397_s17 }
 0x77e   :  { %v2950_v48 = vpop.f32.mrb[38].mxu1 }
 0x77f   :  { %v2952_v43 = vpop.f32.mrb[39].mxu1  ;;  %2965 = vrot.lane.b32.xlu0 %v2950_v48, %s6397_s17 }
 0x781   :  { %2959 = vrot.lane.b32.xlu1 %v2905_v10, %s6397_s17 }
 0x783   :  { %2961 = vrot.lane.b32.xlu0 %v2909_v63, %s6397_s17 }
 0x785   :  { %2967 = vrot.lane.b32.xlu1 %v2948_v29, %s6397_s17 }
 0x787   :  { %2969 = vrot.lane.b32.xlu0 %v2952_v43, %s6397_s17 }
 0x78c   :  { %v8070_v30 = vpop.f32.mrb[40].mxu0 }
 0x78d   :  { %v8072_v21 = vpop.f32.mrb[41].mxu0 }
 0x78e   :  { %v8074_v5 = vpop.f32.mrb[42].mxu0  ;;  %v3093_v8 = vmul.f32 %v8072_v21, %v9517_v36 }
 0x78f   :  { %v8076_v1 = vpop.f32.mrb[43].mxu0 }
 0x790   :  { %v8078_v51 = vpop.f32.mrb[40].mxu1  ;;  %v3097_v6 = vmul.f32 %v8076_v1, %v9517_v36 }
 0x791   :  { %v8080_v45 = vpop.f32.mrb[41].mxu1  ;;  %v3094_v4 = vmul.f32 %v8078_v51, %v9518_v7 }
 0x792   :  { %v8082_v42 = vpop.f32.mrb[42].mxu1 }
 0x793   :  { %v8084_v59 = vpop.f32.mrb[43].mxu1 }
 0x7a0   :  { %v3153_v31 = vpop.f32.mrb[44].mxu0 }
 0x7a1   :  { %3205 = vrot.lane.b32.xlu1 %v3153_v31, %s6398_s18  ;;  %v3155_v2 = vpop.f32.mrb[45].mxu0 }
 0x7a2   :  { %v3157_v49 = vpop.f32.mrb[46].mxu0 }
 0x7a3   :  { %3207 = vrot.lane.b32.xlu0 %v3157_v49, %s6398_s18  ;;  %v3159_v37 = vpop.f32.mrb[47].mxu0 }
 0x7a4   :  { %v3196_v47 = vpop.f32.mrb[44].mxu1 }
 0x7a5   :  { %v3198_v38 = vpop.f32.mrb[45].mxu1  ;;  %3213 = vrot.lane.b32.xlu1 %v3196_v47, %s6398_s18 }
 0x7a6   :  { %v3200_v23 = vpop.f32.mrb[46].mxu1 }
 0x7a7   :  { %v3202_v41 = vpop.f32.mrb[47].mxu1  ;;  %3215 = vrot.lane.b32.xlu0 %v3200_v23, %s6398_s18 }
 0x7a9   :  { %3209 = vrot.lane.b32.xlu1 %v3155_v2, %s6398_s18 }
 0x7ab   :  { %3211 = vrot.lane.b32.xlu0 %v3159_v37, %s6398_s18 }
 0x7ad   :  { %3217 = vrot.lane.b32.xlu1 %v3198_v38, %s6398_s18 }
 0x7af   :  { %3219 = vrot.lane.b32.xlu0 %v3202_v41, %s6398_s18 }
 0x7b4   :  { %v3290_v32 = vpop.f32.mrb[48].mxu0 }
 0x7b5   :  { %3342 = vrot.lane.b32.xlu1 %v3290_v32, %s6399_s19  ;;  %v3292_v52 = vpop.f32.mrb[49].mxu0 }
 0x7b6   :  { %v3294_v12 = vpop.f32.mrb[50].mxu0 }
 0x7b7   :  { %3344 = vrot.lane.b32.xlu0 %v3294_v12, %s6399_s19  ;;  %v3296_v9 = vpop.f32.mrb[51].mxu0 }
 0x7b8   :  { %v3333_v24 = vpop.f32.mrb[48].mxu1 }
 0x7b9   :  { %v3335_v3 = vpop.f32.mrb[49].mxu1  ;;  %3350 = vrot.lane.b32.xlu1 %v3333_v24, %s6399_s19 }
 0x7ba   :  { %v3337_v13 = vpop.f32.mrb[50].mxu1 }
 0x7bb   :  { %v3339_v50 = vpop.f32.mrb[51].mxu1  ;;  %3352 = vrot.lane.b32.xlu0 %v3337_v13, %s6399_s19  ;;  %v9516_v13 = vld [vmem:[#allocation22_spill] sm:$0xff] }
 0x7bc   :  { %v8120_v60 = vmul.f32 %v8074_v5, %v9516_v13 }
 0x7bd   :  { %3346 = vrot.lane.b32.xlu1 %v3292_v52, %s6399_s19 }
 0x7bf   :  { %3348 = vrot.lane.b32.xlu0 %v3296_v9, %s6399_s19 }
 0x7c1   :  { %3354 = vrot.lane.b32.xlu1 %v3335_v3, %s6399_s19 }
 0x7c3   :  { %3356 = vrot.lane.b32.xlu0 %v3339_v50, %s6399_s19  ;;  %v3092_v50 = vmul.f32 %v8070_v30, %v9516_v13 }
 0x7d7   :  { %v2819_v11 = vpop.permute.xlu1 %2818 }
 0x7d9   :  { %v2821_v19 = vpop.permute.xlu0 %2820 }
 0x7db   :  { %v2827_v10 = vpop.permute.xlu1 %2826 }
 0x7dd   :  { %v2829_v46 = vpop.permute.xlu0 %2828 }
 0x7df   :  { %v2823_v63 = vpop.permute.xlu1 %2822 }
 0x7e0   :  { %v2836_v9 = vsel %vm1654_vm8, %v2823_v63, %v2827_v10  ;;  %v2838_v24 = vsel %vm1654_vm8, %v2819_v11, %v2823_v63 }
 0x7e1   :  { %v2825_v0 = vpop.permute.xlu0 %2824  ;;  %v2843_v63 = vmul.f32 %v2838_v24, %v7467_v17  ;;  %v2844_v40 = vmul.f32 %v2836_v9, %v7470_v15 }
 0x7e2   :  { %v2837_v30 = vsel %vm1654_vm8, %v2825_v0, %v2829_v46  ;;  %v2839_v21 = vsel %vm1654_vm8, %v2821_v19, %v2825_v0 }
 0x7e3   :  { %v2831_v29 = vpop.permute.xlu1 %2830 }
 0x7e4   :  { %v2834_v1 = vsel %vm1654_vm8, %v2827_v10, %v2831_v29  ;;  %v2840_v0 = vsel %vm1654_vm8, %v2831_v29, %v2819_v11  ;;  %v2847_v29 = vmul.f32 %v2839_v21, %v7467_v17 }
 0x7e5   :  { %v2833_v48 = vpop.permute.xlu0 %2832 }
 0x7e6   :  { %v2835_v25 = vsel %vm1654_vm8, %v2829_v46, %v2833_v48 }
 0x7eb   :  { %v2956_v43 = vpop.permute.xlu1 %2955 }
 0x7ed   :  { %v2958_v31 = vpop.permute.xlu0 %2957 }
 0x7ef   :  { %v2964_v2 = vpop.permute.xlu1 %2963 }
 0x7f1   :  { %v2966_v49 = vpop.permute.xlu0 %2965 }
 0x7f3   :  { %v2960_v37 = vpop.permute.xlu1 %2959 }
 0x7f4   :  { %v2973_v5 = vsel %vm1813_vm9, %v2960_v37, %v2964_v2  ;;  %v2975_v13 = vsel %vm1813_vm9, %v2956_v43, %v2960_v37 }
 0x7f5   :  { %v2962_v47 = vpop.permute.xlu0 %2961  ;;  %v2981_v11 = vmul.f32 %v2973_v5, %v9519_v18 }
 0x7f6   :  { %v2974_v51 = vsel %vm1813_vm9, %v2962_v47, %v2966_v49  ;;  %v2976_v9 = vsel %vm1813_vm9, %v2958_v31, %v2962_v47  ;;  %v2841_v47 = vsel %vm1654_vm8, %v2833_v48, %v2821_v19  ;;  %v2842_v48 = vmul.f32 %v2840_v0, %v7473_v16 }
 0x7f7   :  { %v2968_v38 = vpop.permute.xlu1 %2967  ;;  %v2846_v21 = vmul.f32 %v2841_v47, %v7473_v16 }
 0x7f8   :  { %v2977_v24 = vsel %vm1813_vm9, %v2968_v38, %v2956_v43  ;;  %v2971_v36 = vsel %vm1813_vm9, %v2964_v2, %v2968_v38  ;;  %v2980_v43 = vmul.f32 %v2975_v13, %v7479_v39  ;;  %v2984_v2 = vmul.f32 %v2976_v9, %v7479_v39  ;;  %v9520_v13 = vld [vmem:[#allocation26_spill] sm:$0xff] }
 0x7f9   :  { %v2970_v23 = vpop.permute.xlu0 %2969  ;;  %v2979_v38 = vmul.f32 %v2977_v24, %v7489_v58  ;;  %v2982_v46 = vmul.f32 %v2971_v36, %v7492_v62  ;;  %v2845_v5 = vmul.f32 %v2834_v1, %v9520_v13  ;;  %v2849_v9 = vmul.f32 %v2835_v25, %v9520_v13 }
 0x7fa   :  { %v2972_v37 = vsel %vm1813_vm9, %v2966_v49, %v2970_v23  ;;  %v2978_v10 = vsel %vm1813_vm9, %v2970_v23, %v2958_v31  ;;  %v2985_v49 = vmul.f32 %v2974_v51, %v9519_v18  ;;  %v2848_v23 = vmul.f32 %v2837_v30, %v7470_v15 }
 0x7fb   :  { %v2983_v57 = vmul.f32 %v2978_v10, %v7489_v58  ;;  %v2986_v19 = vmul.f32 %v2972_v37, %v7492_v62  ;;  %v2988_v18 = vadd.f32 %v2980_v43, %v2843_v63  ;;  %v2989_v24 = vadd.f32 %v2981_v11, %v2844_v40  ;;  %v9521_v43 = vld [vmem:[#allocation25_spill] sm:$0xff] }
 0x7fc   :  { %v2992_v37 = vadd.f32 %v2984_v2, %v2847_v29  ;;  %v2993_v10 = vadd.f32 %v2985_v49, %v2848_v23  ;;  %v2987_v0 = vadd.f32 %v2979_v38, %v2842_v48  ;;  %v2990_v25 = vadd.f32 %v2982_v46, %v2845_v5 }
 0x7fd   :  { %v2991_v13 = vadd.f32 %v2983_v57, %v2846_v21  ;;  %v2994_v63 = vadd.f32 %v2986_v19, %v2849_v9  ;;  %v3095_v11 = vmul.f32 %v8080_v45, %v9521_v43  ;;  %v3099_v38 = vmul.f32 %v8084_v59, %v9521_v43 }
 0x7fe   :  { %v3101_v57 = vadd.f32 %v3093_v8, %v2988_v18  ;;  %v3102_v46 = vadd.f32 %v3094_v4, %v2989_v24  ;;  %v3100_v19 = vadd.f32 %v3092_v50, %v2987_v0 }
 0x7ff   :  { %v3104_v5 = vadd.f32 %v8120_v60, %v2991_v13  ;;  %v3103_v21 = vadd.f32 %v3095_v11, %v2990_v25 }
 0x813   :  { %v8102_v41 = vpop.permute.xlu1 %3205 }
 0x815   :  { %v8104_v32 = vpop.permute.xlu0 %3207 }
 0x817   :  { %v8106_v52 = vpop.permute.xlu1 %3213 }
 0x819   :  { %v8108_v12 = vpop.permute.xlu0 %3215 }
 0x81b   :  { %v3210_v3 = vpop.permute.xlu1 %3209 }
 0x81c   :  { %v3223_v30 = vsel %vm2106_vm10, %v3210_v3, %v8106_v52  ;;  %v3225_v36 = vsel %vm2106_vm10, %v8102_v41, %v3210_v3  ;;  %v3098_v3 = vmul.f32 %v8082_v42, %v9518_v7 }
 0x81d   :  { %v3212_v55 = vpop.permute.xlu0 %3211  ;;  %v3229_v29 = vmul.f32 %v3225_v36, %v7538_v20  ;;  %v3230_v2 = vmul.f32 %v3223_v30, %v7541_v22  ;;  %v3107_v30 = vadd.f32 %v3099_v38, %v2994_v63 }
 0x81e   :  { %v3226_v1 = vsel %vm2106_vm10, %v8104_v32, %v3212_v55  ;;  %v3224_v40 = vsel %vm2106_vm10, %v3212_v55, %v8108_v12  ;;  %v3105_v55 = vadd.f32 %v3097_v6, %v2992_v37  ;;  %v3106_v9 = vadd.f32 %v3098_v3, %v2993_v10 }
 0x81f   :  { %v3218_v26 = vpop.permute.xlu1 %3217  ;;  %v3233_v23 = vmul.f32 %v3226_v1, %v7538_v20  ;;  %v3234_v48 = vmul.f32 %v3224_v40, %v7541_v22  ;;  %v3237_v36 = vadd.f32 %v3229_v29, %v3100_v19  ;;  %v3238_v59 = vadd.f32 %v3230_v2, %v3101_v57 }
 0x820   :  { %v3221_v45 = vsel %vm2106_vm10, %v8106_v52, %v3218_v26  ;;  %v3227_v18 = vsel %vm2106_vm10, %v3218_v26, %v8102_v41 }
 0x821   :  { %v3220_v31 = vpop.permute.xlu0 %3219  ;;  %v3241_v8 = vadd.f32 %v3233_v23, %v3104_v5  ;;  %v3231_v52 = vmul.f32 %v3221_v45, %v7544_v34  ;;  %v3242_v13 = vadd.f32 %v3234_v48, %v3105_v55  ;;  %v3232_v37 = vmul.f32 %v3227_v18, %v7549_v28 }
 0x822   :  { %v3222_v4 = vsel %vm2106_vm10, %v8108_v12, %v3220_v31  ;;  %v3228_v24 = vsel %vm2106_vm10, %v3220_v31, %v8104_v32 }
 0x823   :  { %v3235_v10 = vmul.f32 %v3222_v4, %v7544_v34  ;;  %v3239_v11 = vadd.f32 %v3231_v52, %v3102_v46  ;;  %v3236_v3 = vmul.f32 %v3228_v24, %v7549_v28  ;;  %v3240_v48 = vadd.f32 %v3232_v37, %v3103_v21 }
 0x825   :  { %v3243_v45 = vadd.f32 %v3235_v10, %v3106_v9  ;;  %v3244_v18 = vadd.f32 %v3236_v3, %v3107_v30 }
 0x827   :  { %v3343_v51 = vpop.permute.xlu1 %3342 }
 0x829   :  { %v3345_v47 = vpop.permute.xlu0 %3344 }
 0x82b   :  { %v3351_v49 = vpop.permute.xlu1 %3350 }
 0x82d   :  { %v3353_v42 = vpop.permute.xlu0 %3352 }
 0x82f   :  { %v3347_v6 = vpop.permute.xlu1 %3346 }
 0x830   :  { %v3360_v60 = vsel %vm2265_vm11, %v3347_v6, %v3351_v49  ;;  %v3362_v50 = vsel %vm2265_vm11, %v3343_v51, %v3347_v6 }
 0x831   :  { %v3366_v26 = vmul.f32 %v3362_v50, %v7553_v14  ;;  %v3367_v41 = vmul.f32 %v3360_v60, %v7626_v27  ;;  %v3349_v12 = vpop.permute.xlu0 %3348 }
 0x832   :  { %v3361_v0 = vsel %vm2265_vm11, %v3349_v12, %v3353_v42  ;;  %v3363_v1 = vsel %vm2265_vm11, %v3345_v47, %v3349_v12 }
 0x833   :  { %v3374_v25 = vadd.f32 %v3366_v26, %v3237_v36  ;;  %v3375_v63 = vadd.f32 %v3367_v41, %v3238_v59  ;;  %v3370_v40 = vmul.f32 %v3363_v1, %v7553_v14  ;;  %v3371_v32 = vmul.f32 %v3361_v0, %v7626_v27  ;;  %v3355_v31 = vpop.permute.xlu1 %3354 }
 0x834   :  { %v3358_v29 = vsel %vm2265_vm11, %v3351_v49, %v3355_v31  ;;  %v3364_v2 = vsel %vm2265_vm11, %v3355_v31, %v3343_v51 }
 0x835   :  { %v3378_v38 = vadd.f32 %v3370_v40, %v3241_v8  ;;  %v3379_v57 = vadd.f32 %v3371_v32, %v3242_v13  ;;  %v3368_v23 = vmul.f32 %v3358_v29, %v7630_v56  ;;  %v3369_v19 = vmul.f32 %v3364_v2, %v7637_v35  ;;  %v3357_v55 = vpop.permute.xlu0 %3356 }
 0x836   :  { %v3359_v46 = vsel %vm2265_vm11, %v3353_v42, %v3357_v55  ;;  %v3365_v5 = vsel %vm2265_vm11, %v3357_v55, %v3345_v47  ;;  %v3382_v59 = vadd.f32 %v3375_v63, %v3374_v25  ;;  %v6048_v47 = vld [vmem:[%s9375_s9 + $0x18] sm:$0xff]  ;;  %v6047_v42 = vld [vmem:[%s9375_s9 + $0x10] sm:$0xff] }
 0x837   :  { %v3376_v36 = vadd.f32 %v3368_v23, %v3239_v11  ;;  %v3372_v49 = vmul.f32 %v3359_v46, %v7630_v56  ;;  %v3373_v51 = vmul.f32 %v3365_v5, %v7637_v35  ;;  %v3377_v6 = vadd.f32 %v3369_v19, %v3240_v48 }
 0x838   :  { %v3387_v52 = vadd.f32 %v3379_v57, %v3378_v38 }
 0x839   :  { %v3380_v4 = vadd.f32 %v3372_v49, %v3243_v45  ;;  %v3383_v8 = vadd.f32 %v3382_v59, %v3376_v36  ;;  %v3381_v21 = vadd.f32 %v3373_v51, %v3244_v18  ;;  %v6054_v49 = vld [vmem:[%s9377_s12 + $0x18] sm:$0xff] }
 0x83b   :  { %v3384_v60 = vadd.f32 %v3383_v8, %v3377_v6  ;;  %v3388_v9 = vadd.f32 %v3387_v52, %v3380_v4 }
 0x83d   :  { %3385 = vadd.xlane.f32.xlu1 %v3384_v60  ;;  %v3389_v50 = vadd.f32 %v3388_v9, %v3381_v21 }
 0x83f   :  { %3390 = vadd.xlane.f32.xlu0 %v3389_v50 }
 0x84e   :  { %3444 = vperm.xlu1 %6152, %v6048_v47  }
 0x855   :  { %3439 = vperm.xlu0 %6151, %v6047_v42  }
 0x8ca   :  { %v3386_v30 = vpop.xlane.xlu1 %3385 }
 0x8cb   :  { %v3392_v13 = vmul.f32 0.001953125, %v3386_v30 }
 0x8cc   :  { %v3391_v24 = vpop.xlane.xlu0 %3390 }
 0x8cd   :  { %v3394_v26 = vsub.f32 %v3374_v25, %v3392_v13  ;;  %v3395_v41 = vsub.f32 %v3375_v63, %v3392_v13  ;;  %v3393_v12 = vmul.f32 0.001953125, %v3391_v24  ;;  %v3396_v37 = vsub.f32 %v3376_v36, %v3392_v13  ;;  %v6053_v36 = vld [vmem:[%s9377_s12 + $0x10] sm:$0xff] }
 0x8ce   :  { %v3397_v32 = vsub.f32 %v3377_v6, %v3392_v13  ;;  %v3445_v59 = vpop.permute.xlu1 %3444 }
 0x8cf   :  { %v3398_v10 = vsub.f32 %v3378_v38, %v3393_v12  ;;  %v3399_v0 = vsub.f32 %v3379_v57, %v3393_v12  ;;  %v3400_v1 = vsub.f32 %v3380_v4, %v3393_v12  ;;  %v3402_v40 = vmul.f32 %v3394_v26, %v3394_v26  ;;  %v6049_v38 = vld [vmem:[%s9376_s10 + $0x10] sm:$0xff]  ;;  %v6050_v57 = vld [vmem:[%s9376_s10 + $0x18] sm:$0xff] }
 0x8d0   :  { %v3403_v31 = vmul.f32 %v3395_v41, %v3395_v41  ;;  %v3401_v11 = vsub.f32 %v3381_v21, %v3393_v12  ;;  %v3404_v2 = vmul.f32 %v3396_v37, %v3396_v37  ;;  %v3405_v48 = vmul.f32 %v3397_v32, %v3397_v32 }
 0x8d1   :  { %v3406_v3 = vmul.f32 %v3398_v10, %v3398_v10  ;;  %v3407_v29 = vmul.f32 %v3399_v0, %v3399_v0  ;;  %v3408_v19 = vmul.f32 %v3400_v1, %v3400_v1 }
 0x8d2   :  { %v3410_v23 = vadd.f32 %v3403_v31, %v3402_v40  ;;  %v3409_v46 = vmul.f32 %v3401_v11, %v3401_v11 }
 0x8d3   :  { %v3415_v55 = vadd.f32 %v3407_v29, %v3406_v3 }
 0x8d4   :  { %v3411_v45 = vadd.f32 %v3410_v23, %v3404_v2  ;;  %v3440_v51 = vpop.permute.xlu0 %3439 }
 0x8d5   :  { %v3416_v25 = vadd.f32 %v3415_v55, %v3408_v19 }
 0x8d6   :  { %v3412_v63 = vadd.f32 %v3411_v45, %v3405_v48 }
 0x8d7   :  { %v3417_v5 = vadd.f32 %v3416_v25, %v3409_v46 }
 0x8d8   :  { %3413 = vadd.xlane.f32.xlu0 %v3412_v63 }
 0x8d9   :  { %3418 = vadd.xlane.f32.xlu1 %v3417_v5 }
 0x8ea   :  { %3460 = vperm.xlu1 %6152, %v6049_v38  }
 0x8ee   :  { %3465 = vperm.xlu0 %6151, %v6050_v57   ;;  %3496 = vperm.xlu1 %6152, %v6053_v36  }
 0x8f2   :  { %3501 = vperm.xlu0 %6151, %v6054_v49  }
 0x965   :  { %v3414_v18 = vpop.xlane.xlu0 %3413 }
 0x966   :  { %v3420_v4 = vmul.f32 0.001953125, %v3414_v18  ;;  %v3419_v6 = vpop.xlane.xlu1 %3418 }
 0x967   :  { %v3421_v8 = vmul.f32 0.001953125, %v3419_v6 }
 0x968   :  { %v3422_v52 = vadd.f32 1e-05, %v3420_v4 }
 0x969   :  { %v3423_v60 = vadd.f32 1e-05, %v3421_v8  ;;  %v6360_v8 = vld [vmem:[%s9378_s11 + $0x8] sm:$0xff]  }
 0x96a   :  { %6377 = vrsqrt.f32 %v3422_v52  ;;  %v3461_v23 = vpop.permute.xlu1 %3460 }
 0x96b   :  { %6379 = vrsqrt.f32 %v3423_v60 }
 0x96d   :  { %v3466_v63 = vpop.permute.xlu0 %3465 }
 0x96e   :  { %v3497_v52 = vpop.permute.xlu1 %3496 }
 0x971   :  { %v3502_v60 = vpop.permute.xlu0 %3501 }
 0x974   :  { %v6378_v21 = vpop.eup %6377 }
 0x975   :  { %v6380_v9 = vpop.eup %6379  ;;  %v3426_v50 = vmul.f32 %v6378_v21, %v3394_v26  ;;  %v3428_v47 = vmul.f32 %v6378_v21, %v3396_v37  ;;  %v3427_v42 = vmul.f32 %v6378_v21, %v3395_v41  ;;  %v3429_v30 = vmul.f32 %v6378_v21, %v3397_v32 }
 0x976   :  { %v3430_v13 = vmul.f32 %v6380_v9, %v3398_v10  ;;  %v3432_v24 = vmul.f32 %v6380_v9, %v3400_v1  ;;  %v3431_v12 = vmul.f32 %v6380_v9, %v3399_v0  ;;  %v3433_v40 = vmul.f32 %v6380_v9, %v3401_v11 }
 0x977   :  { %v3447_v31 = vmul.f32 %v3440_v51, %v3426_v50  ;;  %v3449_v3 = vmul.f32 %v3440_v51, %v3428_v47  ;;  %v3448_v29 = vmul.f32 %v3440_v51, %v3427_v42  ;;  %v3450_v2 = vmul.f32 %v3440_v51, %v3429_v30 }
 0x978   :  { %v3451_v19 = vmul.f32 %v3445_v59, %v3430_v13  ;;  %v3453_v55 = vmul.f32 %v3445_v59, %v3432_v24  ;;  %v3452_v48 = vmul.f32 %v3445_v59, %v3431_v12  ;;  %v3454_v45 = vmul.f32 %v3445_v59, %v3433_v40 }
 0x979   :  { %v3468_v46 = vadd.f32 %v3461_v23, %v3447_v31  ;;  %v3470_v25 = vadd.f32 %v3461_v23, %v3449_v3  ;;  %v3469_v26 = vadd.f32 %v3461_v23, %v3448_v29  ;;  %v3471_v37 = vadd.f32 %v3461_v23, %v3450_v2 }
 0x97a   :  { %v3472_v41 = vadd.f32 %v3466_v63, %v3451_v19  ;;  %v3474_v32 = vadd.f32 %v3466_v63, %v3453_v55  ;;  %v3473_v10 = vadd.f32 %v3466_v63, %v3452_v48  ;;  %v3475_v1 = vadd.f32 %v3466_v63, %v3454_v45  ;;  %v9522_v63 = vld [vmem:[#allocation5_spill] sm:$0xff] }
 0x97b   :  { %v3476_v0 = vmax.f32 %v3468_v46, 0.0  ;;  %v3478_v11 = vmax.f32 %v3470_v25, 0.0  ;;  %v3477_v5 = vmax.f32 %v3469_v26, 0.0  ;;  %v3479_v38 = vmax.f32 %v3471_v37, 0.0 }
 0x97c   :  { %v3480_v57 = vmax.f32 %v3472_v41, 0.0  ;;  %v3482_v36 = vmax.f32 %v3474_v32, 0.0  ;;  %v3481_v49 = vmax.f32 %v3473_v10, 0.0  ;;  %v3483_v51 = vmax.f32 %v3475_v1, 0.0 }
 0x97e   :  { %v3488_v18 = vpack.c.bf16 %v3481_v49, %v3477_v5  ;;  %v3490_v4 = vpack.c.bf16 %v3483_v51, %v3479_v38  ;;  %v3487_v59 = vpack.c.bf16 %v3480_v57, %v3476_v0  ;;  %v3489_v6 = vpack.c.bf16 %v3482_v36, %v3478_v11 }
 0x980   :  { %3512 = vmatprep.subr.bf16.mxu0 %v3488_v18  ;;  %3555 = vmatprep.subr.bf16.mxu1 %v3490_v4 }
 0x981   :  { %3513 = vmatpush1.bf16.msra.mxu0 %v3487_v59  ;;  %3556 = vmatpush1.bf16.msra.mxu1 %v3489_v6 }
 0x984   :  { %6056 = vmatmul.mubr.msk.bf16.vlgmr.msra.gmra.mrb[52].mxu0 %vm2435_vm12, %v6360_v8  ;;  %6057 = vmatmul.mubr.msk.bf16.vlgmr.msra.gmra.mrb[52].mxu1 %vm2435_vm12, %v6360_v8 }
 0x985   :  { %3837 = vmatprep.mubr.bf16.mxu0 %v9499_v61  ;;  %3880 = vmatprep.mubr.bf16.mxu1 %v9499_v61 }
 0xa57   :  { %v3546_v21 = vpop.f32.mrb[52].mxu0  ;;  %v3589_v9 = vpop.f32.mrb[52].mxu1 }
 0xa58   :  { %v3547_v50 = vadd.f32 %v3546_v21, %v3497_v52  ;;  %v3590_v47 = vadd.f32 %v3589_v9, %v3497_v52  ;;  %v3548_v42 = vpop.f32.mrb[53].mxu0  ;;  %v3591_v30 = vpop.f32.mrb[53].mxu1 }
 0xa59   :  { %v3549_v13 = vadd.f32 %v3548_v42, %v3497_v52  ;;  %v3592_v24 = vadd.f32 %v3591_v30, %v3497_v52  ;;  %v3550_v12 = vpop.f32.mrb[54].mxu0  ;;  %v3593_v40 = vpop.f32.mrb[54].mxu1 }
 0xa5a   :  { %v3551_v31 = vadd.f32 %v3550_v12, %v3502_v60  ;;  %v3594_v3 = vadd.f32 %v3593_v40, %v3502_v60  ;;  %v3552_v29 = vpop.f32.mrb[55].mxu0  ;;  %v3595_v2 = vpop.f32.mrb[55].mxu1  ;;  %3598 = vrot.lane.b32.xlu1 %v3547_v50, %s6392_s1  ;;  %v3678_v55 = vmul.f32 %v3547_v50, %v6928_v53  ;;  %v3680_v48 = vmul.f32 %v3590_v47, %v6931_v54 }
 0xa5b   :  { %v3553_v23 = vadd.f32 %v3552_v29, %v3502_v60  ;;  %v3596_v19 = vadd.f32 %v3595_v2, %v3502_v60  ;;  %v3679_v25 = vmul.f32 %v3549_v13, %v6936_v44  ;;  %v3681_v26 = vmul.f32 %v3592_v24, %v9522_v63 }
 0xa5c   :  { %v3682_v45 = vmul.f32 %v3551_v31, %v6928_v53  ;;  %v3684_v46 = vmul.f32 %v3594_v3, %v6931_v54  ;;  %3600 = vrot.lane.b32.xlu0 %v3551_v31, %s6392_s1 }
 0xa5d   :  { %v3683_v37 = vmul.f32 %v3553_v23, %v6936_v44  ;;  %v3685_v41 = vmul.f32 %v3596_v19, %v9522_v63  ;;  %v9541_v63 = vld [vmem:[#allocation27_spill] sm:$0xff] }
 0xa5e   :  { %3606 = vrot.lane.b32.xlu1 %v3590_v47, %s6392_s1  ;;  %v8269_v32 = vpack.c.bf16 %v3682_v45, %v3678_v55  ;;  %v8271_v10 = vpack.c.bf16 %v3684_v46, %v3680_v48  ;;  %v9524_v55 = vld [vmem:[#allocation9_spill] sm:$0xff] }
 0xa5f   :  { %v8273_v1 = vpack.c.bf16 %v3683_v37, %v3679_v25  ;;  %v8275_v0 = vpack.c.bf16 %v3685_v41, %v3681_v26  ;;  %v9525_v25 = vld [vmem:[#allocation7_spill] sm:$0xff]  ;;  %v9526_v37 = vld [vmem:[#allocation8_spill] sm:$0xff] }
 0xa60   :  { %3608 = vrot.lane.b32.xlu0 %v3594_v3, %s6392_s1 }
 0xa62   :  { %3638 = vrot.lane.b32.xlu1 %v3547_v50, %s6393_s3 }
 0xa64   :  { %3640 = vrot.lane.b32.xlu0 %v3551_v31, %s6393_s3 }
 0xa66   :  { %3646 = vrot.lane.b32.xlu1 %v3590_v47, %s6393_s3 }
 0xa68   :  { %3648 = vrot.lane.b32.xlu0 %v3594_v3, %s6393_s3 }
 0xa6a   :  { %3702 = vrot.lane.b32.xlu1 %v3590_v47, %s6394_s29 }
 0xa6c   :  { %3704 = vrot.lane.b32.xlu0 %v3594_v3, %s6394_s29 }
 0xa6e   :  { %3694 = vrot.lane.b32.xlu1 %v3547_v50, %s6394_s29 }
 0xa70   :  { %3696 = vrot.lane.b32.xlu0 %v3551_v31, %s6394_s29 }
 0xa72   :  { %3742 = vrot.lane.b32.xlu1 %v3590_v47, %s6395_s30 }
 0xa74   :  { %3744 = vrot.lane.b32.xlu0 %v3594_v3, %s6395_s30 }
 0xa76   :  { %3734 = vrot.lane.b32.xlu1 %v3547_v50, %s6395_s30 }
 0xa78   :  { %3736 = vrot.lane.b32.xlu0 %v3551_v31, %s6395_s30 }
 0xa7a   :  { %3602 = vrot.lane.b32.xlu1 %v3549_v13, %s6392_s1 }
 0xa7c   :  { %3604 = vrot.lane.b32.xlu0 %v3553_v23, %s6392_s1 }
 0xa7e   :  { %3610 = vrot.lane.b32.xlu1 %v3592_v24, %s6392_s1 }
 0xa80   :  { %3612 = vrot.lane.b32.xlu0 %v3596_v19, %s6392_s1 }
 0xa82   :  { %3642 = vrot.lane.b32.xlu1 %v3549_v13, %s6393_s3 }
 0xa84   :  { %3644 = vrot.lane.b32.xlu0 %v3553_v23, %s6393_s3 }
 0xa86   :  { %3650 = vrot.lane.b32.xlu1 %v3592_v24, %s6393_s3 }
 0xa88   :  { %3652 = vrot.lane.b32.xlu0 %v3596_v19, %s6393_s3 }
 0xa8a   :  { %3698 = vrot.lane.b32.xlu1 %v3549_v13, %s6394_s29 }
 0xa8c   :  { %3700 = vrot.lane.b32.xlu0 %v3553_v23, %s6394_s29 }
 0xa8e   :  { %3706 = vrot.lane.b32.xlu1 %v3592_v24, %s6394_s29 }
 0xa90   :  { %3708 = vrot.lane.b32.xlu0 %v3596_v19, %s6394_s29 }
 0xa92   :  { %3738 = vrot.lane.b32.xlu1 %v3549_v13, %s6395_s30  ;;  %v9523_v13 = vld [vmem:[#allocation6_spill] sm:$0xff] }
 0xa94   :  { %3740 = vrot.lane.b32.xlu0 %v3553_v23, %s6395_s30 }
 0xa96   :  { %3746 = vrot.lane.b32.xlu1 %v3592_v24, %s6395_s30 }
 0xa98   :  { %3748 = vrot.lane.b32.xlu0 %v3596_v19, %s6395_s30 }
 0xacc   :  { %v3599_v11 = vpop.permute.xlu1 %3598 }
 0xace   :  { %v3601_v5 = vpop.permute.xlu0 %3600 }
 0xad0   :  { %v3607_v38 = vpop.permute.xlu1 %3606 }
 0xad2   :  { %v3609_v57 = vpop.permute.xlu0 %3608 }
 0xad4   :  { %v3639_v36 = vpop.permute.xlu1 %3638 }
 0xad6   :  { %v3641_v49 = vpop.permute.xlu0 %3640 }
 0xad8   :  { %v3647_v51 = vpop.permute.xlu1 %3646 }
 0xada   :  { %v3649_v18 = vpop.permute.xlu0 %3648 }
 0xadc   :  { %v8306_v4 = vpop.permute.xlu1 %3702 }
 0xade   :  { %v8308_v59 = vpop.permute.xlu0 %3704 }
 0xae0   :  { %v8310_v6 = vpop.permute.xlu1 %3694 }
 0xae2   :  { %v8312_v8 = vpop.permute.xlu0 %3696 }
 0xae4   :  { %v8314_v52 = vpop.permute.xlu1 %3742 }
 0xae6   :  { %v8316_v60 = vpop.permute.xlu0 %3744 }
 0xae8   :  { %v8318_v21 = vpop.permute.xlu1 %3734 }
 0xaea   :  { %v8320_v9 = vpop.permute.xlu0 %3736 }
 0xaec   :  { %v3603_v50 = vpop.permute.xlu1 %3602 }
 0xaed   :  { %v3618_v47 = vsel %vm1252_vm3, %v3599_v11, %v3603_v50  ;;  %v3616_v2 = vsel %vm1252_vm3, %v3603_v50, %v3607_v38 }
 0xaee   :  { %v3605_v42 = vpop.permute.xlu0 %3604  ;;  %v3623_v24 = vmul.f32 %v3618_v47, %v9523_v13  ;;  %v3624_v50 = vmul.f32 %v3616_v2, %v9524_v55 }
 0xaef   :  { %v3619_v30 = vsel %vm1252_vm3, %v3601_v5, %v3605_v42  ;;  %v3617_v12 = vsel %vm1252_vm3, %v3605_v42, %v3609_v57 }
 0xaf0   :  { %v3627_v40 = vmul.f32 %v3619_v30, %v9523_v13  ;;  %v3611_v31 = vpop.permute.xlu1 %3610  ;;  %v3628_v48 = vmul.f32 %v3617_v12, %v9524_v55 }
 0xaf1   :  { %v3614_v3 = vsel %vm1252_vm3, %v3607_v38, %v3611_v31  ;;  %v3620_v29 = vsel %vm1252_vm3, %v3611_v31, %v3599_v11 }
 0xaf2   :  { %v8336_v23 = vpack.c.bf16 %v3627_v40, %v3623_v24  ;;  %v3613_v19 = vpop.permute.xlu0 %3612  ;;  %v3622_v26 = vmul.f32 %v3620_v29, %v9525_v25  ;;  %v3625_v41 = vmul.f32 %v3614_v3, %v9526_v37  ;;  %v8355_v24 = vpack.c.bf16 %v3628_v48, %v3624_v50  ;;  %v9527_v40 = vld [vmem:[#allocation10_spill] sm:$0xff] }
 0xaf3   :  { %v3615_v45 = vsel %vm1252_vm3, %v3609_v57, %v3613_v19  ;;  %v3621_v46 = vsel %vm1252_vm3, %v3613_v19, %v3601_v5 }
 0xaf4   :  { %v3626_v11 = vmul.f32 %v3621_v46, %v9525_v25  ;;  %v3629_v47 = vmul.f32 %v3615_v45, %v9526_v37  ;;  %v3643_v38 = vpop.permute.xlu1 %3642  ;;  %3805 = vmatprep.subr.bf16.mxu0 %v8336_v23 }
 0xaf5   :  { %v3658_v42 = vsel %vm1314_vm4, %v3639_v36, %v3643_v38  ;;  %v3656_v45 = vsel %vm1314_vm4, %v3643_v38, %v3647_v51 }
 0xaf6   :  { %v8351_v57 = vpack.c.bf16 %v3626_v11, %v3622_v26  ;;  %v8353_v30 = vpack.c.bf16 %v3629_v47, %v3625_v41  ;;  %v3645_v5 = vpop.permute.xlu0 %3644  ;;  %v3663_v31 = vmul.f32 %v3658_v42, %v9527_v40  ;;  %v9528_v41 = vld [vmem:[#allocation13_spill] sm:$0xff]  ;;  %v9529_v42 = vld [vmem:[#allocation11_spill] sm:$0xff] }
 0xaf7   :  { %v3659_v12 = vsel %vm1314_vm4, %v3641_v49, %v3645_v5  ;;  %v3657_v3 = vsel %vm1314_vm4, %v3645_v5, %v3649_v18  ;;  %v3664_v38 = vmul.f32 %v3656_v45, %v9528_v41 }
 0xaf8   :  { %v3667_v29 = vmul.f32 %v3659_v12, %v9527_v40  ;;  %v3651_v2 = vpop.permute.xlu1 %3650  ;;  %3806 = vmatpush1.bf16.msra.mxu0 %v8351_v57  ;;  %3848 = vmatprep.subr.bf16.mxu1 %v8353_v30  ;;  %v3668_v11 = vmul.f32 %v3657_v3, %v9528_v41  ;;  %v9530_v12 = vld [vmem:[#allocation12_spill] sm:$0xff] }
 0xaf9   :  { %v3654_v19 = vsel %vm1314_vm4, %v3647_v51, %v3651_v2  ;;  %v3660_v48 = vsel %vm1314_vm4, %v3651_v2, %v3639_v36  ;;  %3849 = vmatpush1.bf16.msra.mxu1 %v8355_v24 }
 0xafa   :  { %v8372_v46 = vpack.c.bf16 %v3667_v29, %v3663_v31  ;;  %v3653_v26 = vpop.permute.xlu0 %3652  ;;  %v3662_v5 = vmul.f32 %v3660_v48, %v9529_v42  ;;  %v3665_v36 = vmul.f32 %v3654_v19, %v9530_v12  ;;  %v8392_v29 = vpack.c.bf16 %v3668_v11, %v3664_v38 }
 0xafb   :  { %v3655_v47 = vsel %vm1314_vm4, %v3649_v18, %v3653_v26  ;;  %v3661_v50 = vsel %vm1314_vm4, %v3653_v26, %v3641_v49  ;;  %v9531_v26 = vld [vmem:[#allocation14_spill] sm:$0xff] }
 0xafc   :  { %v3666_v2 = vmul.f32 %v3661_v50, %v9529_v42  ;;  %v3669_v40 = vmul.f32 %v3655_v47, %v9530_v12  ;;  %v3699_v51 = vpop.permute.xlu1 %3698  ;;  %3807 = vmatprep.subr.bf16.mxu0 %v8372_v46 }
 0xafd   :  { %v3712_v18 = vsel %vm1413_vm5, %v3699_v51, %v8306_v4  ;;  %v3714_v45 = vsel %vm1413_vm5, %v8310_v6, %v3699_v51 }
 0xafe   :  { %v8388_v31 = vpack.c.bf16 %v3666_v2, %v3662_v5  ;;  %v8390_v49 = vpack.c.bf16 %v3669_v40, %v3665_v36  ;;  %v3701_v3 = vpop.permute.xlu0 %3700  ;;  %v3719_v47 = vmul.f32 %v3712_v18, %v9531_v26  ;;  %v9532_v36 = vld [vmem:[#allocation15_spill] sm:$0xff] }
 0xaff   :  { %v3713_v19 = vsel %vm1413_vm5, %v3701_v3, %v8308_v59  ;;  %v3715_v48 = vsel %vm1413_vm5, %v8312_v8, %v3701_v3  ;;  %v3718_v18 = vmul.f32 %v3714_v45, %v9532_v36  ;;  %v9533_v3 = vld [vmem:[#allocation16_spill] sm:$0xff] }
 0xb00   :  { %v3723_v40 = vmul.f32 %v3713_v19, %v9531_v26  ;;  %v3707_v50 = vpop.permute.xlu1 %3706  ;;  %3808 = vmatpush1.bf16.msra.mxu0 %v8388_v31  ;;  %3850 = vmatprep.subr.bf16.mxu1 %v8390_v49  ;;  %v3722_v2 = vmul.f32 %v3715_v48, %v9532_v36 }
 0xb01   :  { %v3710_v11 = vsel %vm1413_vm5, %v8306_v4, %v3707_v50  ;;  %v3716_v5 = vsel %vm1413_vm5, %v3707_v50, %v8310_v6  ;;  %3809 = vmatprep.subr.bf16.mxu0 %v8273_v1  ;;  %3851 = vmatpush1.bf16.msra.mxu1 %v8392_v29  ;;  %v9534_v50 = vld [vmem:[#allocation17_spill] sm:$0xff] }
 0xb02   :  { %v8416_v51 = vpack.c.bf16 %v3723_v40, %v3719_v47  ;;  %3852 = vmatprep.subr.bf16.mxu1 %v8275_v0  ;;  %v3709_v38 = vpop.permute.xlu0 %3708  ;;  %v3720_v19 = vmul.f32 %v3710_v11, %v9533_v3  ;;  %v3721_v26 = vmul.f32 %v3716_v5, %v9534_v50 }
 0xb03   :  { %v3711_v4 = vsel %vm1413_vm5, %v8308_v59, %v3709_v38  ;;  %v3717_v6 = vsel %vm1413_vm5, %v3709_v38, %v8312_v8  ;;  %v8439_v8 = vpack.c.bf16 %v3722_v2, %v3718_v18 }
 0xb04   :  { %v3724_v48 = vmul.f32 %v3711_v4, %v9533_v3  ;;  %v3725_v47 = vmul.f32 %v3717_v6, %v9534_v50  ;;  %v3739_v40 = vpop.permute.xlu1 %3738  ;;  %3810 = vmatpush1.bf16.msra.mxu0 %v8269_v32  ;;  %v9535_v4 = vld [vmem:[#allocation19_spill] sm:$0xff]  ;;  %v9536_v3 = vld [vmem:[#allocation18_spill] sm:$0xff] }
 0xb05   :  { %v3752_v45 = vsel %vm1475_vm6, %v3739_v40, %v8314_v52  ;;  %v3754_v59 = vsel %vm1475_vm6, %v8318_v21, %v3739_v40  ;;  %3811 = vmatprep.subr.bf16.mxu0 %v8416_v51  ;;  %3853 = vmatpush1.bf16.msra.mxu1 %v8271_v10 }
 0xb06   :  { %v8441_v11 = vpack.c.bf16 %v3724_v48, %v3720_v19  ;;  %v8443_v5 = vpack.c.bf16 %v3725_v47, %v3721_v26  ;;  %v3741_v38 = vpop.permute.xlu0 %3740  ;;  %v3758_v6 = vmul.f32 %v3754_v59, %v9535_v4  ;;  %v3759_v36 = vmul.f32 %v3752_v45, %v9536_v3 }
 0xb07   :  { %v3753_v50 = vsel %vm1475_vm6, %v3741_v38, %v8316_v60  ;;  %v3755_v40 = vsel %vm1475_vm6, %v8320_v9, %v3741_v38 }
 0xb08   :  { %v3762_v2 = vmul.f32 %v3755_v40, %v9535_v4  ;;  %v3763_v18 = vmul.f32 %v3753_v50, %v9536_v3  ;;  %v3747_v19 = vpop.permute.xlu1 %3746  ;;  %3812 = vmatpush1.bf16.msra.mxu0 %v8439_v8  ;;  %3854 = vmatprep.subr.bf16.mxu1 %v8443_v5  ;;  %v9538_v3 = vld [vmem:[#allocation21_spill] sm:$0xff] }
 0xb09   :  { %v3750_v26 = vsel %vm1475_vm6, %v8314_v52, %v3747_v19  ;;  %v3756_v48 = vsel %vm1475_vm6, %v3747_v19, %v8318_v21  ;;  %3855 = vmatpush1.bf16.msra.mxu1 %v8441_v11  ;;  %v9537_v52 = vld [vmem:[#allocation20_spill] sm:$0xff] }
 0xb0a   :  { %v8464_v47 = vpack.c.bf16 %v3762_v2, %v3758_v6  ;;  %v8466_v45 = vpack.c.bf16 %v3763_v18, %v3759_v36  ;;  %v3749_v50 = vpop.permute.xlu0 %3748  ;;  %v3760_v40 = vmul.f32 %v3750_v26, %v9537_v52  ;;  %v3761_v4 = vmul.f32 %v3756_v48, %v9538_v3  ;;  %v6361_v36 = vld [vmem:[%s9373_s8 + $0x50] sm:$0xff]   ;;  %v6364_v18 = vld [vmem:[%s9373_s8 + $0x68] sm:$0xff]  }
 0xb0b   :  { %v3751_v59 = vsel %vm1475_vm6, %v8316_v60, %v3749_v50  ;;  %v3757_v38 = vsel %vm1475_vm6, %v3749_v50, %v8320_v9  ;;  %v6362_v9 = vld [vmem:[%s9373_s8 + $0x58] sm:$0xff]  }
 0xb0c   :  { %v3764_v21 = vmul.f32 %v3751_v59, %v9537_v52  ;;  %v3765_v6 = vmul.f32 %v3757_v38, %v9538_v3  ;;  %3813 = vmatprep.subr.bf16.mxu0 %v8466_v45  ;;  %v9540_v3 = vld [vmem:[#allocation23_spill] sm:$0xff] }
 0xb0d   :  { %3814 = vmatpush1.bf16.msra.mxu0 %v8464_v47 }
 0xb0e   :  { %v8483_v60 = vpack.c.bf16 %v3764_v21, %v3760_v40  ;;  %v8485_v2 = vpack.c.bf16 %v3765_v6, %v3761_v4  ;;  %3942 = vmatprep.subr.bf16.mxu0 %v8336_v23  ;;  %v6363_v4 = vld [vmem:[%s9373_s8 + $0x60] sm:$0xff]  }
 0xb10   :  { %6061 = vmatmul.mubr.msk.bf16.vlgmr.msra.gmra.mrb[56].mxu0 %vm1548_vm7, %v6361_v36  ;;  %3856 = vmatprep.subr.bf16.mxu1 %v8485_v2 }
 0xb11   :  { %3857 = vmatpush1.bf16.msra.mxu1 %v8483_v60  ;;  %3943 = vmatpush1.bf16.msra.mxu0 %v8351_v57 }
 0xb12   :  { %3944 = vmatprep.subr.bf16.mxu0 %v8372_v46  ;;  %3985 = vmatprep.subr.bf16.mxu1 %v8353_v30 }
 0xb13   :  { %3974 = vmatprep.mubr.bf16.mxu0 %v9499_v61 }
 0xb14   :  { %6062 = vmatmul.mubr.msk.bf16.vlgmr.msra.gmra.mrb[56].mxu1 %vm1548_vm7, %v6361_v36 }
 0xb15   :  { %3945 = vmatpush1.bf16.msra.mxu0 %v8388_v31  ;;  %3986 = vmatpush1.bf16.msra.mxu1 %v8355_v24 }
 0xb16   :  { %3946 = vmatprep.subr.bf16.mxu0 %v8273_v1  ;;  %3987 = vmatprep.subr.bf16.mxu1 %v8390_v49 }
 0xb17   :  { %4017 = vmatprep.mubr.bf16.mxu1 %v9499_v61 }
 0xb19   :  { %3947 = vmatpush1.bf16.msra.mxu0 %v8269_v32  ;;  %3988 = vmatpush1.bf16.msra.mxu1 %v8392_v29 }
 0xb1a   :  { %3948 = vmatprep.subr.bf16.mxu0 %v8416_v51  ;;  %3989 = vmatprep.subr.bf16.mxu1 %v8275_v0 }
 0xb1d   :  { %3949 = vmatpush1.bf16.msra.mxu0 %v8439_v8  ;;  %3990 = vmatpush1.bf16.msra.mxu1 %v8271_v10 }
 0xb1e   :  { %3950 = vmatprep.subr.bf16.mxu0 %v8466_v45  ;;  %3991 = vmatprep.subr.bf16.mxu1 %v8443_v5 }
 0xb21   :  { %3951 = vmatpush1.bf16.msra.mxu0 %v8464_v47  ;;  %3992 = vmatpush1.bf16.msra.mxu1 %v8441_v11 }
 0xb22   :  { %3993 = vmatprep.subr.bf16.mxu1 %v8485_v2  ;;  %4079 = vmatprep.subr.bf16.mxu0 %v8336_v23 }
 0xb24   :  { %6066 = vmatmul.mubr.msk.bf16.vlgmr.msra.gmra.mrb[60].mxu0 %vm1548_vm7, %v6362_v9 }
 0xb25   :  { %3994 = vmatpush1.bf16.msra.mxu1 %v8483_v60  ;;  %4080 = vmatpush1.bf16.msra.mxu0 %v8351_v57 }
 0xb26   :  { %4081 = vmatprep.subr.bf16.mxu0 %v8372_v46  ;;  %4122 = vmatprep.subr.bf16.mxu1 %v8353_v30 }
 0xb27   :  { %4111 = vmatprep.mubr.bf16.mxu0 %v9499_v61 }
 0xb28   :  { %6067 = vmatmul.mubr.msk.bf16.vlgmr.msra.gmra.mrb[60].mxu1 %vm1548_vm7, %v6362_v9 }
 0xb29   :  { %4082 = vmatpush1.bf16.msra.mxu0 %v8388_v31  ;;  %4123 = vmatpush1.bf16.msra.mxu1 %v8355_v24 }
 0xb2a   :  { %4083 = vmatprep.subr.bf16.mxu0 %v8273_v1  ;;  %4124 = vmatprep.subr.bf16.mxu1 %v8390_v49 }
 0xb2b   :  { %4154 = vmatprep.mubr.bf16.mxu1 %v9499_v61 }
 0xb2d   :  { %4084 = vmatpush1.bf16.msra.mxu0 %v8269_v32  ;;  %4125 = vmatpush1.bf16.msra.mxu1 %v8392_v29 }
 0xb2e   :  { %4085 = vmatprep.subr.bf16.mxu0 %v8416_v51  ;;  %4126 = vmatprep.subr.bf16.mxu1 %v8275_v0 }
 0xb31   :  { %4086 = vmatpush1.bf16.msra.mxu0 %v8439_v8  ;;  %4127 = vmatpush1.bf16.msra.mxu1 %v8271_v10 }
 0xb32   :  { %4087 = vmatprep.subr.bf16.mxu0 %v8466_v45  ;;  %4128 = vmatprep.subr.bf16.mxu1 %v8443_v5 }
 0xb35   :  { %4088 = vmatpush1.bf16.msra.mxu0 %v8464_v47  ;;  %4129 = vmatpush1.bf16.msra.mxu1 %v8441_v11 }
 0xb36   :  { %4130 = vmatprep.subr.bf16.mxu1 %v8485_v2  ;;  %4192 = vmatprep.subr.bf16.mxu0 %v8336_v23 }
 0xb38   :  { %6071 = vmatmul.mubr.msk.bf16.vlgmr.msra.gmra.mrb[64].mxu0 %vm1548_vm7, %v6363_v4 }
 0xb39   :  { %4131 = vmatpush1.bf16.msra.mxu1 %v8483_v60  ;;  %4193 = vmatpush1.bf16.msra.mxu0 %v8351_v57 }
 0xb3a   :  { %4194 = vmatprep.subr.bf16.mxu0 %v8372_v46  ;;  %4235 = vmatprep.subr.bf16.mxu1 %v8353_v30 }
 0xb3b   :  { %4224 = vmatprep.mubr.bf16.mxu0 %v9499_v61 }
 0xb3c   :  { %6072 = vmatmul.mubr.msk.bf16.vlgmr.msra.gmra.mrb[64].mxu1 %vm1548_vm7, %v6363_v4 }
 0xb3d   :  { %4195 = vmatpush1.bf16.msra.mxu0 %v8388_v31  ;;  %4236 = vmatpush1.bf16.msra.mxu1 %v8355_v24 }
 0xb3e   :  { %4196 = vmatprep.subr.bf16.mxu0 %v8273_v1  ;;  %4237 = vmatprep.subr.bf16.mxu1 %v8390_v49 }
 0xb3f   :  { %4267 = vmatprep.mubr.bf16.mxu1 %v9499_v61 }
 0xb41   :  { %4197 = vmatpush1.bf16.msra.mxu0 %v8269_v32  ;;  %4238 = vmatpush1.bf16.msra.mxu1 %v8392_v29 }
 0xb42   :  { %4198 = vmatprep.subr.bf16.mxu0 %v8416_v51  ;;  %4239 = vmatprep.subr.bf16.mxu1 %v8275_v0 }
 0xb45   :  { %4199 = vmatpush1.bf16.msra.mxu0 %v8439_v8  ;;  %4240 = vmatpush1.bf16.msra.mxu1 %v8271_v10 }
 0xb46   :  { %4200 = vmatprep.subr.bf16.mxu0 %v8466_v45  ;;  %4241 = vmatprep.subr.bf16.mxu1 %v8443_v5 }
 0xb49   :  { %4201 = vmatpush1.bf16.msra.mxu0 %v8464_v47  ;;  %4242 = vmatpush1.bf16.msra.mxu1 %v8441_v11 }
 0xb4a   :  { %4243 = vmatprep.subr.bf16.mxu1 %v8485_v2  ;;  %4329 = vmatprep.subr.bf16.mxu0 %v8336_v23 }
 0xb4c   :  { %6076 = vmatmul.mubr.msk.bf16.vlgmr.msra.gmra.mrb[68].mxu0 %vm1548_vm7, %v6364_v18 }
 0xb4d   :  { %4244 = vmatpush1.bf16.msra.mxu1 %v8483_v60  ;;  %4330 = vmatpush1.bf16.msra.mxu0 %v8351_v57 }
 0xb4e   :  { %4331 = vmatprep.subr.bf16.mxu0 %v8372_v46  ;;  %4372 = vmatprep.subr.bf16.mxu1 %v8353_v30 }
 0xb4f   :  { %4361 = vmatprep.mubr.bf16.mxu0 %v9499_v61 }
 0xb50   :  { %6077 = vmatmul.mubr.msk.bf16.vlgmr.msra.gmra.mrb[68].mxu1 %vm1548_vm7, %v6364_v18 }
 0xb51   :  { %4332 = vmatpush1.bf16.msra.mxu0 %v8388_v31  ;;  %4373 = vmatpush1.bf16.msra.mxu1 %v8355_v24 }
 0xb52   :  { %4333 = vmatprep.subr.bf16.mxu0 %v8273_v1  ;;  %4374 = vmatprep.subr.bf16.mxu1 %v8390_v49  ;;  %v6365_v1 = vld [vmem:[%s9373_s8 + $0x70] sm:$0xff]  }
 0xb53   :  { %4404 = vmatprep.mubr.bf16.mxu1 %v9499_v61 }
 0xb55   :  { %4334 = vmatpush1.bf16.msra.mxu0 %v8269_v32  ;;  %4375 = vmatpush1.bf16.msra.mxu1 %v8392_v29 }
 0xb56   :  { %4335 = vmatprep.subr.bf16.mxu0 %v8416_v51  ;;  %4376 = vmatprep.subr.bf16.mxu1 %v8275_v0 }
 0xb59   :  { %4336 = vmatpush1.bf16.msra.mxu0 %v8439_v8  ;;  %4377 = vmatpush1.bf16.msra.mxu1 %v8271_v10 }
 0xb5a   :  { %4337 = vmatprep.subr.bf16.mxu0 %v8466_v45  ;;  %4378 = vmatprep.subr.bf16.mxu1 %v8443_v5 }
 0xb5d   :  { %4338 = vmatpush1.bf16.msra.mxu0 %v8464_v47  ;;  %4379 = vmatpush1.bf16.msra.mxu1 %v8441_v11 }
 0xb5e   :  { %4380 = vmatprep.subr.bf16.mxu1 %v8485_v2 }
 0xb60   :  { %6081 = vmatmul.mubr.msk.bf16.vlgmr.msra.gmra.mrb[72].mxu0 %vm1548_vm7, %v6365_v1 }
 0xb61   :  { %4381 = vmatpush1.bf16.msra.mxu1 %v8483_v60  ;;  %4617 = vmatprep.mubr.bf16.mxu0 %v9499_v61 }
 0xb64   :  { %6082 = vmatmul.mubr.msk.bf16.vlgmr.msra.gmra.mrb[72].mxu1 %vm1548_vm7, %v6365_v1 }
 0xb65   :  { %4660 = vmatprep.mubr.bf16.mxu1 %v9499_v61 }
 0xbe3   :  { %v3839_v32 = vpop.f32.mrb[56].mxu0 }
 0xbe4   :  { %3891 = vrot.lane.b32.xlu1 %v3839_v32, %s6396_s16  ;;  %v3841_v10 = vpop.f32.mrb[57].mxu0 }
 0xbe5   :  { %v3843_v0 = vpop.f32.mrb[58].mxu0 }
 0xbe6   :  { %3893 = vrot.lane.b32.xlu0 %v3843_v0, %s6396_s16  ;;  %v3845_v23 = vpop.f32.mrb[59].mxu0 }
 0xbe7   :  { %v3882_v57 = vpop.f32.mrb[56].mxu1 }
 0xbe8   :  { %v3884_v30 = vpop.f32.mrb[57].mxu1  ;;  %3899 = vrot.lane.b32.xlu1 %v3882_v57, %s6396_s16 }
 0xbe9   :  { %v3886_v24 = vpop.f32.mrb[58].mxu1 }
 0xbea   :  { %v3888_v46 = vpop.f32.mrb[59].mxu1  ;;  %3901 = vrot.lane.b32.xlu0 %v3886_v24, %s6396_s16 }
 0xbec   :  { %3895 = vrot.lane.b32.xlu1 %v3841_v10, %s6396_s16 }
 0xbee   :  { %3897 = vrot.lane.b32.xlu0 %v3845_v23, %s6396_s16 }
 0xbf0   :  { %3903 = vrot.lane.b32.xlu1 %v3884_v30, %s6396_s16 }
 0xbf2   :  { %3905 = vrot.lane.b32.xlu0 %v3888_v46, %s6396_s16 }
 0xbf7   :  { %v3976_v31 = vpop.f32.mrb[60].mxu0 }
 0xbf8   :  { %4028 = vrot.lane.b32.xlu1 %v3976_v31, %s6397_s17  ;;  %v3978_v49 = vpop.f32.mrb[61].mxu0 }
 0xbf9   :  { %v3980_v29 = vpop.f32.mrb[62].mxu0 }
 0xbfa   :  { %4030 = vrot.lane.b32.xlu0 %v3980_v29, %s6397_s17  ;;  %v3982_v51 = vpop.f32.mrb[63].mxu0 }
 0xbfb   :  { %v4019_v8 = vpop.f32.mrb[60].mxu1 }
 0xbfc   :  { %v4021_v11 = vpop.f32.mrb[61].mxu1  ;;  %4036 = vrot.lane.b32.xlu1 %v4019_v8, %s6397_s17 }
 0xbfd   :  { %v4023_v5 = vpop.f32.mrb[62].mxu1 }
 0xbfe   :  { %v4025_v19 = vpop.f32.mrb[63].mxu1  ;;  %4038 = vrot.lane.b32.xlu0 %v4023_v5, %s6397_s17 }
 0xc00   :  { %4032 = vrot.lane.b32.xlu1 %v3978_v49, %s6397_s17 }
 0xc02   :  { %4034 = vrot.lane.b32.xlu0 %v3982_v51, %s6397_s17 }
 0xc04   :  { %4040 = vrot.lane.b32.xlu1 %v4021_v11, %s6397_s17 }
 0xc06   :  { %4042 = vrot.lane.b32.xlu0 %v4025_v19, %s6397_s17 }
 0xc0b   :  { %v8617_v26 = vpop.f32.mrb[64].mxu0 }
 0xc0c   :  { %v8619_v48 = vpop.f32.mrb[65].mxu0 }
 0xc0d   :  { %v8621_v47 = vpop.f32.mrb[66].mxu0  ;;  %v4166_v52 = vmul.f32 %v8619_v48, %v9540_v3 }
 0xc0e   :  { %v8623_v45 = vpop.f32.mrb[67].mxu0 }
 0xc0f   :  { %v8625_v50 = vpop.f32.mrb[64].mxu1  ;;  %v4170_v41 = vmul.f32 %v8623_v45, %v9540_v3 }
 0xc10   :  { %v8627_v59 = vpop.f32.mrb[65].mxu1  ;;  %v4167_v37 = vmul.f32 %v8625_v50, %v9518_v7 }
 0xc11   :  { %v8629_v38 = vpop.f32.mrb[66].mxu1 }
 0xc12   :  { %v8631_v40 = vpop.f32.mrb[67].mxu1 }
 0xc1f   :  { %v4226_v21 = vpop.f32.mrb[68].mxu0 }
 0xc20   :  { %4278 = vrot.lane.b32.xlu1 %v4226_v21, %s6398_s18  ;;  %v4228_v6 = vpop.f32.mrb[69].mxu0 }
 0xc21   :  { %v4230_v36 = vpop.f32.mrb[70].mxu0 }
 0xc22   :  { %4280 = vrot.lane.b32.xlu0 %v4230_v36, %s6398_s18  ;;  %v4232_v60 = vpop.f32.mrb[71].mxu0 }
 0xc23   :  { %v4269_v2 = vpop.f32.mrb[68].mxu1 }
 0xc24   :  { %v4271_v9 = vpop.f32.mrb[69].mxu1  ;;  %4286 = vrot.lane.b32.xlu1 %v4269_v2, %s6398_s18 }
 0xc25   :  { %v4273_v4 = vpop.f32.mrb[70].mxu1 }
 0xc26   :  { %v4275_v18 = vpop.f32.mrb[71].mxu1  ;;  %4288 = vrot.lane.b32.xlu0 %v4273_v4, %s6398_s18 }
 0xc28   :  { %4282 = vrot.lane.b32.xlu1 %v4228_v6, %s6398_s18 }
 0xc2a   :  { %4284 = vrot.lane.b32.xlu0 %v4232_v60, %s6398_s18 }
 0xc2c   :  { %4290 = vrot.lane.b32.xlu1 %v4271_v9, %s6398_s18 }
 0xc2e   :  { %4292 = vrot.lane.b32.xlu0 %v4275_v18, %s6398_s18 }
 0xc33   :  { %v4363_v1 = vpop.f32.mrb[72].mxu0 }
 0xc34   :  { %4415 = vrot.lane.b32.xlu1 %v4363_v1, %s6399_s19  ;;  %v4365_v32 = vpop.f32.mrb[73].mxu0 }
 0xc35   :  { %v4367_v10 = vpop.f32.mrb[74].mxu0 }
 0xc36   :  { %4417 = vrot.lane.b32.xlu0 %v4367_v10, %s6399_s19  ;;  %v4369_v0 = vpop.f32.mrb[75].mxu0 }
 0xc37   :  { %v4406_v23 = vpop.f32.mrb[72].mxu1 }
 0xc38   :  { %v4408_v57 = vpop.f32.mrb[73].mxu1  ;;  %4423 = vrot.lane.b32.xlu1 %v4406_v23, %s6399_s19 }
 0xc39   :  { %v4410_v30 = vpop.f32.mrb[74].mxu1 }
 0xc3a   :  { %v4412_v24 = vpop.f32.mrb[75].mxu1  ;;  %4425 = vrot.lane.b32.xlu0 %v4410_v30, %s6399_s19  ;;  %v9539_v30 = vld [vmem:[#allocation22_spill] sm:$0xff] }
 0xc3b   :  { %v8667_v12 = vmul.f32 %v8621_v47, %v9539_v30 }
 0xc3c   :  { %4419 = vrot.lane.b32.xlu1 %v4365_v32, %s6399_s19 }
 0xc3e   :  { %4421 = vrot.lane.b32.xlu0 %v4369_v0, %s6399_s19 }
 0xc40   :  { %4427 = vrot.lane.b32.xlu1 %v4408_v57, %s6399_s19 }
 0xc42   :  { %4429 = vrot.lane.b32.xlu0 %v4412_v24, %s6399_s19  ;;  %v4165_v24 = vmul.f32 %v8617_v26, %v9539_v30 }
 0xc56   :  { %v3892_v46 = vpop.permute.xlu1 %3891 }
 0xc58   :  { %v3894_v31 = vpop.permute.xlu0 %3893 }
 0xc5a   :  { %v3900_v49 = vpop.permute.xlu1 %3899 }
 0xc5c   :  { %v3902_v29 = vpop.permute.xlu0 %3901 }
 0xc5e   :  { %v3896_v51 = vpop.permute.xlu1 %3895 }
 0xc5f   :  { %v3909_v0 = vsel %vm1654_vm8, %v3896_v51, %v3900_v49  ;;  %v3911_v23 = vsel %vm1654_vm8, %v3892_v46, %v3896_v51 }
 0xc60   :  { %v3898_v8 = vpop.permute.xlu0 %3897  ;;  %v3916_v51 = vmul.f32 %v3911_v23, %v7467_v17  ;;  %v3917_v25 = vmul.f32 %v3909_v0, %v7470_v15 }
 0xc61   :  { %v3910_v26 = vsel %vm1654_vm8, %v3898_v8, %v3902_v29  ;;  %v3912_v48 = vsel %vm1654_vm8, %v3894_v31, %v3898_v8 }
 0xc62   :  { %v3904_v11 = vpop.permute.xlu1 %3903  ;;  %v3921_v44 = vmul.f32 %v3910_v26, %v7470_v15 }
 0xc63   :  { %v3907_v45 = vsel %vm1654_vm8, %v3900_v49, %v3904_v11  ;;  %v3913_v8 = vsel %vm1654_vm8, %v3904_v11, %v3892_v46  ;;  %v3920_v11 = vmul.f32 %v3912_v48, %v7467_v17 }
 0xc64   :  { %v3906_v5 = vpop.permute.xlu0 %3905 }
 0xc65   :  { %v3908_v3 = vsel %vm1654_vm8, %v3902_v29, %v3906_v5  ;;  %v3914_v13 = vsel %vm1654_vm8, %v3906_v5, %v3894_v31  ;;  %v3915_v31 = vmul.f32 %v3913_v8, %v7473_v16 }
 0xc6a   :  { %v4029_v19 = vpop.permute.xlu1 %4028 }
 0xc6c   :  { %v4031_v21 = vpop.permute.xlu0 %4030 }
 0xc6e   :  { %v4037_v6 = vpop.permute.xlu1 %4036 }
 0xc70   :  { %v4039_v36 = vpop.permute.xlu0 %4038 }
 0xc72   :  { %v4033_v60 = vpop.permute.xlu1 %4032 }
 0xc73   :  { %v4046_v47 = vsel %vm1813_vm9, %v4033_v60, %v4037_v6  ;;  %v4048_v30 = vsel %vm1813_vm9, %v4029_v19, %v4033_v60 }
 0xc74   :  { %v4035_v2 = vpop.permute.xlu0 %4034 }
 0xc75   :  { %v4047_v50 = vsel %vm1813_vm9, %v4035_v2, %v4039_v36  ;;  %v4049_v0 = vsel %vm1813_vm9, %v4031_v21, %v4035_v2  ;;  %v4053_v2 = vmul.f32 %v4048_v30, %v7479_v39 }
 0xc76   :  { %v4041_v9 = vpop.permute.xlu1 %4040  ;;  %v4057_v29 = vmul.f32 %v4049_v0, %v7479_v39 }
 0xc77   :  { %v4050_v23 = vsel %vm1813_vm9, %v4041_v9, %v4029_v19  ;;  %v4044_v60 = vsel %vm1813_vm9, %v4037_v6, %v4041_v9  ;;  %v4054_v19 = vmul.f32 %v4046_v47, %v9541_v63  ;;  %v4058_v6 = vmul.f32 %v4047_v50, %v9541_v63  ;;  %v9542_v47 = vld [vmem:[#allocation26_spill] sm:$0xff] }
 0xc78   :  { %v4043_v4 = vpop.permute.xlu0 %4042  ;;  %v4052_v9 = vmul.f32 %v4050_v23, %v7489_v58  ;;  %v4055_v5 = vmul.f32 %v4044_v60, %v7492_v62  ;;  %v3918_v54 = vmul.f32 %v3907_v45, %v9542_v47  ;;  %v4061_v0 = vadd.f32 %v4053_v2, %v3916_v51 }
 0xc79   :  { %v4051_v49 = vsel %vm1813_vm9, %v4043_v4, %v4031_v21  ;;  %v4045_v46 = vsel %vm1813_vm9, %v4039_v36, %v4043_v4  ;;  %v3919_v36 = vmul.f32 %v3914_v13, %v7473_v16  ;;  %v3922_v4 = vmul.f32 %v3908_v3, %v9542_v47 }
 0xc7a   :  { %v4056_v30 = vmul.f32 %v4051_v49, %v7489_v58  ;;  %v4059_v48 = vmul.f32 %v4045_v46, %v7492_v62  ;;  %v4062_v23 = vadd.f32 %v4054_v19, %v3917_v25  ;;  %v4065_v60 = vadd.f32 %v4057_v29, %v3920_v11 }
 0xc7b   :  { %v4066_v49 = vadd.f32 %v4058_v6, %v3921_v44  ;;  %v4060_v45 = vadd.f32 %v4052_v9, %v3915_v31  ;;  %v4168_v51 = vmul.f32 %v8627_v59, %v9521_v43  ;;  %v4171_v25 = vmul.f32 %v8629_v38, %v9518_v7 }
 0xc7c   :  { %v4063_v2 = vadd.f32 %v4055_v5, %v3918_v54  ;;  %v4064_v19 = vadd.f32 %v4056_v30, %v3919_v36  ;;  %v4067_v46 = vadd.f32 %v4059_v48, %v3922_v4  ;;  %v4172_v29 = vmul.f32 %v8631_v40, %v9521_v43 }
 0xc7d   :  { %v4174_v6 = vadd.f32 %v4166_v52, %v4061_v0  ;;  %v4175_v9 = vadd.f32 %v4167_v37, %v4062_v23  ;;  %v4173_v38 = vadd.f32 %v4165_v24, %v4060_v45  ;;  %v4178_v54 = vadd.f32 %v4170_v41, %v4065_v60 }
 0xc7e   :  { %v4179_v5 = vadd.f32 %v4171_v25, %v4066_v49  ;;  %v4177_v36 = vadd.f32 %v8667_v12, %v4064_v19  ;;  %v4176_v4 = vadd.f32 %v4168_v51, %v4063_v2  ;;  %v4180_v37 = vadd.f32 %v4172_v29, %v4067_v46 }
 0xc92   :  { %v8649_v18 = vpop.permute.xlu1 %4278 }
 0xc94   :  { %v8651_v1 = vpop.permute.xlu0 %4280 }
 0xc96   :  { %v8653_v32 = vpop.permute.xlu1 %4286 }
 0xc98   :  { %v8655_v10 = vpop.permute.xlu0 %4288 }
 0xc9a   :  { %v4283_v57 = vpop.permute.xlu1 %4282 }
 0xc9b   :  { %v4296_v26 = vsel %vm2106_vm10, %v4283_v57, %v8653_v32  ;;  %v4298_v8 = vsel %vm2106_vm10, %v8649_v18, %v4283_v57 }
 0xc9c   :  { %v4285_v42 = vpop.permute.xlu0 %4284  ;;  %v4302_v47 = vmul.f32 %v4298_v8, %v7538_v20  ;;  %v4303_v57 = vmul.f32 %v4296_v26, %v7541_v22 }
 0xc9d   :  { %v4299_v13 = vsel %vm2106_vm10, %v8651_v1, %v4285_v42  ;;  %v4297_v44 = vsel %vm2106_vm10, %v4285_v42, %v8655_v10 }
 0xc9e   :  { %v4291_v55 = vpop.permute.xlu1 %4290  ;;  %v4306_v59 = vmul.f32 %v4299_v13, %v7538_v20  ;;  %v4307_v42 = vmul.f32 %v4297_v44, %v7541_v22  ;;  %v4310_v40 = vadd.f32 %v4302_v47, %v4173_v38  ;;  %v4311_v48 = vadd.f32 %v4303_v57, %v4174_v6 }
 0xc9f   :  { %v4294_v31 = vsel %vm2106_vm10, %v8653_v32, %v4291_v55  ;;  %v4300_v52 = vsel %vm2106_vm10, %v4291_v55, %v8649_v18 }
 0xca0   :  { %v4293_v21 = vpop.permute.xlu0 %4292  ;;  %v4314_v32 = vadd.f32 %v4306_v59, %v4177_v36  ;;  %v4304_v0 = vmul.f32 %v4294_v31, %v7544_v34  ;;  %v4305_v26 = vmul.f32 %v4300_v52, %v7549_v28  ;;  %v4315_v8 = vadd.f32 %v4307_v42, %v4178_v54 }
 0xca1   :  { %v4295_v41 = vsel %vm2106_vm10, %v8655_v10, %v4293_v21  ;;  %v4301_v55 = vsel %vm2106_vm10, %v4293_v21, %v8651_v1 }
 0xca2   :  { %v4308_v60 = vmul.f32 %v4295_v41, %v7544_v34  ;;  %v4312_v2 = vadd.f32 %v4304_v0, %v4175_v9  ;;  %v4309_v19 = vmul.f32 %v4301_v55, %v7549_v28  ;;  %v4313_v44 = vadd.f32 %v4305_v26, %v4176_v4 }
 0xca4   :  { %v4316_v54 = vadd.f32 %v4308_v60, %v4179_v5  ;;  %v4317_v4 = vadd.f32 %v4309_v19, %v4180_v37 }
 0xca6   :  { %v4416_v50 = vpop.permute.xlu1 %4415 }
 0xca8   :  { %v4418_v3 = vpop.permute.xlu0 %4417 }
 0xcaa   :  { %v4424_v11 = vpop.permute.xlu1 %4423 }
 0xcac   :  { %v4426_v30 = vpop.permute.xlu0 %4425 }
 0xcae   :  { %v4420_v24 = vpop.permute.xlu1 %4419 }
 0xcaf   :  { %v4433_v12 = vsel %vm2265_vm11, %v4420_v24, %v4424_v11  ;;  %v4435_v23 = vsel %vm2265_vm11, %v4416_v50, %v4420_v24 }
 0xcb0   :  { %v4439_v18 = vmul.f32 %v4435_v23, %v7553_v14  ;;  %v4440_v10 = vmul.f32 %v4433_v12, %v7626_v27  ;;  %v4422_v47 = vpop.permute.xlu0 %4421 }
 0xcb1   :  { %v4434_v49 = vsel %vm2265_vm11, %v4422_v47, %v4426_v30  ;;  %v4436_v45 = vsel %vm2265_vm11, %v4418_v3, %v4422_v47 }
 0xcb2   :  { %v4447_v13 = vadd.f32 %v4439_v18, %v4310_v40  ;;  %v4448_v51 = vadd.f32 %v4440_v10, %v4311_v48  ;;  %v4443_v25 = vmul.f32 %v4436_v45, %v7553_v14  ;;  %v4444_v1 = vmul.f32 %v4434_v49, %v7626_v27  ;;  %v4428_v21 = vpop.permute.xlu1 %4427 }
 0xcb3   :  { %v4431_v46 = vsel %vm2265_vm11, %v4424_v11, %v4428_v21  ;;  %v4437_v57 = vsel %vm2265_vm11, %v4428_v21, %v4416_v50 }
 0xcb4   :  { %v4451_v29 = vadd.f32 %v4443_v25, %v4314_v32  ;;  %v4452_v6 = vadd.f32 %v4444_v1, %v4315_v8  ;;  %v4441_v59 = vmul.f32 %v4431_v46, %v7630_v56  ;;  %v4430_v38 = vpop.permute.xlu0 %4429  ;;  %v4442_v31 = vmul.f32 %v4437_v57, %v7637_v35 }
 0xcb5   :  { %v4432_v9 = vsel %vm2265_vm11, %v4426_v30, %v4430_v38  ;;  %v4438_v36 = vsel %vm2265_vm11, %v4430_v38, %v4418_v3  ;;  %v4455_v42 = vadd.f32 %v4448_v51, %v4447_v13  ;;  %v6084_v3 = vld [vmem:[%s9375_s9 + $0x28] sm:$0xff]  ;;  %v6083_v30 = vld [vmem:[%s9375_s9 + $0x20] sm:$0xff] }
 0xcb6   :  { %v4449_v11 = vadd.f32 %v4441_v59, %v4312_v2  ;;  %v4445_v52 = vmul.f32 %v4432_v9, %v7630_v56  ;;  %v4446_v50 = vmul.f32 %v4438_v36, %v7637_v35  ;;  %v4460_v40 = vadd.f32 %v4452_v6, %v4451_v29  ;;  %v6089_v36 = vld [vmem:[%s9377_s12 + $0x20] sm:$0xff] }
 0xcb7   :  { %v4450_v48 = vadd.f32 %v4442_v31, %v4313_v44 }
 0xcb8   :  { %v4453_v41 = vadd.f32 %v4445_v52, %v4316_v54  ;;  %v4456_v24 = vadd.f32 %v4455_v42, %v4449_v11  ;;  %v4454_v5 = vadd.f32 %v4446_v50, %v4317_v4  ;;  %v6090_v42 = vld [vmem:[%s9377_s12 + $0x28] sm:$0xff] }
 0xcba   :  { %v4457_v32 = vadd.f32 %v4456_v24, %v4450_v48  ;;  %v4461_v0 = vadd.f32 %v4460_v40, %v4453_v41 }
 0xcbc   :  { %4458 = vadd.xlane.f32.xlu1 %v4457_v32  ;;  %v4462_v12 = vadd.f32 %v4461_v0, %v4454_v5 }
 0xcbe   :  { %4463 = vadd.xlane.f32.xlu0 %v4462_v12 }
 0xccd   :  { %4517 = vperm.xlu1 %6152, %v6084_v3  }
 0xcd4   :  { %4512 = vperm.xlu0 %6151, %v6083_v30  }
 0xd49   :  { %v4459_v37 = vpop.xlane.xlu1 %4458 }
 0xd4a   :  { %v4465_v23 = vmul.f32 0.001953125, %v4459_v37 }
 0xd4b   :  { %v4464_v26 = vpop.xlane.xlu0 %4463 }
 0xd4c   :  { %v4467_v55 = vsub.f32 %v4447_v13, %v4465_v23  ;;  %v4468_v18 = vsub.f32 %v4448_v51, %v4465_v23  ;;  %v4466_v10 = vmul.f32 0.001953125, %v4464_v26  ;;  %v4469_v47 = vsub.f32 %v4449_v11, %v4465_v23 }
 0xd4d   :  { %v4470_v25 = vsub.f32 %v4450_v48, %v4465_v23  ;;  %v4518_v52 = vpop.permute.xlu1 %4517 }
 0xd4e   :  { %v4471_v8 = vsub.f32 %v4451_v29, %v4466_v10  ;;  %v4472_v60 = vsub.f32 %v4452_v6, %v4466_v10  ;;  %v4473_v49 = vsub.f32 %v4453_v41, %v4466_v10  ;;  %v4475_v45 = vmul.f32 %v4467_v55, %v4467_v55  ;;  %v6085_v29 = vld [vmem:[%s9376_s10 + $0x20] sm:$0xff]  ;;  %v6086_v6 = vld [vmem:[%s9376_s10 + $0x28] sm:$0xff] }
 0xd4f   :  { %v4476_v1 = vmul.f32 %v4468_v18, %v4468_v18  ;;  %v4474_v21 = vsub.f32 %v4454_v5, %v4466_v10  ;;  %v4477_v46 = vmul.f32 %v4469_v47, %v4469_v47  ;;  %v4478_v38 = vmul.f32 %v4470_v25, %v4470_v25 }
 0xd50   :  { %v4479_v2 = vmul.f32 %v4471_v8, %v4471_v8  ;;  %v4480_v19 = vmul.f32 %v4472_v60, %v4472_v60  ;;  %v4481_v44 = vmul.f32 %v4473_v49, %v4473_v49 }
 0xd51   :  { %v4483_v57 = vadd.f32 %v4476_v1, %v4475_v45  ;;  %v4482_v31 = vmul.f32 %v4474_v21, %v4474_v21 }
 0xd52   :  { %v4488_v59 = vadd.f32 %v4480_v19, %v4479_v2 }
 0xd53   :  { %v4484_v54 = vadd.f32 %v4483_v57, %v4477_v46  ;;  %v4513_v11 = vpop.permute.xlu0 %4512 }
 0xd54   :  { %v4489_v13 = vadd.f32 %v4488_v59, %v4481_v44 }
 0xd55   :  { %v4485_v51 = vadd.f32 %v4484_v54, %v4478_v38 }
 0xd56   :  { %v4490_v9 = vadd.f32 %v4489_v13, %v4482_v31 }
 0xd57   :  { %4486 = vadd.xlane.f32.xlu0 %v4485_v51 }
 0xd58   :  { %4491 = vadd.xlane.f32.xlu1 %v4490_v9 }
 0xd69   :  { %4533 = vperm.xlu1 %6152, %v6085_v29  }
 0xd6d   :  { %4538 = vperm.xlu0 %6151, %v6086_v6   ;;  %4569 = vperm.xlu1 %6152, %v6089_v36  }
 0xd71   :  { %4574 = vperm.xlu0 %6151, %v6090_v42  }
 0xde4   :  { %v4487_v50 = vpop.xlane.xlu0 %4486 }
 0xde5   :  { %v4493_v4 = vmul.f32 0.001953125, %v4487_v50  ;;  %v4492_v40 = vpop.xlane.xlu1 %4491 }
 0xde6   :  { %v4494_v48 = vmul.f32 0.001953125, %v4492_v40  ;;  %v6366_v40 = vld [vmem:[%s9378_s11 + $0x10] sm:$0xff]  }
 0xde7   :  { %v4495_v41 = vadd.f32 1e-05, %v4493_v4 }
 0xde8   :  { %v4496_v24 = vadd.f32 1e-05, %v4494_v48 }
 0xde9   :  { %6381 = vrsqrt.f32 %v4495_v41  ;;  %v4534_v46 = vpop.permute.xlu1 %4533 }
 0xdea   :  { %6383 = vrsqrt.f32 %v4496_v24 }
 0xded   :  { %v4570_v48 = vpop.permute.xlu1 %4569 }
 0xdf3   :  { %v6382_v5 = vpop.eup %6381 }
 0xdf4   :  { %v6384_v32 = vpop.eup %6383  ;;  %v4499_v0 = vmul.f32 %v6382_v5, %v4467_v55  ;;  %v4500_v12 = vmul.f32 %v6382_v5, %v4468_v18  ;;  %v4501_v3 = vmul.f32 %v6382_v5, %v4469_v47  ;;  %v4502_v30 = vmul.f32 %v6382_v5, %v4470_v25  ;;  %v4539_v18 = vpop.permute.xlu0 %4538 }
 0xdf5   :  { %v4503_v37 = vmul.f32 %v6384_v32, %v4471_v8  ;;  %v4504_v23 = vmul.f32 %v6384_v32, %v4472_v60  ;;  %v4505_v26 = vmul.f32 %v6384_v32, %v4473_v49  ;;  %v4506_v10 = vmul.f32 %v6384_v32, %v4474_v21 }
 0xdf6   :  { %v4520_v45 = vmul.f32 %v4513_v11, %v4499_v0  ;;  %v4521_v1 = vmul.f32 %v4513_v11, %v4500_v12  ;;  %v4522_v2 = vmul.f32 %v4513_v11, %v4501_v3  ;;  %v4523_v19 = vmul.f32 %v4513_v11, %v4502_v30 }
 0xdf7   :  { %v4524_v57 = vmul.f32 %v4518_v52, %v4503_v37  ;;  %v4525_v44 = vmul.f32 %v4518_v52, %v4504_v23  ;;  %v4526_v59 = vmul.f32 %v4518_v52, %v4505_v26  ;;  %v4527_v38 = vmul.f32 %v4518_v52, %v4506_v10 }
 0xdf8   :  { %v4541_v54 = vadd.f32 %v4534_v46, %v4520_v45  ;;  %v4542_v31 = vadd.f32 %v4534_v46, %v4521_v1  ;;  %v4543_v13 = vadd.f32 %v4534_v46, %v4522_v2  ;;  %v4544_v55 = vadd.f32 %v4534_v46, %v4523_v19  ;;  %v4575_v41 = vpop.permute.xlu0 %4574 }
 0xdf9   :  { %v4545_v47 = vadd.f32 %v4539_v18, %v4524_v57  ;;  %v4546_v25 = vadd.f32 %v4539_v18, %v4525_v44  ;;  %v4547_v8 = vadd.f32 %v4539_v18, %v4526_v59  ;;  %v4548_v60 = vadd.f32 %v4539_v18, %v4527_v38  ;;  %v9543_v44 = vld [vmem:[#allocation3_spill] sm:$0xff] }
 0xdfa   :  { %v4549_v49 = vmax.f32 %v4541_v54, 0.0  ;;  %v4551_v21 = vmax.f32 %v4543_v13, 0.0  ;;  %v4550_v51 = vmax.f32 %v4542_v31, 0.0  ;;  %v4552_v9 = vmax.f32 %v4544_v55, 0.0  ;;  %v9544_v31 = vld [vmem:[#allocation4_spill] sm:$0xff]  ;;  %v9545_v55 = vld [vmem:[#allocation5_spill] sm:$0xff] }
 0xdfb   :  { %v4553_v29 = vmax.f32 %v4545_v47, 0.0  ;;  %v4555_v6 = vmax.f32 %v4547_v8, 0.0  ;;  %v4554_v36 = vmax.f32 %v4546_v25, 0.0  ;;  %v4556_v42 = vmax.f32 %v4548_v60, 0.0 }
 0xdfd   :  { %v4561_v11 = vpack.c.bf16 %v4554_v36, %v4550_v51  ;;  %v4563_v50 = vpack.c.bf16 %v4556_v42, %v4552_v9  ;;  %v4560_v52 = vpack.c.bf16 %v4553_v29, %v4549_v49  ;;  %v4562_v4 = vpack.c.bf16 %v4555_v6, %v4551_v21 }
 0xdff   :  { %4585 = vmatprep.subr.bf16.mxu0 %v4561_v11  ;;  %4628 = vmatprep.subr.bf16.mxu1 %v4563_v50 }
 0xe00   :  { %4586 = vmatpush1.bf16.msra.mxu0 %v4560_v52  ;;  %4629 = vmatpush1.bf16.msra.mxu1 %v4562_v4 }
 0xe03   :  { %6092 = vmatmul.mubr.msk.bf16.vlgmr.msra.gmra.mrb[76].mxu0 %vm2435_vm12, %v6366_v40  ;;  %6093 = vmatmul.mubr.msk.bf16.vlgmr.msra.gmra.mrb[76].mxu1 %vm2435_vm12, %v6366_v40 }
 0xe04   :  { %4910 = vmatprep.mubr.bf16.mxu0 %v9499_v61  ;;  %4953 = vmatprep.mubr.bf16.mxu1 %v9499_v61 }
 0xed6   :  { %v4619_v24 = vpop.f32.mrb[76].mxu0  ;;  %v4662_v5 = vpop.f32.mrb[76].mxu1 }
 0xed7   :  { %v4620_v32 = vadd.f32 %v4619_v24, %v4570_v48  ;;  %v4663_v0 = vadd.f32 %v4662_v5, %v4570_v48  ;;  %v4621_v12 = vpop.f32.mrb[77].mxu0  ;;  %v4664_v3 = vpop.f32.mrb[77].mxu1 }
 0xed8   :  { %v4622_v30 = vadd.f32 %v4621_v12, %v4570_v48  ;;  %v4665_v37 = vadd.f32 %v4664_v3, %v4570_v48  ;;  %v4623_v23 = vpop.f32.mrb[78].mxu0  ;;  %v4666_v26 = vpop.f32.mrb[78].mxu1 }
 0xed9   :  { %v4624_v10 = vadd.f32 %v4623_v23, %v4575_v41  ;;  %v4667_v45 = vadd.f32 %v4666_v26, %v4575_v41  ;;  %v4625_v1 = vpop.f32.mrb[79].mxu0  ;;  %v4668_v2 = vpop.f32.mrb[79].mxu1  ;;  %4671 = vrot.lane.b32.xlu1 %v4620_v32, %s6392_s1  ;;  %v4751_v57 = vmul.f32 %v4620_v32, %v6928_v53  ;;  %v4753_v59 = vmul.f32 %v4663_v0, %v9543_v44 }
 0xeda   :  { %v4626_v19 = vadd.f32 %v4625_v1, %v4575_v41  ;;  %v4669_v46 = vadd.f32 %v4668_v2, %v4575_v41  ;;  %v4752_v13 = vmul.f32 %v4622_v30, %v9544_v31  ;;  %v4754_v18 = vmul.f32 %v4665_v37, %v9545_v55 }
 0xedb   :  { %v4755_v38 = vmul.f32 %v4624_v10, %v6928_v53  ;;  %v4757_v54 = vmul.f32 %v4667_v45, %v9543_v44  ;;  %4673 = vrot.lane.b32.xlu0 %v4624_v10, %s6392_s1 }
 0xedc   :  { %v4756_v47 = vmul.f32 %v4626_v19, %v9544_v31  ;;  %v4758_v25 = vmul.f32 %v4669_v46, %v9545_v55 }
 0xedd   :  { %4679 = vrot.lane.b32.xlu1 %v4663_v0, %s6392_s1  ;;  %v8816_v8 = vpack.c.bf16 %v4755_v38, %v4751_v57  ;;  %v8818_v60 = vpack.c.bf16 %v4757_v54, %v4753_v59  ;;  %v9547_v57 = vld [vmem:[#allocation9_spill] sm:$0xff]  ;;  %v9548_v54 = vld [vmem:[#allocation7_spill] sm:$0xff] }
 0xede   :  { %v8820_v49 = vpack.c.bf16 %v4756_v47, %v4752_v13  ;;  %v8822_v53 = vpack.c.bf16 %v4758_v25, %v4754_v18  ;;  %v9549_v13 = vld [vmem:[#allocation8_spill] sm:$0xff] }
 0xedf   :  { %4681 = vrot.lane.b32.xlu0 %v4667_v45, %s6392_s1 }
 0xee1   :  { %4711 = vrot.lane.b32.xlu1 %v4620_v32, %s6393_s3 }
 0xee3   :  { %4713 = vrot.lane.b32.xlu0 %v4624_v10, %s6393_s3 }
 0xee5   :  { %4719 = vrot.lane.b32.xlu1 %v4663_v0, %s6393_s3 }
 0xee7   :  { %4721 = vrot.lane.b32.xlu0 %v4667_v45, %s6393_s3 }
 0xee9   :  { %4775 = vrot.lane.b32.xlu1 %v4663_v0, %s6394_s29 }
 0xeeb   :  { %4777 = vrot.lane.b32.xlu0 %v4667_v45, %s6394_s29 }
 0xeed   :  { %4767 = vrot.lane.b32.xlu1 %v4620_v32, %s6394_s29 }
 0xeef   :  { %4769 = vrot.lane.b32.xlu0 %v4624_v10, %s6394_s29 }
 0xef1   :  { %4815 = vrot.lane.b32.xlu1 %v4663_v0, %s6395_s30 }
 0xef3   :  { %4817 = vrot.lane.b32.xlu0 %v4667_v45, %s6395_s30 }
 0xef5   :  { %4807 = vrot.lane.b32.xlu1 %v4620_v32, %s6395_s30 }
 0xef7   :  { %4809 = vrot.lane.b32.xlu0 %v4624_v10, %s6395_s30 }
 0xef9   :  { %4675 = vrot.lane.b32.xlu1 %v4622_v30, %s6392_s1 }
 0xefb   :  { %4677 = vrot.lane.b32.xlu0 %v4626_v19, %s6392_s1 }
 0xefd   :  { %4683 = vrot.lane.b32.xlu1 %v4665_v37, %s6392_s1 }
 0xeff   :  { %4685 = vrot.lane.b32.xlu0 %v4669_v46, %s6392_s1 }
 0xf01   :  { %4715 = vrot.lane.b32.xlu1 %v4622_v30, %s6393_s3 }
 0xf03   :  { %4717 = vrot.lane.b32.xlu0 %v4626_v19, %s6393_s3 }
 0xf05   :  { %4723 = vrot.lane.b32.xlu1 %v4665_v37, %s6393_s3 }
 0xf07   :  { %4725 = vrot.lane.b32.xlu0 %v4669_v46, %s6393_s3 }
 0xf09   :  { %4771 = vrot.lane.b32.xlu1 %v4622_v30, %s6394_s29 }
 0xf0b   :  { %4773 = vrot.lane.b32.xlu0 %v4626_v19, %s6394_s29 }
 0xf0d   :  { %4779 = vrot.lane.b32.xlu1 %v4665_v37, %s6394_s29 }
 0xf0f   :  { %4781 = vrot.lane.b32.xlu0 %v4669_v46, %s6394_s29 }
 0xf11   :  { %4811 = vrot.lane.b32.xlu1 %v4622_v30, %s6395_s30  ;;  %v9546_v30 = vld [vmem:[#allocation6_spill] sm:$0xff] }
 0xf13   :  { %4813 = vrot.lane.b32.xlu0 %v4626_v19, %s6395_s30 }
 0xf15   :  { %4819 = vrot.lane.b32.xlu1 %v4665_v37, %s6395_s30 }
 0xf17   :  { %4821 = vrot.lane.b32.xlu0 %v4669_v46, %s6395_s30 }
 0xf4b   :  { %v4672_v21 = vpop.permute.xlu1 %4671 }
 0xf4d   :  { %v4674_v51 = vpop.permute.xlu0 %4673 }
 0xf4f   :  { %v4680_v9 = vpop.permute.xlu1 %4679 }
 0xf51   :  { %v4682_v29 = vpop.permute.xlu0 %4681 }
 0xf53   :  { %v4712_v6 = vpop.permute.xlu1 %4711 }
 0xf55   :  { %v4714_v36 = vpop.permute.xlu0 %4713 }
 0xf57   :  { %v4720_v42 = vpop.permute.xlu1 %4719 }
 0xf59   :  { %v4722_v11 = vpop.permute.xlu0 %4721 }
 0xf5b   :  { %v8853_v50 = vpop.permute.xlu1 %4775 }
 0xf5d   :  { %v8855_v52 = vpop.permute.xlu0 %4777 }
 0xf5f   :  { %v8857_v4 = vpop.permute.xlu1 %4767 }
 0xf61   :  { %v8859_v40 = vpop.permute.xlu0 %4769 }
 0xf63   :  { %v8861_v48 = vpop.permute.xlu1 %4815 }
 0xf65   :  { %v8863_v41 = vpop.permute.xlu0 %4817 }
 0xf67   :  { %v8865_v24 = vpop.permute.xlu1 %4807 }
 0xf69   :  { %v8867_v5 = vpop.permute.xlu0 %4809 }
 0xf6b   :  { %v4676_v32 = vpop.permute.xlu1 %4675 }
 0xf6c   :  { %v4691_v0 = vsel %vm1252_vm3, %v4672_v21, %v4676_v32  ;;  %v4689_v2 = vsel %vm1252_vm3, %v4676_v32, %v4680_v9 }
 0xf6d   :  { %v4678_v12 = vpop.permute.xlu0 %4677  ;;  %v4696_v37 = vmul.f32 %v4691_v0, %v9546_v30 }
 0xf6e   :  { %v4692_v3 = vsel %vm1252_vm3, %v4674_v51, %v4678_v12  ;;  %v4690_v23 = vsel %vm1252_vm3, %v4678_v12, %v4682_v29 }
 0xf6f   :  { %v4700_v26 = vmul.f32 %v4692_v3, %v9546_v30  ;;  %v4684_v10 = vpop.permute.xlu1 %4683  ;;  %v4701_v44 = vmul.f32 %v4690_v23, %v9547_v57  ;;  %v9550_v3 = vld [vmem:[#allocation10_spill] sm:$0xff] }
 0xf70   :  { %v4687_v45 = vsel %vm1252_vm3, %v4680_v9, %v4684_v10  ;;  %v4693_v1 = vsel %vm1252_vm3, %v4684_v10, %v4672_v21  ;;  %v4697_v21 = vmul.f32 %v4689_v2, %v9547_v57  ;;  %v9551_v57 = vld [vmem:[#allocation13_spill] sm:$0xff] }
 0xf71   :  { %v8883_v19 = vpack.c.bf16 %v4700_v26, %v4696_v37  ;;  %v4686_v46 = vpop.permute.xlu0 %4685  ;;  %v4695_v31 = vmul.f32 %v4693_v1, %v9548_v54  ;;  %v4698_v55 = vmul.f32 %v4687_v45, %v9549_v13 }
 0xf72   :  { %v4688_v59 = vsel %vm1252_vm3, %v4682_v29, %v4686_v46  ;;  %v4694_v38 = vsel %vm1252_vm3, %v4686_v46, %v4674_v51  ;;  %v8902_v0 = vpack.c.bf16 %v4701_v44, %v4697_v21 }
 0xf73   :  { %v4699_v18 = vmul.f32 %v4694_v38, %v9548_v54  ;;  %v4702_v47 = vmul.f32 %v4688_v59, %v9549_v13  ;;  %v4716_v25 = vpop.permute.xlu1 %4715  ;;  %4878 = vmatprep.subr.bf16.mxu0 %v8883_v19  ;;  %v9552_v54 = vld [vmem:[#allocation11_spill] sm:$0xff]  ;;  %v9553_v13 = vld [vmem:[#allocation12_spill] sm:$0xff] }
 0xf74   :  { %v4731_v9 = vsel %vm1314_vm4, %v4712_v6, %v4716_v25  ;;  %v4729_v1 = vsel %vm1314_vm4, %v4716_v25, %v4720_v42 }
 0xf75   :  { %v8898_v29 = vpack.c.bf16 %v4699_v18, %v4695_v31  ;;  %v8900_v32 = vpack.c.bf16 %v4702_v47, %v4698_v55  ;;  %v4718_v51 = vpop.permute.xlu0 %4717  ;;  %v4736_v30 = vmul.f32 %v4731_v9, %v9550_v3  ;;  %v4737_v47 = vmul.f32 %v4729_v1, %v9551_v57  ;;  %v9555_v1 = vld [vmem:[#allocation15_spill] sm:$0xff] }
 0xf76   :  { %v4732_v12 = vsel %vm1314_vm4, %v4714_v36, %v4718_v51  ;;  %v4730_v37 = vsel %vm1314_vm4, %v4718_v51, %v4722_v11 }
 0xf77   :  { %v4740_v23 = vmul.f32 %v4732_v12, %v9550_v3  ;;  %v4724_v26 = vpop.permute.xlu1 %4723  ;;  %4879 = vmatpush1.bf16.msra.mxu0 %v8898_v29  ;;  %4921 = vmatprep.subr.bf16.mxu1 %v8900_v32  ;;  %v4741_v44 = vmul.f32 %v4730_v37, %v9551_v57 }
 0xf78   :  { %v4727_v10 = vsel %vm1314_vm4, %v4720_v42, %v4724_v26  ;;  %v4733_v45 = vsel %vm1314_vm4, %v4724_v26, %v4712_v6  ;;  %4922 = vmatpush1.bf16.msra.mxu1 %v8902_v0 }
 0xf79   :  { %v8919_v2 = vpack.c.bf16 %v4740_v23, %v4736_v30  ;;  %v4726_v46 = vpop.permute.xlu0 %4725  ;;  %v4735_v31 = vmul.f32 %v4733_v45, %v9552_v54  ;;  %v4738_v6 = vmul.f32 %v4727_v10, %v9553_v13  ;;  %v8939_v9 = vpack.c.bf16 %v4741_v44, %v4737_v47  ;;  %v9554_v30 = vld [vmem:[#allocation14_spill] sm:$0xff] }
 0xf7a   :  { %v4728_v59 = vsel %vm1314_vm4, %v4722_v11, %v4726_v46  ;;  %v4734_v38 = vsel %vm1314_vm4, %v4726_v46, %v4714_v36 }
 0xf7b   :  { %v4739_v55 = vmul.f32 %v4734_v38, %v9552_v54  ;;  %v4742_v18 = vmul.f32 %v4728_v59, %v9553_v13  ;;  %v4772_v42 = vpop.permute.xlu1 %4771  ;;  %4880 = vmatprep.subr.bf16.mxu0 %v8919_v2  ;;  %v9556_v38 = vld [vmem:[#allocation16_spill] sm:$0xff] }
 0xf7c   :  { %v4785_v11 = vsel %vm1413_vm5, %v4772_v42, %v8853_v50  ;;  %v4787_v3 = vsel %vm1413_vm5, %v8857_v4, %v4772_v42 }
 0xf7d   :  { %v8935_v25 = vpack.c.bf16 %v4739_v55, %v4735_v31  ;;  %v8937_v36 = vpack.c.bf16 %v4742_v18, %v4738_v6  ;;  %v4774_v21 = vpop.permute.xlu0 %4773  ;;  %v4792_v37 = vmul.f32 %v4785_v11, %v9554_v30  ;;  %v4791_v59 = vmul.f32 %v4787_v3, %v9555_v1  ;;  %v9557_v31 = vld [vmem:[#allocation17_spill] sm:$0xff] }
 0xf7e   :  { %v4786_v51 = vsel %vm1413_vm5, %v4774_v21, %v8855_v52  ;;  %v4788_v12 = vsel %vm1413_vm5, %v8859_v40, %v4774_v21 }
 0xf7f   :  { %v4796_v23 = vmul.f32 %v4786_v51, %v9554_v30  ;;  %v4780_v26 = vpop.permute.xlu1 %4779  ;;  %4881 = vmatpush1.bf16.msra.mxu0 %v8935_v25  ;;  %4923 = vmatprep.subr.bf16.mxu1 %v8937_v36  ;;  %v4795_v46 = vmul.f32 %v4788_v12, %v9555_v1  ;;  %v9558_v51 = vld [vmem:[#allocation19_spill] sm:$0xff] }
 0xf80   :  { %v4783_v10 = vsel %vm1413_vm5, %v8853_v50, %v4780_v26  ;;  %v4789_v45 = vsel %vm1413_vm5, %v4780_v26, %v8857_v4  ;;  %4882 = vmatprep.subr.bf16.mxu0 %v8820_v49  ;;  %4924 = vmatpush1.bf16.msra.mxu1 %v8939_v9 }
 0xf81   :  { %v8963_v57 = vpack.c.bf16 %v4796_v23, %v4792_v37  ;;  %4925 = vmatprep.subr.bf16.mxu1 %v8822_v53  ;;  %v4782_v44 = vpop.permute.xlu0 %4781  ;;  %v4793_v54 = vmul.f32 %v4783_v10, %v9556_v38  ;;  %v4794_v13 = vmul.f32 %v4789_v45, %v9557_v31  ;;  %v9559_v37 = vld [vmem:[#allocation18_spill] sm:$0xff] }
 0xf82   :  { %v4784_v50 = vsel %vm1413_vm5, %v8855_v52, %v4782_v44  ;;  %v4790_v4 = vsel %vm1413_vm5, %v4782_v44, %v8859_v40  ;;  %v8986_v40 = vpack.c.bf16 %v4795_v46, %v4791_v59 }
 0xf83   :  { %v4797_v6 = vmul.f32 %v4784_v50, %v9556_v38  ;;  %v4798_v55 = vmul.f32 %v4790_v4, %v9557_v31  ;;  %v4812_v18 = vpop.permute.xlu1 %4811  ;;  %4883 = vmatpush1.bf16.msra.mxu0 %v8816_v8  ;;  %v9561_v31 = vld [vmem:[#allocation21_spill] sm:$0xff] }
 0xf84   :  { %v4825_v42 = vsel %vm1475_vm6, %v4812_v18, %v8861_v48  ;;  %v4827_v52 = vsel %vm1475_vm6, %v8865_v24, %v4812_v18  ;;  %4884 = vmatprep.subr.bf16.mxu0 %v8963_v57  ;;  %4926 = vmatpush1.bf16.msra.mxu1 %v8818_v60 }
 0xf85   :  { %v8988_v47 = vpack.c.bf16 %v4797_v6, %v4793_v54  ;;  %v8990_v11 = vpack.c.bf16 %v4798_v55, %v4794_v13  ;;  %v4814_v21 = vpop.permute.xlu0 %4813  ;;  %v4831_v12 = vmul.f32 %v4827_v52, %v9558_v51  ;;  %v4832_v23 = vmul.f32 %v4825_v42, %v9559_v37  ;;  %v6367_v55 = vld [vmem:[%s9373_s8 + $0x78] sm:$0xff]   ;;  %v6369_v42 = vld [vmem:[%s9373_s8 + $0x88] sm:$0xff]   ;;  %v6370_v52 = vld [vmem:[%s9373_s8 + $0x90] sm:$0xff]  }
 0xf86   :  { %v4826_v3 = vsel %vm1475_vm6, %v4814_v21, %v8863_v41  ;;  %v4828_v30 = vsel %vm1475_vm6, %v8867_v5, %v4814_v21 }
 0xf87   :  { %v4835_v26 = vmul.f32 %v4828_v30, %v9558_v51  ;;  %v4836_v10 = vmul.f32 %v4826_v3, %v9559_v37  ;;  %v4820_v45 = vpop.permute.xlu1 %4819  ;;  %4885 = vmatpush1.bf16.msra.mxu0 %v8986_v40  ;;  %4927 = vmatprep.subr.bf16.mxu1 %v8990_v11 }
 0xf88   :  { %v4823_v1 = vsel %vm1475_vm6, %v8861_v48, %v4820_v45  ;;  %v4829_v46 = vsel %vm1475_vm6, %v4820_v45, %v8865_v24  ;;  %4928 = vmatpush1.bf16.msra.mxu1 %v8988_v47  ;;  %v9560_v48 = vld [vmem:[#allocation20_spill] sm:$0xff] }
 0xf89   :  { %v9011_v44 = vpack.c.bf16 %v4835_v26, %v4831_v12  ;;  %v9013_v59 = vpack.c.bf16 %v4836_v10, %v4832_v23  ;;  %v4822_v50 = vpop.permute.xlu0 %4821  ;;  %v4833_v54 = vmul.f32 %v4823_v1, %v9560_v48  ;;  %v4834_v13 = vmul.f32 %v4829_v46, %v9561_v31 }
 0xf8a   :  { %v4824_v4 = vsel %vm1475_vm6, %v8863_v41, %v4822_v50  ;;  %v4830_v38 = vsel %vm1475_vm6, %v4822_v50, %v8867_v5  ;;  %v6368_v5 = vld [vmem:[%s9373_s8 + $0x80] sm:$0xff]  }
 0xf8b   :  { %v4837_v24 = vmul.f32 %v4824_v4, %v9560_v48  ;;  %v4838_v6 = vmul.f32 %v4830_v38, %v9561_v31  ;;  %4886 = vmatprep.subr.bf16.mxu0 %v9013_v59 }
 0xf8c   :  { %4887 = vmatpush1.bf16.msra.mxu0 %v9011_v44 }
 0xf8d   :  { %v9030_v41 = vpack.c.bf16 %v4837_v24, %v4833_v54  ;;  %v9032_v18 = vpack.c.bf16 %v4838_v6, %v4834_v13  ;;  %5015 = vmatprep.subr.bf16.mxu0 %v8883_v19 }
 0xf8f   :  { %6097 = vmatmul.mubr.msk.bf16.vlgmr.msra.gmra.mrb[80].mxu0 %vm1548_vm7, %v6367_v55  ;;  %4929 = vmatprep.subr.bf16.mxu1 %v9032_v18 }
 0xf90   :  { %4930 = vmatpush1.bf16.msra.mxu1 %v9030_v41  ;;  %5016 = vmatpush1.bf16.msra.mxu0 %v8898_v29 }
 0xf91   :  { %5017 = vmatprep.subr.bf16.mxu0 %v8919_v2  ;;  %5058 = vmatprep.subr.bf16.mxu1 %v8900_v32 }
 0xf92   :  { %5047 = vmatprep.mubr.bf16.mxu0 %v9499_v61 }
 0xf93   :  { %6098 = vmatmul.mubr.msk.bf16.vlgmr.msra.gmra.mrb[80].mxu1 %vm1548_vm7, %v6367_v55 }
 0xf94   :  { %5018 = vmatpush1.bf16.msra.mxu0 %v8935_v25  ;;  %5059 = vmatpush1.bf16.msra.mxu1 %v8902_v0 }
 0xf95   :  { %5019 = vmatprep.subr.bf16.mxu0 %v8820_v49  ;;  %5060 = vmatprep.subr.bf16.mxu1 %v8937_v36 }
 0xf96   :  { %5090 = vmatprep.mubr.bf16.mxu1 %v9499_v61 }
 0xf98   :  { %5020 = vmatpush1.bf16.msra.mxu0 %v8816_v8  ;;  %5061 = vmatpush1.bf16.msra.mxu1 %v8939_v9 }
 0xf99   :  { %5021 = vmatprep.subr.bf16.mxu0 %v8963_v57  ;;  %5062 = vmatprep.subr.bf16.mxu1 %v8822_v53 }
 0xf9c   :  { %5022 = vmatpush1.bf16.msra.mxu0 %v8986_v40  ;;  %5063 = vmatpush1.bf16.msra.mxu1 %v8818_v60 }
 0xf9d   :  { %5023 = vmatprep.subr.bf16.mxu0 %v9013_v59  ;;  %5064 = vmatprep.subr.bf16.mxu1 %v8990_v11 }
 0xfa0   :  { %5024 = vmatpush1.bf16.msra.mxu0 %v9011_v44  ;;  %5065 = vmatpush1.bf16.msra.mxu1 %v8988_v47 }
 0xfa1   :  { %5066 = vmatprep.subr.bf16.mxu1 %v9032_v18  ;;  %5152 = vmatprep.subr.bf16.mxu0 %v8883_v19 }
 0xfa3   :  { %6102 = vmatmul.mubr.msk.bf16.vlgmr.msra.gmra.mrb[84].mxu0 %vm1548_vm7, %v6368_v5 }
 0xfa4   :  { %5067 = vmatpush1.bf16.msra.mxu1 %v9030_v41  ;;  %5153 = vmatpush1.bf16.msra.mxu0 %v8898_v29 }
 0xfa5   :  { %5154 = vmatprep.subr.bf16.mxu0 %v8919_v2  ;;  %5195 = vmatprep.subr.bf16.mxu1 %v8900_v32 }
 0xfa6   :  { %5184 = vmatprep.mubr.bf16.mxu0 %v9499_v61 }
 0xfa7   :  { %6103 = vmatmul.mubr.msk.bf16.vlgmr.msra.gmra.mrb[84].mxu1 %vm1548_vm7, %v6368_v5 }
 0xfa8   :  { %5155 = vmatpush1.bf16.msra.mxu0 %v8935_v25  ;;  %5196 = vmatpush1.bf16.msra.mxu1 %v8902_v0 }
 0xfa9   :  { %5156 = vmatprep.subr.bf16.mxu0 %v8820_v49  ;;  %5197 = vmatprep.subr.bf16.mxu1 %v8937_v36 }
 0xfaa   :  { %5227 = vmatprep.mubr.bf16.mxu1 %v9499_v61 }
 0xfac   :  { %5157 = vmatpush1.bf16.msra.mxu0 %v8816_v8  ;;  %5198 = vmatpush1.bf16.msra.mxu1 %v8939_v9 }
 0xfad   :  { %5158 = vmatprep.subr.bf16.mxu0 %v8963_v57  ;;  %5199 = vmatprep.subr.bf16.mxu1 %v8822_v53 }
 0xfb0   :  { %5159 = vmatpush1.bf16.msra.mxu0 %v8986_v40  ;;  %5200 = vmatpush1.bf16.msra.mxu1 %v8818_v60 }
 0xfb1   :  { %5160 = vmatprep.subr.bf16.mxu0 %v9013_v59  ;;  %5201 = vmatprep.subr.bf16.mxu1 %v8990_v11 }
 0xfb4   :  { %5161 = vmatpush1.bf16.msra.mxu0 %v9011_v44  ;;  %5202 = vmatpush1.bf16.msra.mxu1 %v8988_v47 }
 0xfb5   :  { %5203 = vmatprep.subr.bf16.mxu1 %v9032_v18  ;;  %5265 = vmatprep.subr.bf16.mxu0 %v8883_v19 }
 0xfb7   :  { %6107 = vmatmul.mubr.msk.bf16.vlgmr.msra.gmra.mrb[88].mxu0 %vm1548_vm7, %v6369_v42 }
 0xfb8   :  { %5204 = vmatpush1.bf16.msra.mxu1 %v9030_v41  ;;  %5266 = vmatpush1.bf16.msra.mxu0 %v8898_v29 }
 0xfb9   :  { %5267 = vmatprep.subr.bf16.mxu0 %v8919_v2  ;;  %5308 = vmatprep.subr.bf16.mxu1 %v8900_v32 }
 0xfba   :  { %5297 = vmatprep.mubr.bf16.mxu0 %v9499_v61 }
 0xfbb   :  { %6108 = vmatmul.mubr.msk.bf16.vlgmr.msra.gmra.mrb[88].mxu1 %vm1548_vm7, %v6369_v42 }
 0xfbc   :  { %5268 = vmatpush1.bf16.msra.mxu0 %v8935_v25  ;;  %5309 = vmatpush1.bf16.msra.mxu1 %v8902_v0 }
 0xfbd   :  { %5269 = vmatprep.subr.bf16.mxu0 %v8820_v49  ;;  %5310 = vmatprep.subr.bf16.mxu1 %v8937_v36 }
 0xfbe   :  { %5340 = vmatprep.mubr.bf16.mxu1 %v9499_v61 }
 0xfc0   :  { %5270 = vmatpush1.bf16.msra.mxu0 %v8816_v8  ;;  %5311 = vmatpush1.bf16.msra.mxu1 %v8939_v9 }
 0xfc1   :  { %5271 = vmatprep.subr.bf16.mxu0 %v8963_v57  ;;  %5312 = vmatprep.subr.bf16.mxu1 %v8822_v53 }
 0xfc4   :  { %5272 = vmatpush1.bf16.msra.mxu0 %v8986_v40  ;;  %5313 = vmatpush1.bf16.msra.mxu1 %v8818_v60 }
 0xfc5   :  { %5273 = vmatprep.subr.bf16.mxu0 %v9013_v59  ;;  %5314 = vmatprep.subr.bf16.mxu1 %v8990_v11 }
 0xfc8   :  { %5274 = vmatpush1.bf16.msra.mxu0 %v9011_v44  ;;  %5315 = vmatpush1.bf16.msra.mxu1 %v8988_v47 }
 0xfc9   :  { %5316 = vmatprep.subr.bf16.mxu1 %v9032_v18  ;;  %5402 = vmatprep.subr.bf16.mxu0 %v8883_v19 }
 0xfcb   :  { %6112 = vmatmul.mubr.msk.bf16.vlgmr.msra.gmra.mrb[92].mxu0 %vm1548_vm7, %v6370_v52 }
 0xfcc   :  { %5317 = vmatpush1.bf16.msra.mxu1 %v9030_v41  ;;  %5403 = vmatpush1.bf16.msra.mxu0 %v8898_v29 }
 0xfcd   :  { %5404 = vmatprep.subr.bf16.mxu0 %v8919_v2  ;;  %5445 = vmatprep.subr.bf16.mxu1 %v8900_v32 }
 0xfce   :  { %5434 = vmatprep.mubr.bf16.mxu0 %v9499_v61 }
 0xfcf   :  { %6113 = vmatmul.mubr.msk.bf16.vlgmr.msra.gmra.mrb[92].mxu1 %vm1548_vm7, %v6370_v52 }
 0xfd0   :  { %5405 = vmatpush1.bf16.msra.mxu0 %v8935_v25  ;;  %5446 = vmatpush1.bf16.msra.mxu1 %v8902_v0 }
 0xfd1   :  { %5406 = vmatprep.subr.bf16.mxu0 %v8820_v49  ;;  %5447 = vmatprep.subr.bf16.mxu1 %v8937_v36  ;;  %v6371_v49 = vld [vmem:[%s9373_s8 + $0x98] sm:$0xff]  }
 0xfd2   :  { %5477 = vmatprep.mubr.bf16.mxu1 %v9499_v61 }
 0xfd4   :  { %5407 = vmatpush1.bf16.msra.mxu0 %v8816_v8  ;;  %5448 = vmatpush1.bf16.msra.mxu1 %v8939_v9 }
 0xfd5   :  { %5408 = vmatprep.subr.bf16.mxu0 %v8963_v57  ;;  %5449 = vmatprep.subr.bf16.mxu1 %v8822_v53 }
 0xfd8   :  { %5409 = vmatpush1.bf16.msra.mxu0 %v8986_v40  ;;  %5450 = vmatpush1.bf16.msra.mxu1 %v8818_v60 }
 0xfd9   :  { %5410 = vmatprep.subr.bf16.mxu0 %v9013_v59  ;;  %5451 = vmatprep.subr.bf16.mxu1 %v8990_v11 }
 0xfdc   :  { %5411 = vmatpush1.bf16.msra.mxu0 %v9011_v44  ;;  %5452 = vmatpush1.bf16.msra.mxu1 %v8988_v47 }
 0xfdd   :  { %5453 = vmatprep.subr.bf16.mxu1 %v9032_v18 }
 0xfdf   :  { %6117 = vmatmul.mubr.msk.bf16.vlgmr.msra.gmra.mrb[96].mxu0 %vm1548_vm7, %v6371_v49 }
 0xfe0   :  { %5454 = vmatpush1.bf16.msra.mxu1 %v9030_v41  ;;  %5690 = vmatprep.mubr.bf16.mxu0 %v9499_v61 }
 0xfe3   :  { %6118 = vmatmul.mubr.msk.bf16.vlgmr.msra.gmra.mrb[96].mxu1 %vm1548_vm7, %v6371_v49 }
 0xfe4   :  { %5733 = vmatprep.mubr.bf16.mxu1 %v9499_v61 }
0x1062   :  { %v4912_v8 = vpop.f32.mrb[80].mxu0 }
0x1063   :  { %4964 = vrot.lane.b32.xlu1 %v4912_v8, %s6396_s16  ;;  %v4914_v60 = vpop.f32.mrb[81].mxu0 }
0x1064   :  { %v4916_v53 = vpop.f32.mrb[82].mxu0 }
0x1065   :  { %4966 = vrot.lane.b32.xlu0 %v4916_v53, %s6396_s16  ;;  %v4918_v19 = vpop.f32.mrb[83].mxu0 }
0x1066   :  { %v4955_v29 = vpop.f32.mrb[80].mxu1 }
0x1067   :  { %v4957_v32 = vpop.f32.mrb[81].mxu1  ;;  %4972 = vrot.lane.b32.xlu1 %v4955_v29, %s6396_s16 }
0x1068   :  { %v4959_v0 = vpop.f32.mrb[82].mxu1 }
0x1069   :  { %v4961_v2 = vpop.f32.mrb[83].mxu1  ;;  %4974 = vrot.lane.b32.xlu0 %v4959_v0, %s6396_s16 }
0x106b   :  { %4968 = vrot.lane.b32.xlu1 %v4914_v60, %s6396_s16 }
0x106d   :  { %4970 = vrot.lane.b32.xlu0 %v4918_v19, %s6396_s16 }
0x106f   :  { %4976 = vrot.lane.b32.xlu1 %v4957_v32, %s6396_s16 }
0x1071   :  { %4978 = vrot.lane.b32.xlu0 %v4961_v2, %s6396_s16 }
0x1076   :  { %v5049_v25 = vpop.f32.mrb[84].mxu0 }
0x1077   :  { %5101 = vrot.lane.b32.xlu1 %v5049_v25, %s6397_s17  ;;  %v5051_v36 = vpop.f32.mrb[85].mxu0 }
0x1078   :  { %v5053_v9 = vpop.f32.mrb[86].mxu0 }
0x1079   :  { %5103 = vrot.lane.b32.xlu0 %v5053_v9, %s6397_s17  ;;  %v5055_v57 = vpop.f32.mrb[87].mxu0 }
0x107a   :  { %v5092_v40 = vpop.f32.mrb[84].mxu1 }
0x107b   :  { %v5094_v47 = vpop.f32.mrb[85].mxu1  ;;  %5109 = vrot.lane.b32.xlu1 %v5092_v40, %s6397_s17 }
0x107c   :  { %v5096_v11 = vpop.f32.mrb[86].mxu1 }
0x107d   :  { %v5098_v21 = vpop.f32.mrb[87].mxu1  ;;  %5111 = vrot.lane.b32.xlu0 %v5096_v11, %s6397_s17 }
0x107f   :  { %5105 = vrot.lane.b32.xlu1 %v5051_v36, %s6397_s17 }
0x1081   :  { %5107 = vrot.lane.b32.xlu0 %v5055_v57, %s6397_s17 }
0x1083   :  { %5113 = vrot.lane.b32.xlu1 %v5094_v47, %s6397_s17 }
0x1085   :  { %5115 = vrot.lane.b32.xlu0 %v5098_v21, %s6397_s17 }
0x108a   :  { %v9164_v51 = vpop.f32.mrb[88].mxu0 }
0x108b   :  { %v9166_v12 = vpop.f32.mrb[89].mxu0 }
0x108c   :  { %v9168_v3 = vpop.f32.mrb[90].mxu0 }
0x108d   :  { %v9170_v30 = vpop.f32.mrb[91].mxu0 }
0x108e   :  { %v9172_v37 = vpop.f32.mrb[88].mxu1 }
0x108f   :  { %v9174_v23 = vpop.f32.mrb[89].mxu1 }
0x1090   :  { %v9176_v26 = vpop.f32.mrb[90].mxu1 }
0x1091   :  { %v9178_v10 = vpop.f32.mrb[91].mxu1 }
0x109e   :  { %v5299_v45 = vpop.f32.mrb[92].mxu0 }
0x109f   :  { %5351 = vrot.lane.b32.xlu1 %v5299_v45, %s6398_s18  ;;  %v5301_v1 = vpop.f32.mrb[93].mxu0 }
0x10a0   :  { %v5303_v46 = vpop.f32.mrb[94].mxu0 }
0x10a1   :  { %5353 = vrot.lane.b32.xlu0 %v5303_v46, %s6398_s18  ;;  %v5305_v44 = vpop.f32.mrb[95].mxu0  ;;  %v9562_v46 = vld [vmem:[#allocation22_spill] sm:$0xff] }
0x10a2   :  { %v5342_v59 = vpop.f32.mrb[92].mxu1 }
0x10a3   :  { %v5344_v50 = vpop.f32.mrb[93].mxu1  ;;  %5359 = vrot.lane.b32.xlu1 %v5342_v59, %s6398_s18  ;;  %v9563_v59 = vld [vmem:[#allocation23_spill] sm:$0xff] }
0x10a4   :  { %v5346_v4 = vpop.f32.mrb[94].mxu1 }
0x10a5   :  { %v5348_v38 = vpop.f32.mrb[95].mxu1  ;;  %5361 = vrot.lane.b32.xlu0 %v5346_v4, %s6398_s18  ;;  %v9214_v4 = vmul.f32 %v9168_v3, %v9562_v46 }
0x10a7   :  { %5355 = vrot.lane.b32.xlu1 %v5301_v1, %s6398_s18 }
0x10a9   :  { %5357 = vrot.lane.b32.xlu0 %v5305_v44, %s6398_s18  ;;  %v5238_v44 = vmul.f32 %v9164_v51, %v9562_v46 }
0x10ab   :  { %5363 = vrot.lane.b32.xlu1 %v5344_v50, %s6398_s18  ;;  %v5239_v50 = vmul.f32 %v9166_v12, %v9563_v59 }
0x10ad   :  { %5365 = vrot.lane.b32.xlu0 %v5348_v38, %s6398_s18 }
0x10b2   :  { %v5436_v48 = vpop.f32.mrb[96].mxu0 }
0x10b3   :  { %5488 = vrot.lane.b32.xlu1 %v5436_v48, %s6399_s19  ;;  %v5438_v54 = vpop.f32.mrb[97].mxu0  ;;  %v5243_v48 = vmul.f32 %v9170_v30, %v9563_v59  ;;  %v9564_v59 = vld [vmem:[#allocation26_spill] sm:$0xff] }
0x10b4   :  { %v5440_v31 = vpop.f32.mrb[98].mxu0 }
0x10b5   :  { %5490 = vrot.lane.b32.xlu0 %v5440_v31, %s6399_s19  ;;  %v5442_v13 = vpop.f32.mrb[99].mxu0 }
0x10b6   :  { %v5479_v24 = vpop.f32.mrb[96].mxu1 }
0x10b7   :  { %v5481_v6 = vpop.f32.mrb[97].mxu1  ;;  %5496 = vrot.lane.b32.xlu1 %v5479_v24, %s6399_s19 }
0x10b8   :  { %v5483_v55 = vpop.f32.mrb[98].mxu1 }
0x10b9   :  { %v5485_v41 = vpop.f32.mrb[99].mxu1  ;;  %5498 = vrot.lane.b32.xlu0 %v5483_v55, %s6399_s19 }
0x10bb   :  { %5492 = vrot.lane.b32.xlu1 %v5438_v54, %s6399_s19  ;;  %v5240_v54 = vmul.f32 %v9172_v37, %v9518_v7 }
0x10bd   :  { %5494 = vrot.lane.b32.xlu0 %v5442_v13, %s6399_s19 }
0x10bf   :  { %5500 = vrot.lane.b32.xlu1 %v5481_v6, %s6399_s19 }
0x10c1   :  { %5502 = vrot.lane.b32.xlu0 %v5485_v41, %s6399_s19 }
0x10d5   :  { %v4965_v18 = vpop.permute.xlu1 %4964 }
0x10d7   :  { %v4967_v5 = vpop.permute.xlu0 %4966 }
0x10d9   :  { %v4973_v42 = vpop.permute.xlu1 %4972 }
0x10db   :  { %v4975_v52 = vpop.permute.xlu0 %4974 }
0x10dd   :  { %v4969_v49 = vpop.permute.xlu1 %4968 }
0x10de   :  { %v4982_v21 = vsel %vm1654_vm8, %v4969_v49, %v4973_v42  ;;  %v4984_v45 = vsel %vm1654_vm8, %v4965_v18, %v4969_v49 }
0x10df   :  { %v4971_v8 = vpop.permute.xlu0 %4970  ;;  %v4989_v31 = vmul.f32 %v4984_v45, %v7467_v17  ;;  %v4990_v13 = vmul.f32 %v4982_v21, %v7470_v15 }
0x10e0   :  { %v4983_v51 = vsel %vm1654_vm8, %v4971_v8, %v4975_v52  ;;  %v4985_v12 = vsel %vm1654_vm8, %v4967_v5, %v4971_v8 }
0x10e1   :  { %v4977_v60 = vpop.permute.xlu1 %4976  ;;  %v4994_v45 = vmul.f32 %v4983_v51, %v7470_v15 }
0x10e2   :  { %v4980_v30 = vsel %vm1654_vm8, %v4973_v42, %v4977_v60  ;;  %v4986_v41 = vsel %vm1654_vm8, %v4977_v60, %v4965_v18  ;;  %v4993_v60 = vmul.f32 %v4985_v12, %v7467_v17 }
0x10e3   :  { %v4979_v53 = vpop.permute.xlu0 %4978 }
0x10e4   :  { %v4981_v49 = vsel %vm1654_vm8, %v4975_v52, %v4979_v53  ;;  %v4987_v21 = vsel %vm1654_vm8, %v4979_v53, %v4967_v5  ;;  %v4988_v5 = vmul.f32 %v4986_v41, %v7473_v16 }
0x10e5   :  { %v4995_v17 = vmul.f32 %v4981_v49, %v9564_v59 }
0x10e9   :  { %v5102_v19 = vpop.permute.xlu1 %5101 }
0x10eb   :  { %v5104_v29 = vpop.permute.xlu0 %5103 }
0x10ed   :  { %v5110_v32 = vpop.permute.xlu1 %5109 }
0x10ef   :  { %v5112_v0 = vpop.permute.xlu0 %5111 }
0x10f1   :  { %v5106_v2 = vpop.permute.xlu1 %5105 }
0x10f2   :  { %v5119_v3 = vsel %vm1813_vm9, %v5106_v2, %v5110_v32  ;;  %v5121_v24 = vsel %vm1813_vm9, %v5102_v19, %v5106_v2 }
0x10f3   :  { %v5108_v25 = vpop.permute.xlu0 %5107 }
0x10f4   :  { %v5120_v37 = vsel %vm1813_vm9, %v5108_v25, %v5112_v0  ;;  %v5122_v6 = vsel %vm1813_vm9, %v5104_v29, %v5108_v25  ;;  %v5126_v25 = vmul.f32 %v5121_v24, %v7479_v39 }
0x10f5   :  { %v5114_v36 = vpop.permute.xlu1 %5113  ;;  %v5130_v52 = vmul.f32 %v5122_v6, %v7479_v39 }
0x10f6   :  { %v5123_v55 = vsel %vm1813_vm9, %v5114_v36, %v5102_v19  ;;  %v5117_v8 = vsel %vm1813_vm9, %v5110_v32, %v5114_v36  ;;  %v5127_v19 = vmul.f32 %v5119_v3, %v9541_v63  ;;  %v5131_v32 = vmul.f32 %v5120_v37, %v9541_v63 }
0x10f7   :  { %v5116_v9 = vpop.permute.xlu0 %5115  ;;  %v5125_v36 = vmul.f32 %v5123_v55, %v7489_v58  ;;  %v5128_v53 = vmul.f32 %v5117_v8, %v7492_v62  ;;  %v4991_v3 = vmul.f32 %v4980_v30, %v9564_v59 }
0x10f8   :  { %v5124_v42 = vsel %vm1813_vm9, %v5116_v9, %v5104_v29  ;;  %v5118_v18 = vsel %vm1813_vm9, %v5112_v0, %v5116_v9  ;;  %v4992_v0 = vmul.f32 %v4987_v21, %v7473_v16  ;;  %v5134_v9 = vadd.f32 %v5126_v25, %v4989_v31 }
0x10f9   :  { %v5129_v46 = vmul.f32 %v5124_v42, %v7489_v58  ;;  %v5132_v39 = vmul.f32 %v5118_v18, %v7492_v62  ;;  %v5135_v12 = vadd.f32 %v5127_v19, %v4990_v13  ;;  %v5138_v58 = vadd.f32 %v5130_v52, %v4993_v60 }
0x10fa   :  { %v5139_v24 = vadd.f32 %v5131_v32, %v4994_v45  ;;  %v5133_v30 = vadd.f32 %v5125_v36, %v4988_v5  ;;  %v5241_v62 = vmul.f32 %v9174_v23, %v9521_v43  ;;  %v5244_v31 = vmul.f32 %v9176_v26, %v9518_v7 }
0x10fb   :  { %v5136_v13 = vadd.f32 %v5128_v53, %v4991_v3  ;;  %v5137_v6 = vadd.f32 %v5129_v46, %v4992_v0  ;;  %v5140_v55 = vadd.f32 %v5132_v39, %v4995_v17  ;;  %v5245_v42 = vmul.f32 %v9178_v10, %v9521_v43 }
0x10fc   :  { %v5247_v21 = vadd.f32 %v5239_v50, %v5134_v9  ;;  %v5248_v25 = vadd.f32 %v5240_v54, %v5135_v12  ;;  %v5246_v7 = vadd.f32 %v5238_v44, %v5133_v30  ;;  %v5251_v26 = vadd.f32 %v5243_v48, %v5138_v58 }
0x10fd   :  { %v5252_v18 = vadd.f32 %v5244_v31, %v5139_v24  ;;  %v5250_v52 = vadd.f32 %v9214_v4, %v5137_v6  ;;  %v5249_v32 = vadd.f32 %v5241_v62, %v5136_v13  ;;  %v5253_v50 = vadd.f32 %v5245_v42, %v5140_v55 }
0x1111   :  { %v9196_v57 = vpop.permute.xlu1 %5351 }
0x1113   :  { %v9198_v40 = vpop.permute.xlu0 %5353 }
0x1115   :  { %v9200_v47 = vpop.permute.xlu1 %5359 }
0x1117   :  { %v9202_v11 = vpop.permute.xlu0 %5361 }
0x1119   :  { %v5356_v1 = vpop.permute.xlu1 %5355 }
0x111a   :  { %v5369_v15 = vsel %vm2106_vm10, %v5356_v1, %v9200_v47  ;;  %v5371_v51 = vsel %vm2106_vm10, %v9196_v57, %v5356_v1 }
0x111b   :  { %v5358_v38 = vpop.permute.xlu0 %5357  ;;  %v5375_v41 = vmul.f32 %v5371_v51, %v7538_v20  ;;  %v5376_v1 = vmul.f32 %v5369_v15, %v7541_v22 }
0x111c   :  { %v5372_v16 = vsel %vm2106_vm10, %v9198_v40, %v5358_v38  ;;  %v5370_v49 = vsel %vm2106_vm10, %v5358_v38, %v9202_v11 }
0x111d   :  { %v5364_v2 = vpop.permute.xlu1 %5363  ;;  %v5379_v23 = vmul.f32 %v5372_v16, %v7538_v20  ;;  %v5380_v38 = vmul.f32 %v5370_v49, %v7541_v22  ;;  %v5383_v10 = vadd.f32 %v5375_v41, %v5246_v7  ;;  %v5384_v20 = vadd.f32 %v5376_v1, %v5247_v21 }
0x111e   :  { %v5367_v19 = vsel %vm2106_vm10, %v9200_v47, %v5364_v2  ;;  %v5373_v43 = vsel %vm2106_vm10, %v5364_v2, %v9196_v57 }
0x111f   :  { %v5366_v29 = vpop.permute.xlu0 %5365  ;;  %v5387_v47 = vadd.f32 %v5379_v23, %v5250_v52  ;;  %v5377_v54 = vmul.f32 %v5367_v19, %v7544_v34  ;;  %v5378_v36 = vmul.f32 %v5373_v43, %v7549_v28  ;;  %v5388_v5 = vadd.f32 %v5380_v38, %v5251_v26 }
0x1120   :  { %v5368_v44 = vsel %vm2106_vm10, %v9202_v11, %v5366_v29  ;;  %v5374_v57 = vsel %vm2106_vm10, %v5366_v29, %v9198_v40 }
0x1121   :  { %v5381_v53 = vmul.f32 %v5368_v44, %v7544_v34  ;;  %v5385_v39 = vadd.f32 %v5377_v54, %v5248_v25  ;;  %v5382_v9 = vmul.f32 %v5374_v57, %v7549_v28  ;;  %v5386_v15 = vadd.f32 %v5378_v36, %v5249_v32 }
0x1123   :  { %v5389_v16 = vadd.f32 %v5381_v53, %v5252_v18  ;;  %v5390_v6 = vadd.f32 %v5382_v9, %v5253_v50  ;;  %v6122_v53 = vld [vmem:[%s9376_s10 + $0x38] sm:$0xff] }
0x1125   :  { %v5489_v63 = vpop.permute.xlu1 %5488 }
0x1127   :  { %v5491_v37 = vpop.permute.xlu0 %5490 }
0x1129   :  { %v5497_v8 = vpop.permute.xlu1 %5496 }
0x112b   :  { %v5499_v60 = vpop.permute.xlu0 %5498 }
0x112d   :  { %v5493_v48 = vpop.permute.xlu1 %5492 }
0x112e   :  { %v5506_v4 = vsel %vm2265_vm11, %v5493_v48, %v5497_v8  ;;  %v5508_v22 = vsel %vm2265_vm11, %v5489_v63, %v5493_v48 }
0x112f   :  { %v5512_v2 = vmul.f32 %v5508_v22, %v7553_v14  ;;  %v5513_v11 = vmul.f32 %v5506_v4, %v7626_v27  ;;  %v5495_v45 = vpop.permute.xlu0 %5494 }
0x1130   :  { %v5507_v46 = vsel %vm2265_vm11, %v5495_v45, %v5499_v60  ;;  %v5509_v59 = vsel %vm2265_vm11, %v5491_v37, %v5495_v45 }
0x1131   :  { %v5520_v3 = vadd.f32 %v5512_v2, %v5383_v10  ;;  %v5521_v0 = vadd.f32 %v5513_v11, %v5384_v20  ;;  %v5516_v17 = vmul.f32 %v5509_v59, %v7553_v14  ;;  %v5517_v40 = vmul.f32 %v5507_v46, %v7626_v27  ;;  %v5501_v29 = vpop.permute.xlu1 %5500  ;;  %v6125_v46 = vld [vmem:[%s9377_s12 + $0x30] sm:$0xff]  ;;  %v6126_v59 = vld [vmem:[%s9377_s12 + $0x38] sm:$0xff] }
0x1132   :  { %v5504_v12 = vsel %vm2265_vm11, %v5497_v8, %v5501_v29  ;;  %v5510_v34 = vsel %vm2265_vm11, %v5501_v29, %v5489_v63 }
0x1133   :  { %v5524_v51 = vadd.f32 %v5516_v17, %v5387_v47  ;;  %v5525_v58 = vadd.f32 %v5517_v40, %v5388_v5  ;;  %v5514_v24 = vmul.f32 %v5504_v12, %v7630_v56  ;;  %v5503_v30 = vpop.permute.xlu0 %5502  ;;  %v5515_v14 = vmul.f32 %v5510_v34, %v7637_v35  ;;  %v6121_v5 = vld [vmem:[%s9376_s10 + $0x30] sm:$0xff] }
0x1134   :  { %v5505_v27 = vsel %vm2265_vm11, %v5499_v60, %v5503_v30  ;;  %v5511_v28 = vsel %vm2265_vm11, %v5503_v30, %v5491_v37  ;;  %v5528_v62 = vadd.f32 %v5521_v0, %v5520_v3 }
0x1135   :  { %v5522_v31 = vadd.f32 %v5514_v24, %v5385_v39  ;;  %v5518_v13 = vmul.f32 %v5505_v27, %v7630_v56  ;;  %v5519_v63 = vmul.f32 %v5511_v28, %v7637_v35  ;;  %v5533_v55 = vadd.f32 %v5525_v58, %v5524_v51  ;;  %v6119_v56 = vld [vmem:[%s9375_s9 + $0x30] sm:$0xff] }
0x1136   :  { %v5523_v41 = vadd.f32 %v5515_v14, %v5386_v15 }
0x1137   :  { %v5526_v1 = vadd.f32 %v5518_v13, %v5389_v16  ;;  %v5529_v49 = vadd.f32 %v5528_v62, %v5522_v31  ;;  %v5527_v8 = vadd.f32 %v5519_v63, %v5390_v6 }
0x1139   :  { %v5530_v42 = vadd.f32 %v5529_v49, %v5523_v41  ;;  %v5534_v21 = vadd.f32 %v5533_v55, %v5526_v1 }
0x113b   :  { %5531 = vadd.xlane.f32.xlu1 %v5530_v42  ;;  %v5535_v23 = vadd.f32 %v5534_v21, %v5527_v8 }
0x113d   :  { %5536 = vadd.xlane.f32.xlu0 %v5535_v23 }
0x114c   :  { %5590 = vperm.xlu1 %6152, %v6120_v33  }
0x1153   :  { %5585 = vperm.xlu0 %6151, %v6119_v56  }
0x11c8   :  { %v5532_v35 = vpop.xlane.xlu1 %5531 }
0x11c9   :  { %v5538_v37 = vmul.f32 0.001953125, %v5532_v35 }
0x11ca   :  { %v5537_v25 = vpop.xlane.xlu0 %5536 }
0x11cb   :  { %v5540_v7 = vsub.f32 %v5520_v3, %v5538_v37  ;;  %v5541_v26 = vsub.f32 %v5521_v0, %v5538_v37  ;;  %v5539_v19 = vmul.f32 0.001953125, %v5537_v25  ;;  %v5542_v18 = vsub.f32 %v5522_v31, %v5538_v37  ;;  %v5749_v3 = vld [vmem:[%s9379_s14] sm:$0x7] }
0x11cc   :  { %v5543_v43 = vsub.f32 %v5523_v41, %v5538_v37  ;;  %v5591_v17 = vpop.permute.xlu1 %5590 }
0x11cd   :  { %v5544_v60 = vsub.f32 %v5524_v51, %v5539_v19  ;;  %v5545_v52 = vsub.f32 %v5525_v58, %v5539_v19  ;;  %v5546_v38 = vsub.f32 %v5526_v1, %v5539_v19  ;;  %v5548_v32 = vmul.f32 %v5540_v7, %v5540_v7 }
0x11ce   :  { %v5549_v10 = vmul.f32 %v5541_v26, %v5541_v26  ;;  %v5547_v20 = vsub.f32 %v5527_v8, %v5539_v19  ;;  %v5550_v48 = vmul.f32 %v5542_v18, %v5542_v18  ;;  %v5551_v22 = vmul.f32 %v5543_v43, %v5543_v43 }
0x11cf   :  { %v5552_v50 = vmul.f32 %v5544_v60, %v5544_v60  ;;  %v5553_v44 = vmul.f32 %v5545_v52, %v5545_v52  ;;  %v5554_v54 = vmul.f32 %v5546_v38, %v5546_v38 }
0x11d0   :  { %v5556_v47 = vadd.f32 %v5549_v10, %v5548_v32  ;;  %v5555_v57 = vmul.f32 %v5547_v20, %v5547_v20 }
0x11d1   :  { %v5561_v4 = vadd.f32 %v5553_v44, %v5552_v50 }
0x11d2   :  { %v5557_v36 = vadd.f32 %v5556_v47, %v5550_v48  ;;  %v5586_v0 = vpop.permute.xlu0 %5585  ;;  %v6372_v48 = vld [vmem:[%s9378_s11 + $0x18] sm:$0xff]  }
0x11d3   :  { %v5562_v2 = vadd.f32 %v5561_v4, %v5554_v54 }
0x11d4   :  { %v5558_v11 = vadd.f32 %v5557_v36, %v5551_v22 }
0x11d5   :  { %v5563_v45 = vadd.f32 %v5562_v2, %v5555_v57 }
0x11d6   :  { %5559 = vadd.xlane.f32.xlu0 %v5558_v11 }
0x11d7   :  { %5564 = vadd.xlane.f32.xlu1 %v5563_v45 }
0x11e8   :  { %5606 = vperm.xlu1 %6152, %v6121_v5  }
0x11ec   :  { %5611 = vperm.xlu0 %6151, %v6122_v53   ;;  %5642 = vperm.xlu1 %6152, %v6125_v46  }
0x11f0   :  { %5647 = vperm.xlu0 %6151, %v6126_v59   ;;  %5752 = vperm.xlu1 %6152, %v5749_v3  }
0x1263   :  { %v5560_v40 = vpop.xlane.xlu0 %5559 }
0x1264   :  { %v5566_v29 = vmul.f32 0.001953125, %v5560_v40  ;;  %v5565_v39 = vpop.xlane.xlu1 %5564 }
0x1265   :  { %v5567_v9 = vmul.f32 0.001953125, %v5565_v39 }
0x1266   :  { %v5568_v12 = vadd.f32 1e-05, %v5566_v29 }
0x1267   :  { %v5569_v34 = vadd.f32 1e-05, %v5567_v9 }
0x1268   :  { %6385 = vrsqrt.f32 %v5568_v12  ;;  %v5607_v55 = vpop.permute.xlu1 %5606 }
0x1269   :  { %6387 = vrsqrt.f32 %v5569_v34  ;;  %v5744_v34 = vld [vmem:[%s9380_s13] sm:$0x3] }
0x126b   :  { %v5612_v56 = vpop.permute.xlu0 %5611 }
0x126c   :  { %v5643_v47 = vpop.permute.xlu1 %5642 }
0x126f   :  { %v5648_v54 = vpop.permute.xlu0 %5647 }
0x1272   :  { %v6386_v15 = vpop.eup %6385 }
0x1273   :  { %v6388_v51 = vpop.eup %6387  ;;  %v5572_v58 = vmul.f32 %v6386_v15, %v5540_v7  ;;  %v5573_v24 = vmul.f32 %v6386_v15, %v5541_v26  ;;  %v5574_v30 = vmul.f32 %v6386_v15, %v5542_v18  ;;  %v5575_v16 = vmul.f32 %v6386_v15, %v5543_v43  ;;  %v5753_v15 = vpop.permute.xlu1 %5752 }
0x1274   :  { %v5576_v14 = vmul.f32 %v6388_v51, %v5544_v60  ;;  %v5577_v27 = vmul.f32 %v6388_v51, %v5545_v52  ;;  %v5578_v28 = vmul.f32 %v6388_v51, %v5546_v38  ;;  %v5579_v62 = vmul.f32 %v6388_v51, %v5547_v20 }
0x1275   :  { %v5593_v31 = vmul.f32 %v5586_v0, %v5572_v58  ;;  %v5594_v13 = vmul.f32 %v5586_v0, %v5573_v24  ;;  %v5595_v63 = vmul.f32 %v5586_v0, %v5574_v30  ;;  %v5596_v6 = vmul.f32 %v5586_v0, %v5575_v16 }
0x1276   :  { %v5597_v41 = vmul.f32 %v5591_v17, %v5576_v14  ;;  %v5598_v1 = vmul.f32 %v5591_v17, %v5577_v27  ;;  %v5599_v49 = vmul.f32 %v5591_v17, %v5578_v28  ;;  %v5600_v8 = vmul.f32 %v5591_v17, %v5579_v62 }
0x1277   :  { %v5614_v42 = vadd.f32 %v5607_v55, %v5593_v31  ;;  %v5615_v21 = vadd.f32 %v5607_v55, %v5594_v13  ;;  %v5616_v23 = vadd.f32 %v5607_v55, %v5595_v63  ;;  %v5617_v33 = vadd.f32 %v5607_v55, %v5596_v6 }
0x1278   :  { %v5618_v35 = vadd.f32 %v5612_v56, %v5597_v41  ;;  %v5619_v37 = vadd.f32 %v5612_v56, %v5598_v1  ;;  %v5620_v25 = vadd.f32 %v5612_v56, %v5599_v49  ;;  %v5621_v7 = vadd.f32 %v5612_v56, %v5600_v8 }
0x1279   :  { %v5622_v26 = vmax.f32 %v5614_v42, 0.0  ;;  %v5624_v19 = vmax.f32 %v5616_v23, 0.0  ;;  %v5623_v18 = vmax.f32 %v5615_v21, 0.0  ;;  %v5625_v60 = vmax.f32 %v5617_v33, 0.0 }
0x127a   :  { %v5626_v52 = vmax.f32 %v5618_v35, 0.0  ;;  %v5628_v38 = vmax.f32 %v5620_v25, 0.0  ;;  %v5627_v32 = vmax.f32 %v5619_v37, 0.0  ;;  %v5629_v43 = vmax.f32 %v5621_v7, 0.0 }
0x127c   :  { %v5634_v10 = vpack.c.bf16 %v5627_v32, %v5623_v18  ;;  %v5636_v20 = vpack.c.bf16 %v5629_v43, %v5625_v60  ;;  %v5633_v50 = vpack.c.bf16 %v5626_v52, %v5622_v26  ;;  %v5635_v44 = vpack.c.bf16 %v5628_v38, %v5624_v19 }
0x127e   :  { %5658 = vmatprep.subr.bf16.mxu0 %v5634_v10  ;;  %5701 = vmatprep.subr.bf16.mxu1 %v5636_v20 }
0x127f   :  { %5659 = vmatpush1.bf16.msra.mxu0 %v5633_v50  ;;  %5702 = vmatpush1.bf16.msra.mxu1 %v5635_v44 }
0x1282   :  { %6128 = vmatmul.mubr.msk.bf16.vlgmr.msra.gmra.mrb[100].mxu0 %vm2435_vm12, %v6372_v48  ;;  %6129 = vmatmul.mubr.msk.bf16.vlgmr.msra.gmra.mrb[100].mxu1 %vm2435_vm12, %v6372_v48 }
0x1283   :  { %5790 = vmatprep.mubr.bf16.mxu0 %v9499_v61  ;;  %5831 = vmatprep.mubr.bf16.mxu1 %v9499_v61 }
0x1355   :  { %v5692_v4 = vpop.f32.mrb[100].mxu0  ;;  %v5735_v22 = vpop.f32.mrb[100].mxu1 }
0x1356   :  { %v5694_v36 = vpop.f32.mrb[101].mxu0  ;;  %v5737_v57 = vpop.f32.mrb[101].mxu1  ;;  %v5693_v45 = vadd.f32 %v5692_v4, %v5643_v47  ;;  %v5736_v5 = vadd.f32 %v5735_v22, %v5643_v47 }
0x1357   :  { %v5696_v2 = vpop.f32.mrb[102].mxu0  ;;  %v5739_v11 = vpop.f32.mrb[102].mxu1  ;;  %v5695_v0 = vadd.f32 %v5694_v36, %v5643_v47  ;;  %v5738_v17 = vadd.f32 %v5737_v57, %v5643_v47 }
0x1358   :  { %v5697_v53 = vadd.f32 %v5696_v2, %v5648_v54  ;;  %v5740_v46 = vadd.f32 %v5739_v11, %v5648_v54  ;;  %v5698_v59 = vpop.f32.mrb[103].mxu0  ;;  %v5741_v3 = vpop.f32.mrb[103].mxu1 }
0x1359   :  { %v5699_v40 = vadd.f32 %v5698_v59, %v5648_v54  ;;  %v5742_v29 = vadd.f32 %v5741_v3, %v5648_v54 }
0x135a   :  { %v5745_v39 = vpack.c.bf16 %v5697_v53, %v5693_v45  ;;  %v5747_v61 = vpack.c.bf16 %v5740_v46, %v5736_v5 }
0x135b   :  { %v5746_v9 = vpack.c.bf16 %v5699_v40, %v5695_v0  ;;  %v5748_v12 = vpack.c.bf16 %v5742_v29, %v5738_v17 }
0x135d   :  { %5758 = vmatprep.subr.bf16.mxu0 %v5746_v9  ;;  %5799 = vmatprep.subr.bf16.mxu1 %v5748_v12 }
0x135e   :  { %5759 = vmatpush1.bf16.msra.mxu0 %v5745_v39  ;;  %5800 = vmatpush1.bf16.msra.mxu1 %v5747_v61 }
0x1361   :  { %6130 = vmatmul.mubr.msk.bf16.vlgmr.msra.gmra.mrb[104].mxu0 %vm2435_vm12, %v5744_v34  ;;  %6131 = vmatmul.mubr.msk.bf16.vlgmr.msra.gmra.mrb[104].mxu1 %vm2435_vm12, %v5744_v34 }
0x1434   :  { %v5792_v51 = vpop.f32.mrb[104].mxu0  ;;  %v5833_v58 = vpop.f32.mrb[104].mxu1 }
0x1435   :  { %v5793_v24 = vadd.f32 %v5792_v51, %v5753_v15  ;;  %v5834_v30 = vadd.f32 %v5833_v58, %v5753_v15  ;;  %v5794_v16 = vpop.f32.mrb[105].mxu0  ;;  %v5835_v14 = vpop.f32.mrb[105].mxu1 }
0x1436   :  { %v5795_v27 = vadd.f32 %v5794_v16, %v5753_v15  ;;  %v5836_v28 = vadd.f32 %v5835_v14, %v5753_v15  ;;  %v5796_v62 = vpop.f32.mrb[106].mxu0  ;;  %v5837_v31 = vpop.f32.mrb[106].mxu1 }
0x1437   :  { %v5797_v13 = vpop.f32.mrb[107].mxu0  ;;  %v5838_v63 = vpop.f32.mrb[107].mxu1 }
0x1438   :  { %v5844_v6 = vcombine.low %v5793_v24, %v5795_v27  ;;  %v5845_v55 = vcombine.low %v5834_v30, %v5836_v28 }
0x143a   :  { %5848 = vst [vmem:[%s9381_s15] sm:$0x77] %v5844_v6  ;;  %5849 = vst [vmem:[%s9381_s15 + $0x8] sm:$0x77] %v5845_v55 }

</bundles_post_ra>
